<compile_context>
chip_gen: v5e
topology: v5e:2x2
jax: 0.10.0
libtpu: 0.0.40
codegen_flags: <defaults>
</compile_context>

<pallas_src>
import math
import jax
import jax.numpy as jnp
from jax.experimental import pallas as pl
from jax.experimental.pallas import tpu as pltpu

D_IN = 3
D_OUT = 5
D_HIDDEN = 32
N_LAYERS = 8
SKIP_IN = (4,)
SCALE = 1.0
SQRT2 = math.sqrt(2.0)


def _round_up(x, m):
    return ((x + m - 1) // m) * m


def _layer_specs():
    dims = [D_IN] + [D_HIDDEN] * N_LAYERS + [D_OUT]
    num_layers = len(dims)
    specs = []
    for l in range(num_layers - 1):
        if l + 1 in SKIP_IN:
            out_dim = dims[l + 1] - dims[0]   # layer before the skip outputs d_hidden - d_in
        else:
            out_dim = dims[l + 1]
        specs.append((dims[l], out_dim))
    return dims, specs


def init_params(key):
    """Deterministic init mirroring the reachable PyTorch init path (multires=0).

    Note: in the reference code the geometric last-layer branch is guarded by
    `geometric_init and l != num_layers - 2`, so the last layer actually falls
    through to the `else` branch: W ~ N(0, 1e-4), b = 0. Hidden layers use
    W ~ N(0, sqrt(2)/sqrt(out_dim)), b = 0. weight_norm is identity at init.
    """
    dims, specs = _layer_specs()
    num_layers = len(dims)
    params = []
    for l, (din, dout) in enumerate(specs):
        key, wk = jax.random.split(key)
        if l != num_layers - 2:
            std = math.sqrt(2.0) / math.sqrt(dout)
        else:
            std = 1e-4
        w = (std * jax.random.normal(wk, (din, dout))).astype(jnp.float32)  # [in, out]
        b = jnp.zeros((1, dout), dtype=jnp.float32)
        params.append((w, b))
    return params


def _softplus_beta100(x):
    # torch.nn.Softplus(beta=100, threshold=20): log1p(exp(100*x))/100,
    # linear when 100*x > 20.
    z = 100.0 * x
    safe = jnp.minimum(z, 20.0)          # keep the masked branch finite
    return jnp.where(z > 20.0, x, jnp.log1p(jnp.exp(safe)) * (1.0 / 100.0))


def _make_kernel(n_lin, compute_dtype):
    def kernel(x_ref, *refs):
        o_ref = refs[-1]
        p_refs = refs[:-1]

        xin = x_ref[...]                     # [d_in, tile_n], f32
        if SCALE != 1.0:
            xin = xin * SCALE
        x_mm = xin.astype(compute_dtype)

        h = x_mm
        idx = 0
        for l in range(n_lin):
            if l in SKIP_IN:
                # skip layer: concat replaced by split weights (1/sqrt(2) folded in)
                wa = p_refs[idx][...]        # [out, k_h]
                wb = p_refs[idx + 1][...]    # [out, d_in]
                b = p_refs[idx + 2][...]     # [out, 1], f32
                idx += 3
                pre = (jnp.dot(wa, h, preferred_element_type=jnp.float32)
                       + jnp.dot(wb, x_mm, preferred_element_type=jnp.float32)
                       + b)
            else:
                w = p_refs[idx][...]         # [out, in]
                b = p_refs[idx + 1][...]     # [out, 1], f32
                idx += 2
                pre = jnp.dot(w, h, preferred_element_type=jnp.float32) + b
            if l < n_lin - 1:
                h = _softplus_beta100(pre).astype(compute_dtype)
            else:
                h = pre                      # last layer stays f32

        # final: cat([x[:, :1] / scale, x[:, 1:]]) -> row-0 rescale (no-op for scale==1)
        if SCALE != 1.0:
            row = jax.lax.broadcasted_iota(jnp.int32, h.shape, 0)
            h = jnp.where(row == 0, h * (1.0 / SCALE), h)
        o_ref[...] = h.astype(o_ref.dtype)

    return kernel


def _prepare_kernel_params(params, compute_dtype):
    """Transpose weights to [out, in], fold 1/sqrt(2) into the skip layer, split it."""
    flat = []
    for l, (w, b) in enumerate(params):
        wt = w.T                                  # [out, in]
        bt = b.T.astype(jnp.float32)              # [out, 1]
        if l in SKIP_IN:
            k_h = w.shape[0] - D_IN               # hidden part of the concatenated input
            wa = (wt[:, :k_h] * (1.0 / SQRT2)).astype(compute_dtype)
            wb = (wt[:, k_h:] * (1.0 / SQRT2)).astype(compute_dtype)
            flat += [wa, wb, bt]
        else:
            flat += [wt.astype(compute_dtype), bt]
    return flat


def sdf_forward(x, params, *, tile_n=2048, compute_dtype=jnp.bfloat16):
    """x: [N, d_in] float32 -> [N, d_out] float32."""
    N, d_in = x.shape
    assert d_in == D_IN
    d_out = params[-1][0].shape[1]
    n_lin = len(params)

    # Lane-tile sizing: multiple of 128, capped at (padded) N; pad ragged N.
    tile_n = max(128, _round_up(min(tile_n, _round_up(N, 128)), 128))
    n_pad = _round_up(N, tile_n)
    grid_steps = n_pad // tile_n

    xT = jnp.asarray(x, jnp.float32).T            # [d_in, N]
    if n_pad != N:
        xT = jnp.pad(xT, ((0, 0), (0, n_pad - N)))

    flat = _prepare_kernel_params(params, compute_dtype)

    in_specs = [pl.BlockSpec((d_in, tile_n), lambda i: (0, i))]
    for a in flat:
        in_specs.append(pl.BlockSpec(a.shape, lambda i: (0, 0)))
    out_spec = pl.BlockSpec((d_out, tile_n), lambda i: (0, i))

    # Advisory cost estimate for XLA's scheduler.
    flops_per_row = 0
    trans_per_row = 0
    for l, (w, _) in enumerate(params):
        din, dout = w.shape
        flops_per_row += 2 * din * dout
        if l < n_lin - 1:
            trans_per_row += 2 * dout             # exp + log1p per activated element
    bytes_accessed = (xT.size * 4 + d_out * n_pad * 4
                      + sum(int(a.size) * a.dtype.itemsize for a in flat) * grid_steps)
    cost = pl.CostEstimate(flops=int(flops_per_row * n_pad),
                           transcendentals=int(trans_per_row * n_pad),
                           bytes_accessed=int(bytes_accessed))

    outT = pl.pallas_call(
        _make_kernel(n_lin, compute_dtype),
        out_shape=jax.ShapeDtypeStruct((d_out, n_pad), jnp.float32),
        grid_spec=pltpu.PrefetchScalarGridSpec(
            num_scalar_prefetch=0,
            grid=(grid_steps,),
            in_specs=in_specs,
            out_specs=out_spec,
        ),
        compiler_params=pltpu.CompilerParams(
            dimension_semantics=("parallel",)),   # shard grid across TCs on v7x
        cost_estimate=cost,
    )(xT, *flat)

    return outT[:, :N].T                          # back to [N, d_out]


def sdf_reference(x, params):
    """Pure-JAX f32 reference of the same forward (for correctness check)."""
    inputs = x * SCALE
    h = inputs
    n_lin = len(params)
    for l, (w, b) in enumerate(params):
        if l in SKIP_IN:
            h = jnp.concatenate([h, inputs], axis=1) / SQRT2
        h = h @ w + b
        if l < n_lin - 1:
            h = _softplus_beta100(h)
    return jnp.concatenate([h[:, :1] / SCALE, h[:, 1:]], axis=1)


if __name__ == "__main__":
    key = jax.random.PRNGKey(0)
    pkey, xkey = jax.random.split(key)

    params = init_params(pkey)
    N = 1000                                  # deliberately ragged vs. the 512-lane tile
    x = jax.random.normal(xkey, (N, D_IN), dtype=jnp.float32)

    ref = sdf_reference(x, params)

    # f32 path: tight check of kernel layout / skip-split / padding logic.
    out_f32 = jax.block_until_ready(
        sdf_forward(x, params, tile_n=512, compute_dtype=jnp.float32))
    assert out_f32.shape == (N, D_OUT), out_f32.shape
    assert jnp.allclose(out_f32, ref, atol=1e-5, rtol=1e-5), \
        float(jnp.max(jnp.abs(out_f32 - ref)))

    # bf16-matmul fast path (f32 accumulation): loose numerical check.
    out_bf16 = jax.block_until_ready(
        sdf_forward(x, params, tile_n=512, compute_dtype=jnp.bfloat16))
    assert out_bf16.shape == (N, D_OUT), out_bf16.shape
    assert jnp.allclose(out_bf16, ref, atol=1e-4, rtol=2e-2), \
        float(jnp.max(jnp.abs(out_bf16 - ref)))

    print("KERNEL_OK")
</pallas_src>

<mosaic_0001>
module attributes {stable_mosaic.version = 11 : i64} {
  func.func @kernel(%arg0: i32, %arg1: memref<3x512xf32, #tpu.memory_space<vmem>>, %arg2: memref<32x3xf32, #tpu.memory_space<vmem>>, %arg3: memref<32x1xf32, #tpu.memory_space<vmem>>, %arg4: memref<32x32xf32, #tpu.memory_space<vmem>>, %arg5: memref<32x1xf32, #tpu.memory_space<vmem>>, %arg6: memref<32x32xf32, #tpu.memory_space<vmem>>, %arg7: memref<32x1xf32, #tpu.memory_space<vmem>>, %arg8: memref<29x32xf32, #tpu.memory_space<vmem>>, %arg9: memref<29x1xf32, #tpu.memory_space<vmem>>, %arg10: memref<32x29xf32, #tpu.memory_space<vmem>>, %arg11: memref<32x3xf32, #tpu.memory_space<vmem>>, %arg12: memref<32x1xf32, #tpu.memory_space<vmem>>, %arg13: memref<32x32xf32, #tpu.memory_space<vmem>>, %arg14: memref<32x1xf32, #tpu.memory_space<vmem>>, %arg15: memref<32x32xf32, #tpu.memory_space<vmem>>, %arg16: memref<32x1xf32, #tpu.memory_space<vmem>>, %arg17: memref<32x32xf32, #tpu.memory_space<vmem>>, %arg18: memref<32x1xf32, #tpu.memory_space<vmem>>, %arg19: memref<5x32xf32, #tpu.memory_space<vmem>>, %arg20: memref<5x1xf32, #tpu.memory_space<vmem>>, %arg21: memref<5x512xf32, #tpu.memory_space<vmem>>) attributes {dimension_semantics = [#tpu.dimension_semantics<parallel>], iteration_bounds = array<i64: 2>, scalar_prefetch = 0 : i64, scratch_operands = 0 : i64, tpu.core_type = #tpu.core_type<tc>, window_params = [{transform_indices = @transform_0, window_bounds = array<i64: 3, 512>}, {pipeline_mode = #tpu.pipeline_mode<synchronous>, transform_indices = @transform_1, window_bounds = array<i64: 32, 3>}, {pipeline_mode = #tpu.pipeline_mode<synchronous>, transform_indices = @transform_2, window_bounds = array<i64: 32, 1>}, {pipeline_mode = #tpu.pipeline_mode<synchronous>, transform_indices = @transform_3, window_bounds = array<i64: 32, 32>}, {pipeline_mode = #tpu.pipeline_mode<synchronous>, transform_indices = @transform_4, window_bounds = array<i64: 32, 1>}, {pipeline_mode = #tpu.pipeline_mode<synchronous>, transform_indices = @transform_5, window_bounds = array<i64: 32, 32>}, {pipeline_mode = #tpu.pipeline_mode<synchronous>, transform_indices = @transform_6, window_bounds = array<i64: 32, 1>}, {pipeline_mode = #tpu.pipeline_mode<synchronous>, transform_indices = @transform_7, window_bounds = array<i64: 29, 32>}, {pipeline_mode = #tpu.pipeline_mode<synchronous>, transform_indices = @transform_8, window_bounds = array<i64: 29, 1>}, {pipeline_mode = #tpu.pipeline_mode<synchronous>, transform_indices = @transform_9, window_bounds = array<i64: 32, 29>}, {pipeline_mode = #tpu.pipeline_mode<synchronous>, transform_indices = @transform_10, window_bounds = array<i64: 32, 3>}, {pipeline_mode = #tpu.pipeline_mode<synchronous>, transform_indices = @transform_11, window_bounds = array<i64: 32, 1>}, {pipeline_mode = #tpu.pipeline_mode<synchronous>, transform_indices = @transform_12, window_bounds = array<i64: 32, 32>}, {pipeline_mode = #tpu.pipeline_mode<synchronous>, transform_indices = @transform_13, window_bounds = array<i64: 32, 1>}, {pipeline_mode = #tpu.pipeline_mode<synchronous>, transform_indices = @transform_14, window_bounds = array<i64: 32, 32>}, {pipeline_mode = #tpu.pipeline_mode<synchronous>, transform_indices = @transform_15, window_bounds = array<i64: 32, 1>}, {pipeline_mode = #tpu.pipeline_mode<synchronous>, transform_indices = @transform_16, window_bounds = array<i64: 32, 32>}, {pipeline_mode = #tpu.pipeline_mode<synchronous>, transform_indices = @transform_17, window_bounds = array<i64: 32, 1>}, {pipeline_mode = #tpu.pipeline_mode<synchronous>, transform_indices = @transform_18, window_bounds = array<i64: 5, 32>}, {pipeline_mode = #tpu.pipeline_mode<synchronous>, transform_indices = @transform_19, window_bounds = array<i64: 5, 1>}, {transform_indices = @transform_20, window_bounds = array<i64: 5, 512>}]} {
    %c0 = arith.constant 0 : index
    %c0_0 = arith.constant 0 : index
    %0 = vector.load %arg1[%c0, %c0_0] : memref<3x512xf32, #tpu.memory_space<vmem>>, vector<3x512xf32>
    %c0_1 = arith.constant 0 : index
    %c0_2 = arith.constant 0 : index
    %1 = vector.load %arg2[%c0_1, %c0_2] : memref<32x3xf32, #tpu.memory_space<vmem>>, vector<32x3xf32>
    %c0_3 = arith.constant 0 : index
    %c0_4 = arith.constant 0 : index
    %2 = vector.load %arg3[%c0_3, %c0_4] : memref<32x1xf32, #tpu.memory_space<vmem>>, vector<32x1xf32>
    %cst = arith.constant dense<0.000000e+00> : vector<32x512xf32>
    %3 = tpu.matmul %1, %0, %cst {dimension_numbers = #tpu.dot_dimension_numbers<[1], [0], [0], [1], [0, 0, 1, 1], [], []>} : vector<32x3xf32>, vector<3x512xf32>, vector<32x512xf32> -> vector<32x512xf32>
    %4 = vector.broadcast %2 : vector<32x1xf32> to vector<32x512xf32>
    %5 = arith.addf %3, %4 : vector<32x512xf32>
    %cst_5 = arith.constant 1.000000e+02 : f32
    %6 = vector.broadcast %cst_5 : f32 to vector<32x512xf32>
    %7 = arith.mulf %6, %5 : vector<32x512xf32>
    %cst_6 = arith.constant 2.000000e+01 : f32
    %8 = vector.broadcast %cst_6 : f32 to vector<32x512xf32>
    %9 = arith.minimumf %7, %8 : vector<32x512xf32>
    %cst_7 = arith.constant 2.000000e+01 : f32
    %10 = vector.broadcast %cst_7 : f32 to vector<32x512xf32>
    %11 = arith.cmpf ogt, %7, %10 : vector<32x512xf32>
    %12 = math.exp %9 : vector<32x512xf32>
    %13 = math.log1p %12 : vector<32x512xf32>
    %cst_8 = arith.constant 0.00999999977 : f32
    %14 = vector.broadcast %cst_8 : f32 to vector<32x512xf32>
    %15 = arith.mulf %13, %14 : vector<32x512xf32>
    %16 = arith.select %11, %5, %15 : vector<32x512xi1>, vector<32x512xf32>
    %c0_9 = arith.constant 0 : index
    %c0_10 = arith.constant 0 : index
    %17 = vector.load %arg4[%c0_9, %c0_10] : memref<32x32xf32, #tpu.memory_space<vmem>>, vector<32x32xf32>
    %c0_11 = arith.constant 0 : index
    %c0_12 = arith.constant 0 : index
    %18 = vector.load %arg5[%c0_11, %c0_12] : memref<32x1xf32, #tpu.memory_space<vmem>>, vector<32x1xf32>
    %cst_13 = arith.constant dense<0.000000e+00> : vector<32x512xf32>
    %19 = tpu.matmul %17, %16, %cst_13 {dimension_numbers = #tpu.dot_dimension_numbers<[1], [0], [0], [1], [0, 0, 1, 1], [], []>} : vector<32x32xf32>, vector<32x512xf32>, vector<32x512xf32> -> vector<32x512xf32>
    %20 = vector.broadcast %18 : vector<32x1xf32> to vector<32x512xf32>
    %21 = arith.addf %19, %20 : vector<32x512xf32>
    %cst_14 = arith.constant 1.000000e+02 : f32
    %22 = vector.broadcast %cst_14 : f32 to vector<32x512xf32>
    %23 = arith.mulf %22, %21 : vector<32x512xf32>
    %cst_15 = arith.constant 2.000000e+01 : f32
    %24 = vector.broadcast %cst_15 : f32 to vector<32x512xf32>
    %25 = arith.minimumf %23, %24 : vector<32x512xf32>
    %cst_16 = arith.constant 2.000000e+01 : f32
    %26 = vector.broadcast %cst_16 : f32 to vector<32x512xf32>
    %27 = arith.cmpf ogt, %23, %26 : vector<32x512xf32>
    %28 = math.exp %25 : vector<32x512xf32>
    %29 = math.log1p %28 : vector<32x512xf32>
    %cst_17 = arith.constant 0.00999999977 : f32
    %30 = vector.broadcast %cst_17 : f32 to vector<32x512xf32>
    %31 = arith.mulf %29, %30 : vector<32x512xf32>
    %32 = arith.select %27, %21, %31 : vector<32x512xi1>, vector<32x512xf32>
    %c0_18 = arith.constant 0 : index
    %c0_19 = arith.constant 0 : index
    %33 = vector.load %arg6[%c0_18, %c0_19] : memref<32x32xf32, #tpu.memory_space<vmem>>, vector<32x32xf32>
    %c0_20 = arith.constant 0 : index
    %c0_21 = arith.constant 0 : index
    %34 = vector.load %arg7[%c0_20, %c0_21] : memref<32x1xf32, #tpu.memory_space<vmem>>, vector<32x1xf32>
    %cst_22 = arith.constant dense<0.000000e+00> : vector<32x512xf32>
    %35 = tpu.matmul %33, %32, %cst_22 {dimension_numbers = #tpu.dot_dimension_numbers<[1], [0], [0], [1], [0, 0, 1, 1], [], []>} : vector<32x32xf32>, vector<32x512xf32>, vector<32x512xf32> -> vector<32x512xf32>
    %36 = vector.broadcast %34 : vector<32x1xf32> to vector<32x512xf32>
    %37 = arith.addf %35, %36 : vector<32x512xf32>
    %cst_23 = arith.constant 1.000000e+02 : f32
    %38 = vector.broadcast %cst_23 : f32 to vector<32x512xf32>
    %39 = arith.mulf %38, %37 : vector<32x512xf32>
    %cst_24 = arith.constant 2.000000e+01 : f32
    %40 = vector.broadcast %cst_24 : f32 to vector<32x512xf32>
    %41 = arith.minimumf %39, %40 : vector<32x512xf32>
    %cst_25 = arith.constant 2.000000e+01 : f32
    %42 = vector.broadcast %cst_25 : f32 to vector<32x512xf32>
    %43 = arith.cmpf ogt, %39, %42 : vector<32x512xf32>
    %44 = math.exp %41 : vector<32x512xf32>
    %45 = math.log1p %44 : vector<32x512xf32>
    %cst_26 = arith.constant 0.00999999977 : f32
    %46 = vector.broadcast %cst_26 : f32 to vector<32x512xf32>
    %47 = arith.mulf %45, %46 : vector<32x512xf32>
    %48 = arith.select %43, %37, %47 : vector<32x512xi1>, vector<32x512xf32>
    %c0_27 = arith.constant 0 : index
    %c0_28 = arith.constant 0 : index
    %49 = vector.load %arg8[%c0_27, %c0_28] : memref<29x32xf32, #tpu.memory_space<vmem>>, vector<29x32xf32>
    %c0_29 = arith.constant 0 : index
    %c0_30 = arith.constant 0 : index
    %50 = vector.load %arg9[%c0_29, %c0_30] : memref<29x1xf32, #tpu.memory_space<vmem>>, vector<29x1xf32>
    %cst_31 = arith.constant dense<0.000000e+00> : vector<29x512xf32>
    %51 = tpu.matmul %49, %48, %cst_31 {dimension_numbers = #tpu.dot_dimension_numbers<[1], [0], [0], [1], [0, 0, 1, 1], [], []>} : vector<29x32xf32>, vector<32x512xf32>, vector<29x512xf32> -> vector<29x512xf32>
    %52 = vector.broadcast %50 : vector<29x1xf32> to vector<29x512xf32>
    %53 = arith.addf %51, %52 : vector<29x512xf32>
    %cst_32 = arith.constant 1.000000e+02 : f32
    %54 = vector.broadcast %cst_32 : f32 to vector<29x512xf32>
    %55 = arith.mulf %54, %53 : vector<29x512xf32>
    %cst_33 = arith.constant 2.000000e+01 : f32
    %56 = vector.broadcast %cst_33 : f32 to vector<29x512xf32>
    %57 = arith.minimumf %55, %56 : vector<29x512xf32>
    %cst_34 = arith.constant 2.000000e+01 : f32
    %58 = vector.broadcast %cst_34 : f32 to vector<29x512xf32>
    %59 = arith.cmpf ogt, %55, %58 : vector<29x512xf32>
    %60 = math.exp %57 : vector<29x512xf32>
    %61 = math.log1p %60 : vector<29x512xf32>
    %cst_35 = arith.constant 0.00999999977 : f32
    %62 = vector.broadcast %cst_35 : f32 to vector<29x512xf32>
    %63 = arith.mulf %61, %62 : vector<29x512xf32>
    %64 = arith.select %59, %53, %63 : vector<29x512xi1>, vector<29x512xf32>
    %c0_36 = arith.constant 0 : index
    %c0_37 = arith.constant 0 : index
    %65 = vector.load %arg10[%c0_36, %c0_37] : memref<32x29xf32, #tpu.memory_space<vmem>>, vector<32x29xf32>
    %c0_38 = arith.constant 0 : index
    %c0_39 = arith.constant 0 : index
    %66 = vector.load %arg11[%c0_38, %c0_39] : memref<32x3xf32, #tpu.memory_space<vmem>>, vector<32x3xf32>
    %c0_40 = arith.constant 0 : index
    %c0_41 = arith.constant 0 : index
    %67 = vector.load %arg12[%c0_40, %c0_41] : memref<32x1xf32, #tpu.memory_space<vmem>>, vector<32x1xf32>
    %cst_42 = arith.constant dense<0.000000e+00> : vector<32x512xf32>
    %68 = tpu.matmul %65, %64, %cst_42 {dimension_numbers = #tpu.dot_dimension_numbers<[1], [0], [0], [1], [0, 0, 1, 1], [], []>} : vector<32x29xf32>, vector<29x512xf32>, vector<32x512xf32> -> vector<32x512xf32>
    %cst_43 = arith.constant dense<0.000000e+00> : vector<32x512xf32>
    %69 = tpu.matmul %66, %0, %cst_43 {dimension_numbers = #tpu.dot_dimension_numbers<[1], [0], [0], [1], [0, 0, 1, 1], [], []>} : vector<32x3xf32>, vector<3x512xf32>, vector<32x512xf32> -> vector<32x512xf32>
    %70 = arith.addf %68, %69 : vector<32x512xf32>
    %71 = vector.broadcast %67 : vector<32x1xf32> to vector<32x512xf32>
    %72 = arith.addf %70, %71 : vector<32x512xf32>
    %cst_44 = arith.constant 1.000000e+02 : f32
    %73 = vector.broadcast %cst_44 : f32 to vector<32x512xf32>
    %74 = arith.mulf %73, %72 : vector<32x512xf32>
    %cst_45 = arith.constant 2.000000e+01 : f32
    %75 = vector.broadcast %cst_45 : f32 to vector<32x512xf32>
    %76 = arith.minimumf %74, %75 : vector<32x512xf32>
    %cst_46 = arith.constant 2.000000e+01 : f32
    %77 = vector.broadcast %cst_46 : f32 to vector<32x512xf32>
    %78 = arith.cmpf ogt, %74, %77 : vector<32x512xf32>
    %79 = math.exp %76 : vector<32x512xf32>
    %80 = math.log1p %79 : vector<32x512xf32>
    %cst_47 = arith.constant 0.00999999977 : f32
    %81 = vector.broadcast %cst_47 : f32 to vector<32x512xf32>
    %82 = arith.mulf %80, %81 : vector<32x512xf32>
    %83 = arith.select %78, %72, %82 : vector<32x512xi1>, vector<32x512xf32>
    %c0_48 = arith.constant 0 : index
    %c0_49 = arith.constant 0 : index
    %84 = vector.load %arg13[%c0_48, %c0_49] : memref<32x32xf32, #tpu.memory_space<vmem>>, vector<32x32xf32>
    %c0_50 = arith.constant 0 : index
    %c0_51 = arith.constant 0 : index
    %85 = vector.load %arg14[%c0_50, %c0_51] : memref<32x1xf32, #tpu.memory_space<vmem>>, vector<32x1xf32>
    %cst_52 = arith.constant dense<0.000000e+00> : vector<32x512xf32>
    %86 = tpu.matmul %84, %83, %cst_52 {dimension_numbers = #tpu.dot_dimension_numbers<[1], [0], [0], [1], [0, 0, 1, 1], [], []>} : vector<32x32xf32>, vector<32x512xf32>, vector<32x512xf32> -> vector<32x512xf32>
    %87 = vector.broadcast %85 : vector<32x1xf32> to vector<32x512xf32>
    %88 = arith.addf %86, %87 : vector<32x512xf32>
    %cst_53 = arith.constant 1.000000e+02 : f32
    %89 = vector.broadcast %cst_53 : f32 to vector<32x512xf32>
    %90 = arith.mulf %89, %88 : vector<32x512xf32>
    %cst_54 = arith.constant 2.000000e+01 : f32
    %91 = vector.broadcast %cst_54 : f32 to vector<32x512xf32>
    %92 = arith.minimumf %90, %91 : vector<32x512xf32>
    %cst_55 = arith.constant 2.000000e+01 : f32
    %93 = vector.broadcast %cst_55 : f32 to vector<32x512xf32>
    %94 = arith.cmpf ogt, %90, %93 : vector<32x512xf32>
    %95 = math.exp %92 : vector<32x512xf32>
    %96 = math.log1p %95 : vector<32x512xf32>
    %cst_56 = arith.constant 0.00999999977 : f32
    %97 = vector.broadcast %cst_56 : f32 to vector<32x512xf32>
    %98 = arith.mulf %96, %97 : vector<32x512xf32>
    %99 = arith.select %94, %88, %98 : vector<32x512xi1>, vector<32x512xf32>
    %c0_57 = arith.constant 0 : index
    %c0_58 = arith.constant 0 : index
    %100 = vector.load %arg15[%c0_57, %c0_58] : memref<32x32xf32, #tpu.memory_space<vmem>>, vector<32x32xf32>
    %c0_59 = arith.constant 0 : index
    %c0_60 = arith.constant 0 : index
    %101 = vector.load %arg16[%c0_59, %c0_60] : memref<32x1xf32, #tpu.memory_space<vmem>>, vector<32x1xf32>
    %cst_61 = arith.constant dense<0.000000e+00> : vector<32x512xf32>
    %102 = tpu.matmul %100, %99, %cst_61 {dimension_numbers = #tpu.dot_dimension_numbers<[1], [0], [0], [1], [0, 0, 1, 1], [], []>} : vector<32x32xf32>, vector<32x512xf32>, vector<32x512xf32> -> vector<32x512xf32>
    %103 = vector.broadcast %101 : vector<32x1xf32> to vector<32x512xf32>
    %104 = arith.addf %102, %103 : vector<32x512xf32>
    %cst_62 = arith.constant 1.000000e+02 : f32
    %105 = vector.broadcast %cst_62 : f32 to vector<32x512xf32>
    %106 = arith.mulf %105, %104 : vector<32x512xf32>
    %cst_63 = arith.constant 2.000000e+01 : f32
    %107 = vector.broadcast %cst_63 : f32 to vector<32x512xf32>
    %108 = arith.minimumf %106, %107 : vector<32x512xf32>
    %cst_64 = arith.constant 2.000000e+01 : f32
    %109 = vector.broadcast %cst_64 : f32 to vector<32x512xf32>
    %110 = arith.cmpf ogt, %106, %109 : vector<32x512xf32>
    %111 = math.exp %108 : vector<32x512xf32>
    %112 = math.log1p %111 : vector<32x512xf32>
    %cst_65 = arith.constant 0.00999999977 : f32
    %113 = vector.broadcast %cst_65 : f32 to vector<32x512xf32>
    %114 = arith.mulf %112, %113 : vector<32x512xf32>
    %115 = arith.select %110, %104, %114 : vector<32x512xi1>, vector<32x512xf32>
    %c0_66 = arith.constant 0 : index
    %c0_67 = arith.constant 0 : index
    %116 = vector.load %arg17[%c0_66, %c0_67] : memref<32x32xf32, #tpu.memory_space<vmem>>, vector<32x32xf32>
    %c0_68 = arith.constant 0 : index
    %c0_69 = arith.constant 0 : index
    %117 = vector.load %arg18[%c0_68, %c0_69] : memref<32x1xf32, #tpu.memory_space<vmem>>, vector<32x1xf32>
    %cst_70 = arith.constant dense<0.000000e+00> : vector<32x512xf32>
    %118 = tpu.matmul %116, %115, %cst_70 {dimension_numbers = #tpu.dot_dimension_numbers<[1], [0], [0], [1], [0, 0, 1, 1], [], []>} : vector<32x32xf32>, vector<32x512xf32>, vector<32x512xf32> -> vector<32x512xf32>
    %119 = vector.broadcast %117 : vector<32x1xf32> to vector<32x512xf32>
    %120 = arith.addf %118, %119 : vector<32x512xf32>
    %cst_71 = arith.constant 1.000000e+02 : f32
    %121 = vector.broadcast %cst_71 : f32 to vector<32x512xf32>
    %122 = arith.mulf %121, %120 : vector<32x512xf32>
    %cst_72 = arith.constant 2.000000e+01 : f32
    %123 = vector.broadcast %cst_72 : f32 to vector<32x512xf32>
    %124 = arith.minimumf %122, %123 : vector<32x512xf32>
    %cst_73 = arith.constant 2.000000e+01 : f32
    %125 = vector.broadcast %cst_73 : f32 to vector<32x512xf32>
    %126 = arith.cmpf ogt, %122, %125 : vector<32x512xf32>
    %127 = math.exp %124 : vector<32x512xf32>
    %128 = math.log1p %127 : vector<32x512xf32>
    %cst_74 = arith.constant 0.00999999977 : f32
    %129 = vector.broadcast %cst_74 : f32 to vector<32x512xf32>
    %130 = arith.mulf %128, %129 : vector<32x512xf32>
    %131 = arith.select %126, %120, %130 : vector<32x512xi1>, vector<32x512xf32>
    %c0_75 = arith.constant 0 : index
    %c0_76 = arith.constant 0 : index
    %132 = vector.load %arg19[%c0_75, %c0_76] : memref<5x32xf32, #tpu.memory_space<vmem>>, vector<5x32xf32>
    %c0_77 = arith.constant 0 : index
    %c0_78 = arith.constant 0 : index
    %133 = vector.load %arg20[%c0_77, %c0_78] : memref<5x1xf32, #tpu.memory_space<vmem>>, vector<5x1xf32>
    %cst_79 = arith.constant dense<0.000000e+00> : vector<5x512xf32>
    %134 = tpu.matmul %132, %131, %cst_79 {dimension_numbers = #tpu.dot_dimension_numbers<[1], [0], [0], [1], [0, 0, 1, 1], [], []>} : vector<5x32xf32>, vector<32x512xf32>, vector<5x512xf32> -> vector<5x512xf32>
    %135 = vector.broadcast %133 : vector<5x1xf32> to vector<5x512xf32>
    %136 = arith.addf %134, %135 : vector<5x512xf32>
    %c0_80 = arith.constant 0 : index
    %c0_81 = arith.constant 0 : index
    %137 = vector.load %arg21[%c0_80, %c0_81] : memref<5x512xf32, #tpu.memory_space<vmem>>, vector<5x512xf32>
    tpu.vector_store %arg21[%c0_80, %c0_81], %136 {strides = array<i32>} : memref<5x512xf32, #tpu.memory_space<vmem>>, vector<5x512xf32>,
    return
  }
  func.func @transform_0(%arg0: i32) -> (i32, i32) {
    %c0_i32 = arith.constant 0 : i32
    %c0_i32_0 = arith.constant 0 : i32
    return %c0_i32, %arg0 : i32, i32
  }
  func.func @transform_1(%arg0: i32) -> (i32, i32) {
    %c0_i32 = arith.constant 0 : i32
    %c0_i32_0 = arith.constant 0 : i32
    %c0_i32_1 = arith.constant 0 : i32
    return %c0_i32, %c0_i32_0 : i32, i32
  }
  func.func @transform_2(%arg0: i32) -> (i32, i32) {
    %c0_i32 = arith.constant 0 : i32
    %c0_i32_0 = arith.constant 0 : i32
    %c0_i32_1 = arith.constant 0 : i32
    return %c0_i32, %c0_i32_0 : i32, i32
  }
  func.func @transform_3(%arg0: i32) -> (i32, i32) {
    %c0_i32 = arith.constant 0 : i32
    %c0_i32_0 = arith.constant 0 : i32
    %c0_i32_1 = arith.constant 0 : i32
    return %c0_i32, %c0_i32_0 : i32, i32
  }
  func.func @transform_4(%arg0: i32) -> (i32, i32) {
    %c0_i32 = arith.constant 0 : i32
    %c0_i32_0 = arith.constant 0 : i32
    %c0_i32_1 = arith.constant 0 : i32
    return %c0_i32, %c0_i32_0 : i32, i32
  }
  func.func @transform_5(%arg0: i32) -> (i32, i32) {
    %c0_i32 = arith.constant 0 : i32
    %c0_i32_0 = arith.constant 0 : i32
    %c0_i32_1 = arith.constant 0 : i32
    return %c0_i32, %c0_i32_0 : i32, i32
  }
  func.func @transform_6(%arg0: i32) -> (i32, i32) {
    %c0_i32 = arith.constant 0 : i32
    %c0_i32_0 = arith.constant 0 : i32
    %c0_i32_1 = arith.constant 0 : i32
    return %c0_i32, %c0_i32_0 : i32, i32
  }
  func.func @transform_7(%arg0: i32) -> (i32, i32) {
    %c0_i32 = arith.constant 0 : i32
    %c0_i32_0 = arith.constant 0 : i32
    %c0_i32_1 = arith.constant 0 : i32
    return %c0_i32, %c0_i32_0 : i32, i32
  }
  func.func @transform_8(%arg0: i32) -> (i32, i32) {
    %c0_i32 = arith.constant 0 : i32
    %c0_i32_0 = arith.constant 0 : i32
    %c0_i32_1 = arith.constant 0 : i32
    return %c0_i32, %c0_i32_0 : i32, i32
  }
  func.func @transform_9(%arg0: i32) -> (i32, i32) {
    %c0_i32 = arith.constant 0 : i32
    %c0_i32_0 = arith.constant 0 : i32
    %c0_i32_1 = arith.constant 0 : i32
    return %c0_i32, %c0_i32_0 : i32, i32
  }
  func.func @transform_10(%arg0: i32) -> (i32, i32) {
    %c0_i32 = arith.constant 0 : i32
    %c0_i32_0 = arith.constant 0 : i32
    %c0_i32_1 = arith.constant 0 : i32
    return %c0_i32, %c0_i32_0 : i32, i32
  }
  func.func @transform_11(%arg0: i32) -> (i32, i32) {
    %c0_i32 = arith.constant 0 : i32
    %c0_i32_0 = arith.constant 0 : i32
    %c0_i32_1 = arith.constant 0 : i32
    return %c0_i32, %c0_i32_0 : i32, i32
  }
  func.func @transform_12(%arg0: i32) -> (i32, i32) {
    %c0_i32 = arith.constant 0 : i32
    %c0_i32_0 = arith.constant 0 : i32
    %c0_i32_1 = arith.constant 0 : i32
    return %c0_i32, %c0_i32_0 : i32, i32
  }
  func.func @transform_13(%arg0: i32) -> (i32, i32) {
    %c0_i32 = arith.constant 0 : i32
    %c0_i32_0 = arith.constant 0 : i32
    %c0_i32_1 = arith.constant 0 : i32
    return %c0_i32, %c0_i32_0 : i32, i32
  }
  func.func @transform_14(%arg0: i32) -> (i32, i32) {
    %c0_i32 = arith.constant 0 : i32
    %c0_i32_0 = arith.constant 0 : i32
    %c0_i32_1 = arith.constant 0 : i32
    return %c0_i32, %c0_i32_0 : i32, i32
  }
  func.func @transform_15(%arg0: i32) -> (i32, i32) {
    %c0_i32 = arith.constant 0 : i32
    %c0_i32_0 = arith.constant 0 : i32
    %c0_i32_1 = arith.constant 0 : i32
    return %c0_i32, %c0_i32_0 : i32, i32
  }
  func.func @transform_16(%arg0: i32) -> (i32, i32) {
    %c0_i32 = arith.constant 0 : i32
    %c0_i32_0 = arith.constant 0 : i32
    %c0_i32_1 = arith.constant 0 : i32
    return %c0_i32, %c0_i32_0 : i32, i32
  }
  func.func @transform_17(%arg0: i32) -> (i32, i32) {
    %c0_i32 = arith.constant 0 : i32
    %c0_i32_0 = arith.constant 0 : i32
    %c0_i32_1 = arith.constant 0 : i32
    return %c0_i32, %c0_i32_0 : i32, i32
  }
  func.func @transform_18(%arg0: i32) -> (i32, i32) {
    %c0_i32 = arith.constant 0 : i32
    %c0_i32_0 = arith.constant 0 : i32
    %c0_i32_1 = arith.constant 0 : i32
    return %c0_i32, %c0_i32_0 : i32, i32
  }
  func.func @transform_19(%arg0: i32) -> (i32, i32) {
    %c0_i32 = arith.constant 0 : i32
    %c0_i32_0 = arith.constant 0 : i32
    %c0_i32_1 = arith.constant 0 : i32
    return %c0_i32, %c0_i32_0 : i32, i32
  }
  func.func @transform_20(%arg0: i32) -> (i32, i32) {
    %c0_i32 = arith.constant 0 : i32
    %c0_i32_0 = arith.constant 0 : i32
    return %c0_i32, %arg0 : i32, i32
  }
}

</mosaic_0001>

<bundles_post_ra>
// kernel: tpu_custom_call.1
= control target key start
LH: loop header
LB: loop body
LE: loop exit
PB: predicated region body
PF: predicated region fallthrough
CT: control target
= control target key end

     0   :  { %s8173_s0 = inlined_call_operand.vmem [shape: f32[3,1024], index: 0, kind: input, shape index: {}]   ;;  %s8174_s1 = inlined_call_operand.vmem [shape: f32[32,3], index: 1, kind: input, shape index: {}]   ;;  %s8175_s2 = inlined_call_operand.vmem [shape: f32[32,1], index: 2, kind: input, shape index: {}]   ;;  %s8176_s3 = inlined_call_operand.vmem [shape: f32[32,32], index: 3, kind: input, shape index: {}]   ;;  %s8177_s4 = inlined_call_operand.vmem [shape: f32[32,1], index: 4, kind: input, shape index: {}]   ;;  %s8178_s5 = inlined_call_operand.vmem [shape: f32[32,32], index: 5, kind: input, shape index: {}]   ;;  %s8179_s6 = inlined_call_operand.vmem [shape: f32[32,1], index: 6, kind: input, shape index: {}]   ;;  %s8180_s7 = inlined_call_operand.vmem [shape: f32[29,32], index: 7, kind: input, shape index: {}]   ;;  %s8181_s8 = inlined_call_operand.vmem [shape: f32[29,1], index: 8, kind: input, shape index: {}]   ;;  %s8182_s9 = inlined_call_operand.vmem [shape: f32[32,29], index: 9, kind: input, shape index: {}]   ;;  %s8183_s10 = inlined_call_operand.vmem [shape: f32[32,3], index: 10, kind: input, shape index: {}]   ;;  %s8184_s11 = inlined_call_operand.vmem [shape: f32[32,1], index: 11, kind: input, shape index: {}]   ;;  %s8185_s12 = inlined_call_operand.vmem [shape: f32[32,32], index: 12, kind: input, shape index: {}]   ;;  %s8186_s13 = inlined_call_operand.vmem [shape: f32[32,1], index: 13, kind: input, shape index: {}]   ;;  %s8187_s14 = inlined_call_operand.vmem [shape: f32[32,32], index: 14, kind: input, shape index: {}]   ;;  %s8188_s15 = inlined_call_operand.vmem [shape: f32[32,1], index: 15, kind: input, shape index: {}]   ;;  %s8189_s16 = inlined_call_operand.vmem [shape: f32[32,32], index: 16, kind: input, shape index: {}]   ;;  %s8190_s17 = inlined_call_operand.vmem [shape: f32[32,1], index: 17, kind: input, shape index: {}]   ;;  %s8191_s18 = inlined_call_operand.vmem [shape: f32[5,32], index: 18, kind: input, shape index: {}]   ;;  %s8192_s19 = inlined_call_operand.vmem [shape: f32[5,1], index: 19, kind: input, shape index: {}]   ;;  %s8193_s20 = inlined_call_operand.hbm [shape: f32[5,1024], index: 20, kind: output, shape index: {}]  }
   0x1   :  { %8216 = sst [smem:[#allocation20_spill]] %s8173_s0 }
   0x2   :  { %8217 = sst [smem:[#allocation21_spill]] %s8174_s1 }
   0x3   :  { %8218 = sst [smem:[#allocation22_spill]] %s8175_s2 }
   0x4   :  { %8219 = sst [smem:[#allocation23_spill]] %s8176_s3 }
   0x5   :  { %8220 = sst [smem:[#allocation24_spill]] %s8177_s4 }
   0x6   :  { %8221 = sst [smem:[#allocation25_spill]] %s8178_s5 }
   0x7   :  { %8222 = sst [smem:[#allocation26_spill]] %s8179_s6 }
   0x8   :  { %8223 = sst [smem:[#allocation27_spill]] %s8180_s7 }
   0x9   :  { %25 = vsyncpa [#allocation3], 0 }
   0xa   :  { %27 = vsyncpa [#allocation3 + $0x1], 0  ;;  %s5194_s1 = smov 0   ;;  %s5196_s22 = smov 0  }
   0xb   :  { %s5198_s23 = smov 0   ;;  %s5200_s24 = smov 0  }
   0xc LB: > { %8224 = sst [smem:[#allocation5_spill]] %s5074_s1  ;;  %s5215_s2 = sadd.s32 4294967295, %s5086_s24   ;;  %s5086_s24 = sphi %s5200_s24, %s8430_s24   ;;  %s5082_s23 = sphi %s5198_s23, %s8432_s23   ;;  %s5078_s22 = sphi %s5196_s22, %s8434_s22   ;;  %s5074_s1 = sphi %s5194_s1, %s8433_s1  }
   0xd   : > { %8225 = sst [smem:[#allocation6_spill]] %s5082_s23  ;;  %s4296_s25 = sadd.s32 4294967294, %s5086_s24  }
   0xe   : > { %8226 = sst [smem:[#allocation7_spill]] %s5086_s24  ;;  %s5219_s3 = sadd.s32 1, %s5086_s24  }
   0xf   : > { %8227 = sst [smem:[#allocation8_spill]] %s5219_s3  ;;  %s465_s26 = sadd.s32 1, %s5082_s23 }
  0x10   : > { %s462_s27 = ssub.s32 %s5086_s24, %s5219_s3  ;;  %p475_p0 = scmp.ne.s32.totalorder %s5082_s23, %s5078_s22 }
  0x11   : > { %p463_p1 = scmp.eq.s32.totalorder %s462_s27, 0  ;;  %p476_p2 = scmp.eq.s32.totalorder %s5215_s2, 1 }
  0x12   : > { %p481_p3 = scmp.ne.s32.totalorder %s5078_s22, %s5074_s1  ;;  %p482_p4 = scmp.eq.s32.totalorder %s4296_s25, 1 }
  0x13   : > { %s5230_s28 = scalar_select %p463_p1, %s5082_s23, %s465_s26  }
  0x14   : > { %p5232_p5 = por %p476_p2, %p475_p0  ;;  %p5236_p6 = por %p482_p4, %p481_p3 }
  0x15   : > { %8228 = sst [smem:[#allocation9_spill]] %s5230_s28  ;;  %p4299_p7 = scmp.ge.s32.totalorder %s5086_s24, 1 }
  0x16   : > { %s8229_s4 = scalar_select %p5232_p5, 1, 0 }
  0x17   : > { %s8231_s29 = scalar_select %p5236_p6, 1, 0 }
  0x18   : > { %8230 = sst [smem:[#allocation10_spill]] %s8229_s4  ;;  %p566_p8 = scmp.lt.s32.totalorder %s5086_s24, 3 }
  0x19   : > { %8232 = sst [smem:[#allocation11_spill]] %s8231_s29 }
  0x1a   : > { %p567_p9 = pnand %p4299_p7, %p566_p8 }
  0x1c   : > { %570 = sbr.rel (%p567_p9) target bundleno = 1765 (0x6e5), region = 100 }
  0x21   : > { %s8233_s21 = sld [smem:[#allocation22_spill]]  ;;  %s4301_s27 = sshll.u32 %s5215_s2, 2  ;;  %v5088_v2 = vmov 0   ;;  %vm683_vm0 = vcmask 1042432   ;;  %vm670_vm1 = vcmask 23552   ;;  %v1895_v19 = vld [vmem:[%s8181_s8 + $0x10] sm:$0xff] }
  0x22   : > { %4510 = vset.pattern.permute.xlu1 %v5088_v2  ;;  %4509 = vset.pattern.permute.xlu0 %v5088_v2  ;;  %p625_p10 = scmp.lt.s32.totalorder %s4301_s27, 7  ;;  %s8234_s29 = sld [smem:[#allocation20_spill]]  ;;  %v1896_v18 = vld [vmem:[%s8181_s8 + $0x18] sm:$0x1f]  ;;  %v1893_v21 = vld [vmem:[%s8181_s8] sm:$0xff]  ;;  %v2310_v23 = vld [vmem:[%s8184_s11 + $0x8] sm:$0xff] }
  0x23   : > { %4511 = vset.pattern.permute.xlu2 %v5088_v2  ;;  %s8235_s4 = sld [smem:[#allocation21_spill]]  ;;  %v2312_v22 = vld [vmem:[%s8184_s11 + $0x18] sm:$0xff]  ;;  %v2309_v24 = vld [vmem:[%s8184_s11] sm:$0xff]  ;;  %v2896_v25 = vld [vmem:[%s8186_s13 + $0x10] sm:$0xff]  ;;  %s5044_s30 = scalar_lea.hbm %s8193_s20, 64 }
  0x24   : > { %s8436_s27 = smov (!%p625_p10, %s4301_s27), 7  ;;  %s8236_s3 = sld [smem:[#allocation24_spill]]  ;;  %v2895_v26 = vld [vmem:[%s8186_s13 + $0x8] sm:$0xff]  ;;  %v3309_v27 = vld [vmem:[%s8188_s15 + $0x18] sm:$0xff]  ;;  %v3308_v28 = vld [vmem:[%s8188_s15 + $0x10] sm:$0xff] }
  0x25   : > { %s4302_s28 = sshll.u32 %s8436_s27, 2  ;;  %s8237_s6 = sld [smem:[#allocation26_spill]]  ;;  %v3306_v29 = vld [vmem:[%s8188_s15] sm:$0xff]  ;;  %v3721_v30 = vld [vmem:[%s8190_s17 + $0x18] sm:$0xff]  ;;  %v3719_v31 = vld [vmem:[%s8190_s17 + $0x8] sm:$0xff] }
  0x26   : > { %v3718_v32 = vld [vmem:[%s8190_s17] sm:$0xff]  ;;  %s8265_s24 = sld [smem:[#allocation23_spill]] }
  0x27   : > { %v640_v0 = vld [vmem:[%s8233_s21 + $0x18] sm:$0xff]  ;;  %v638_v1 = vld [vmem:[%s8233_s21 + $0x8] sm:$0xff]  ;;  %v639_v3 = vld [vmem:[%s8233_s21 + $0x10] sm:$0xff]  ;;  %s8287_s5 = sld [smem:[#allocation25_spill]] }
  0x28   : > { %658 = vperm.xlu0 %4509, %v640_v0   ;;  %648 = vperm.xlu1 %4510, %v638_v1   ;;  %s628_s1 = scalar_lea.vmem %s8234_s29, %s4302_s28  ;;  %v637_v4 = vld [vmem:[%s8233_s21] sm:$0xff]  ;;  %s8302_s7 = sld [smem:[#allocation27_spill]] }
  0x29   : > { %v631_v5 = vld [vmem:[%s628_s1] sm:$0x77]  ;;  %v632_v6 = vld [vmem:[%s628_s1 + $0x8] sm:$0x77]  ;;  %v635_v17 = vld [vmem:[%s8235_s4 + $0x10] sm:$0xff]  ;;  %s621_s1 = sand.u32 1, %s5078_s22  }
  0x2a   : > { %663 = vst [vmem:[#allocation1] ss:$2 sm:$0xff] %v631_v5  ;;  %v633_v7 = vld [vmem:[%s8235_s4] sm:$0xff]  ;;  %v1069_v12 = vld [vmem:[%s8236_s3 + $0x8] sm:$0xff]  ;;  %v636_v20 = vld [vmem:[%s8235_s4 + $0x18] sm:$0xff]  ;;  %s4300_s23 = sshll.u32 %s621_s1, 5 }
  0x2b   : > { %665 = vst [vmem:[#allocation1 + $0x10] ss:$2 sm:$0xff] %v632_v6  ;;  %v1068_v13 = vld [vmem:[%s8236_s3] sm:$0xff]  ;;  %v634_v14 = vld [vmem:[%s8235_s4 + $0x8] sm:$0xff]  ;;  %v1483_v15 = vld [vmem:[%s8237_s6 + $0x10] sm:$0xff]  ;;  %s4468_s29 = sshll.u32 %s5215_s2, 5 }
  0x2c   : > { %v1482_v16 = vld [vmem:[%s8237_s6 + $0x8] sm:$0xff]  ;;  %v1071_v60 = vld [vmem:[%s8236_s3 + $0x18] sm:$0xff]  ;;  %s8266_s28 = smov %s8265_s24  ;;  %s4232_s25 = scalar_lea.hbm %s8193_s20, %s4468_s29 }
  0x2d   : > { %1089 = vperm.xlu2 %4511, %v1071_v60  }
  0x30   : > { %653 = vperm.xlu0 %4509, %v639_v3   ;;  %643 = vperm.xlu1 %4510, %v637_v4  }
  0x31   : > { %v666_v8 = vld.sshfl [vmem:[#allocation1] sm:$0xff pattern:$0x75316420]  ;;  %v667_v9 = vld.sshfl [vmem:[#allocation1 + $0x8] sm:$0xff pattern:$0x75316420] }
  0x32   : > { %4303 = vmatpush.msk.msra.mxu0 %vm683_vm0, %v666_v8  ;;  %4308 = vmatpush.msk.msra.mxu1 %vm683_vm0, %v667_v9  ;;  %2313 = vst [vmem:[#allocation1] ss:$2 sm:$0xff] %v631_v5  ;;  %v668_v10 = vld.sshfl [vmem:[#allocation1 + $0x10] sm:$0xff pattern:$0x75316420] }
  0x33   : > { %4313 = vmatpush.msk.msra.mxu2 %vm683_vm0, %v668_v10  ;;  %v669_v11 = vld.sshfl [vmem:[#allocation1 + $0x18] sm:$0xff pattern:$0x75316420]  ;;  %4304 = vmatmul.msk.f32.vlgmr.msra.gmra.mxu0 %vm670_vm1, %v633_v7 }
  0x34   : > { %4318 = vmatpush.msk.msra.mxu3 %vm683_vm0, %v669_v11  ;;  %2315 = vst [vmem:[#allocation1 + $0x10] ss:$2 sm:$0xff] %v632_v6  ;;  %4309 = vmatmul.msk.f32.vlgmr.msra.gmra.mxu1 %vm670_vm1, %v633_v7 }
  0x35   : > { %4314 = vmatmul.msk.f32.vlgmr.msra.gmra.mxu2 %vm670_vm1, %v633_v7  ;;  %4319 = vmatmul.msk.f32.vlgmr.msra.gmra.mxu3 %vm670_vm1, %v633_v7 }
  0x38   : > { %1079 = vperm.xlu0 %4509, %v1069_v12   ;;  %1074 = vperm.xlu1 %4510, %v1068_v13  }
  0x3b   : > { %4305 = vmatmul.msk.f32.gmra.mxu0 %vm670_vm1, %v634_v14 }
  0x3c   : > { %4310 = vmatmul.msk.f32.gmra.mxu1 %vm670_vm1, %v634_v14 }
  0x3d   : > { %4315 = vmatmul.msk.f32.gmra.mxu2 %vm670_vm1, %v634_v14  ;;  %4320 = vmatmul.msk.f32.gmra.mxu3 %vm670_vm1, %v634_v14 }
  0x40   : > { %1497 = vperm.xlu0 %4509, %v1483_v15   ;;  %1492 = vperm.xlu1 %4510, %v1482_v16  }
  0x43   : > { %4306 = vmatmul.msk.f32.gmra.mxu0 %vm670_vm1, %v635_v17 }
  0x44   : > { %4311 = vmatmul.msk.f32.gmra.mxu1 %vm670_vm1, %v635_v17 }
  0x45   : > { %4316 = vmatmul.msk.f32.gmra.mxu2 %vm670_vm1, %v635_v17  ;;  %4321 = vmatmul.msk.f32.gmra.mxu3 %vm670_vm1, %v635_v17 }
  0x48   : > { %1914 = vperm.xlu0 %4509, %v1896_v18   ;;  %1909 = vperm.xlu1 %4510, %v1895_v19  }
  0x4b   : > { %4307 = vmatmul.msk.f32.gmra.mxu0 %vm670_vm1, %v636_v20 }
  0x4c   : > { %4312 = vmatmul.msk.f32.gmra.mxu1 %vm670_vm1, %v636_v20 }
  0x4d   : > { %4317 = vmatmul.msk.f32.gmra.mxu2 %vm670_vm1, %v636_v20  ;;  %4322 = vmatmul.msk.f32.gmra.mxu3 %vm670_vm1, %v636_v20 }
  0x50   : > { %1899 = vperm.xlu0 %4509, %v1893_v21   ;;  %2615 = vperm.xlu1 %4510, %v2312_v22   ;;  %v1070_v21 = vld [vmem:[%s8236_s3 + $0x10] sm:$0xff]  ;;  %s4236_s3 = sshll.u32 %s4232_s25, 4  ;;  %s4237_s3 = int_to_ptr.hbm [resolvable:$true] %s4236_s3 }
  0x51   : > { %1084 = vperm.xlu2 %4511, %v1070_v21   ;;  %s5038_s4 = sshra.s32 %s4237_s3, 4  ;;  %s5039_s4 = int_to_ptr.hbm [resolvable:$true] %s5038_s4 }
  0x52   : > { %p5045_p0 = scmp.lt.s32.totalorder %s5039_s4, %s8193_s20 }
  0x58   : > { %2605 = vperm.xlu0 %4509, %v2310_v23   ;;  %2600 = vperm.xlu1 %4510, %v2309_v24  }
  0x60   : > { %2910 = vperm.xlu0 %4509, %v2896_v25   ;;  %2905 = vperm.xlu1 %4510, %v2895_v26  }
  0x68   : > { %3327 = vperm.xlu0 %4509, %v3309_v27   ;;  %3322 = vperm.xlu1 %4510, %v3308_v28  }
  0x70   : > { %3312 = vperm.xlu0 %4509, %v3306_v29   ;;  %3739 = vperm.xlu1 %4510, %v3721_v30  }
  0x78   : > { %3729 = vperm.xlu0 %4509, %v3719_v31   ;;  %3724 = vperm.xlu1 %4510, %v3718_v32  }
  0x9a   : > { %v649_v33 = vpop.permute.xlu1 %648  ;;  %v5349_v39 = vpop.permute.xlu0 %658 }
  0xa2   : > { %v644_v34 = vpop.permute.xlu1 %643  ;;  %v654_v58 = vpop.permute.xlu0 %653 }
  0xb0   : > { %v709_v35 = vpop.f32.mrf.mxu0 }
  0xb1   : > { %v738_v36 = vpop.f32.mrf.mxu1  ;;  %v5344_v37 = vadd.f32 %v709_v35, %v644_v34 }
  0xb2   : > { %v5351_v40 = vadd.f32 %v738_v36, %v644_v34 }
  0xb3   : > { %v5347_v38 = vmul.f32 100.0, %v5344_v37 }
  0xb4   : > { %v5359_v48 = vmul.f32 100.0, %v5351_v40 }
  0xb5   : > { %v824_v41 = vmin.f32 %v5347_v38, 20.0  ;;  %vm840_vm10 = vcmp.gt.f32.partialorder %v5347_v38, 20.0 }
  0xb6   : > { %v825_v56 = vmin.f32 %v5359_v48, 20.0 }
  0xb7   : > { %v856_v51 = vmul.f32 1.442695, %v824_v41 }
  0xb8   : > { %v767_v42 = vpop.f32.mrf.mxu2  ;;  %v796_v43 = vpop.f32.mrf.mxu3  ;;  %v858_v6 = vmul.f32 1.442695, %v825_v56 }
  0xb9   : > { %v5354_v44 = vadd.f32 %v767_v42, %v644_v34  ;;  %v5356_v45 = vadd.f32 %v796_v43, %v644_v34  ;;  %v712_v46 = vpop.f32.mrf.mxu0  ;;  %v741_v47 = vpop.f32.mrf.mxu1  ;;  %4512 = vpow2.f32 %v856_v51 }
  0xba   : > { %v5361_v49 = vadd.f32 %v712_v46, %v649_v33  ;;  %v5363_v50 = vadd.f32 %v741_v47, %v649_v33 }
  0xbb   : > { %8238 = vst [vmem:[#allocation12_spill] sm:$0xff] %v5354_v44  ;;  %v5366_v52 = vmul.f32 100.0, %v5354_v44  ;;  %v5369_v53 = vmul.f32 100.0, %v5356_v45 }
  0xbc   : > { %8239 = vst [vmem:[#allocation13_spill] sm:$0xff] %v5356_v45  ;;  %v5372_v54 = vmul.f32 100.0, %v5361_v49  ;;  %v5375_v55 = vmul.f32 100.0, %v5363_v50 }
  0xbd   : > { %8240 = vst [vmem:[#allocation14_spill] sm:$0xff] %v5366_v52  ;;  %v826_v59 = vmin.f32 %v5366_v52, 20.0  ;;  %v827_v61 = vmin.f32 %v5369_v53, 20.0 }
  0xbe   : > { %8241 = vst [vmem:[#allocation15_spill] sm:$0xff] %v5369_v53  ;;  %v828_v57 = vmin.f32 %v5372_v54, 20.0  ;;  %v829_v1 = vmin.f32 %v5375_v55, 20.0  ;;  %vm844_vm4 = vcmp.gt.f32.partialorder %v5372_v54, 20.0  ;;  %vm845_vm15 = vcmp.gt.f32.partialorder %v5375_v55, 20.0 }
  0xbf   : > { %v860_v9 = vmul.f32 1.442695, %v826_v59  ;;  %v862_v11 = vmul.f32 1.442695, %v827_v61  ;;  %v5405_v15 = vpop.eup %4512 }
  0xc0   : > { %v864_v62 = vmul.f32 1.442695, %v828_v57  ;;  %v770_v63 = vpop.f32.mrf.mxu2  ;;  %v799_v0 = vpop.f32.mrf.mxu3  ;;  %v866_v16 = vmul.f32 1.442695, %v829_v1  ;;  %v891_v19 = vmul.f32 -0.5, %v5405_v15  ;;  %v888_v32 = vadd.f32 1.0, %v5405_v15 }
  0xc1   : > { %v5385_v2 = vadd.f32 %v770_v63, %v649_v33  ;;  %v5387_v3 = vadd.f32 %v799_v0, %v649_v33  ;;  %v715_v4 = vpop.f32.mrf.mxu0  ;;  %v744_v5 = vpop.f32.mrf.mxu1  ;;  %v894_v60 = vand.u32 2147483647, %v5405_v15 }
  0xc2   : > { %v5389_v7 = vadd.f32 %v715_v4, %v654_v58  ;;  %v5391_v8 = vadd.f32 %v744_v5, %v654_v58  ;;  %4514 = vpow2.f32 %v864_v62  ;;  %v892_v36 = vadd.f32 1.0, %v891_v19 }
  0xc3   : > { %8242 = vst [vmem:[#allocation16_spill] sm:$0xff] %v5385_v2  ;;  %v5394_v10 = vmul.f32 100.0, %v5385_v2  ;;  %v5397_v12 = vmul.f32 100.0, %v5387_v3  ;;  %4516 = vpow2.f32 %v858_v6  ;;  %vm5484_vm3 = vcmp.lt.f32.partialorder %v894_v60, 0.0004427343 }
  0xc4   : > { %8243 = vst [vmem:[#allocation17_spill] sm:$0xff] %v5387_v3  ;;  %v5400_v13 = vmul.f32 100.0, %v5389_v7  ;;  %v5403_v14 = vmul.f32 100.0, %v5391_v8  ;;  %4518 = vpow2.f32 %v860_v9  ;;  %v5451_v4 = vmul.f32 %v5405_v15, %v892_v36 }
  0xc5   : > { %8244 = vst [vmem:[#allocation18_spill] sm:$0xff] %v5394_v10  ;;  %v830_v20 = vmin.f32 %v5394_v10, 20.0  ;;  %4520 = vpow2.f32 %v862_v11  ;;  %v831_v22 = vmin.f32 %v5397_v12, 20.0 }
  0xc6   : > { %8245 = vst [vmem:[#allocation19_spill] sm:$0xff] %v5397_v12  ;;  %v832_v17 = vmin.f32 %v5400_v13, 20.0  ;;  %v833_v18 = vmin.f32 %v5403_v14, 20.0  ;;  %4522 = vpow2.f32 %v866_v16  ;;  %vm848_vm7 = vcmp.gt.f32.partialorder %v5400_v13, 20.0 }
  0xc7   : > { %v868_v41 = vmul.f32 1.442695, %v830_v20  ;;  %v870_v47 = vmul.f32 1.442695, %v831_v22  ;;  %vm849_vm8 = vcmp.gt.f32.partialorder %v5403_v14, 20.0 }
  0xc8   : > { %v872_v23 = vmul.f32 1.442695, %v832_v17  ;;  %v874_v24 = vmul.f32 1.442695, %v833_v18  ;;  %v773_v25 = vpop.f32.mrf.mxu2  ;;  %v802_v26 = vpop.f32.mrf.mxu3 }
  0xc9   : > { %v4515_v27 = vpop.eup %4514  ;;  %v5415_v28 = vadd.f32 %v773_v25, %v654_v58  ;;  %v5417_v29 = vadd.f32 %v802_v26, %v654_v58  ;;  %v718_v30 = vpop.f32.mrf.mxu0 }
  0xca   : > { %v747_v31 = vpop.f32.mrf.mxu1  ;;  %v5421_v33 = vadd.f32 %v718_v30, %v5349_v39  ;;  %v924_v35 = vadd.f32 1.0, %v4515_v27  ;;  %4524 = vpow2.f32 %v872_v23  ;;  %v927_v43 = vmul.f32 -0.5, %v4515_v27  ;;  %v5429_v46 = vpop.eup %4516 }
  0xcb   : > { %v5424_v34 = vadd.f32 %v747_v31, %v5349_v39  ;;  %v5427_v42 = vmul.f32 100.0, %v5415_v28  ;;  %4526 = vpow2.f32 %v874_v24  ;;  %v5437_v57 = vpop.eup %4518  ;;  %v5441_v59 = vmul.f32 100.0, %v5417_v29 }
  0xcc   : > { %v5432_v51 = vmul.f32 100.0, %v5421_v33  ;;  %4528 = vlog2.f32 %v924_v35  ;;  %v5444_v61 = vpop.eup %4520  ;;  %v928_v0 = vadd.f32 1.0, %v927_v43  ;;  %v5454_v5 = vadd.f32 1.0, %v5429_v46 }
  0xcd   : > { %v5435_v56 = vmul.f32 100.0, %v5424_v34  ;;  %v834_v58 = vmin.f32 %v5427_v42, 20.0  ;;  %4530 = vlog2.f32 %v888_v32  ;;  %v5448_v1 = vpop.eup %4522  ;;  %v5457_v6 = vmul.f32 -0.5, %v5429_v46 }
  0xce   : > { %v836_v62 = vmin.f32 %v5432_v51, 20.0  ;;  %4532 = vpow2.f32 %v868_v41  ;;  %v930_v18 = vand.u32 2147483647, %v4515_v27  ;;  %v835_v21 = vmin.f32 %v5441_v59, 20.0 }
  0xcf   : > { %v837_v63 = vmin.f32 %v5435_v56, 20.0  ;;  %4534 = vpow2.f32 %v870_v47  ;;  %v876_v20 = vmul.f32 1.442695, %v834_v58  ;;  %v929_v26 = vmul.f32 %v4515_v27, %v928_v0 }
  0xd0   : > { %v880_v9 = vmul.f32 1.442695, %v836_v62  ;;  %v776_v16 = vpop.f32.mrf.mxu2  ;;  %v805_v17 = vpop.f32.mrf.mxu3  ;;  %v933_v30 = vadd.f32 1.0, %v5448_v1  ;;  %vm5476_vm2 = vcmp.lt.f32.partialorder %v930_v18, 0.0004427343  ;;  %v936_v18 = vmul.f32 -0.5, %v5448_v1 }
  0xd1   : > { %v882_v11 = vmul.f32 1.442695, %v837_v63  ;;  %v4525_v19 = vpop.eup %4524  ;;  %v5461_v22 = vadd.f32 %v776_v16, %v5349_v39  ;;  %v5464_v15 = vadd.f32 %v805_v17, %v5349_v39  ;;  %v1484_v39 = vld [vmem:[%s8237_s6 + $0x18] sm:$0xff]  ;;  %v878_v44 = vmul.f32 1.442695, %v835_v21 }
  0xd2   : > { %v4527_v23 = vpop.eup %4526  ;;  %v960_v24 = vadd.f32 1.0, %v4525_v19  ;;  %v963_v25 = vmul.f32 -0.5, %v4525_v19  ;;  %4536 = vpow2.f32 %v880_v9  ;;  %v966_v43 = vand.u32 2147483647, %v4525_v19  ;;  %1502 = vperm.xlu2 %4511, %v1484_v39  }
  0xd3   : > { %v4529_v31 = vpop.eup %4528  ;;  %v5468_v32 = vmul.f32 100.0, %v5461_v22  ;;  %v5471_v35 = vmul.f32 100.0, %v5464_v15  ;;  %v969_v36 = vadd.f32 1.0, %v4527_v23  ;;  %4538 = vpow2.f32 %v882_v11 }
  0xd4   : > { %v4531_v41 = vpop.eup %4530  ;;  %v972_v47 = vmul.f32 -0.5, %v4527_v23  ;;  %4540 = vlog2.f32 %v960_v24  ;;  %v964_v0 = vadd.f32 1.0, %v963_v25  ;;  %v975_v16 = vand.u32 2147483647, %v4527_v23 }
  0xd5   : > { %v5480_v58 = vpop.eup %4532  ;;  %v838_v62 = vmin.f32 %v5468_v32, 20.0  ;;  %v839_v63 = vmin.f32 %v5471_v35, 20.0  ;;  %4542 = vlog2.f32 %v969_v36  ;;  %v926_v17 = vmul.f32 0.6931472, %v4529_v31 }
  0xd6   : > { %v5488_v11 = vpop.eup %4534  ;;  %v973_v53 = vadd.f32 1.0, %v972_v47  ;;  %4544 = vlog2.f32 %v933_v30  ;;  %v939_v60 = vand.u32 2147483647, %v5448_v1  ;;  %v965_v52 = vmul.f32 %v4525_v19, %v964_v0 }
  0xd7   : > { %v884_v39 = vmul.f32 1.442695, %v838_v62  ;;  %v886_v45 = vmul.f32 1.442695, %v839_v63  ;;  %4546 = vpow2.f32 %v876_v20  ;;  %vm5494_vm5 = vcmp.lt.f32.partialorder %v966_v43, 0.0004427343 }
  0xd8   : > { %v4537_v25 = vpop.eup %4536  ;;  %v932_v31 = vsel %vm5476_vm2, %v929_v26, %v926_v17  ;;  %vm5500_vm6 = vcmp.lt.f32.partialorder %v975_v16, 0.0004427343  ;;  %v937_v62 = vadd.f32 1.0, %v936_v18  ;;  %v974_v19 = vmul.f32 %v4527_v23, %v973_v53 }
  0xd9   : > { %4548 = vpow2.f32 %v884_v39  ;;  %v4539_v47 = vpop.eup %4538  ;;  %v996_v30 = vadd.f32 1.0, %v4537_v25  ;;  %v999_v20 = vmul.f32 -0.5, %v4537_v25  ;;  %v1036_v3 = vmul.f32 0.01, %v932_v31 }
  0xda   : > { %v4541_v63 = vpop.eup %4540  ;;  %4550 = vpow2.f32 %v886_v45  ;;  %v1005_v24 = vadd.f32 1.0, %v4539_v47  ;;  %v1008_v39 = vmul.f32 -0.5, %v4539_v47  ;;  %v890_v12 = vmul.f32 0.6931472, %v4531_v41 }
  0xdb   : > { %v4543_v43 = vpop.eup %4542  ;;  %4552 = vlog2.f32 %v996_v30  ;;  %v962_v0 = vmul.f32 0.6931472, %v4541_v63  ;;  %v1002_v26 = vand.u32 2147483647, %v4537_v25  ;;  %v1011_v17 = vand.u32 2147483647, %v4539_v47 }
  0xdc   : > { %v4545_v27 = vpop.eup %4544  ;;  %4554 = vlog2.f32 %v1005_v24  ;;  %v971_v2 = vmul.f32 0.6931472, %v4543_v43  ;;  %v1000_v10 = vadd.f32 1.0, %v999_v20  ;;  %v938_v53 = vmul.f32 %v5448_v1, %v937_v62 }
  0xdd   : > { %v5504_v16 = vpop.eup %4546  ;;  %v935_v45 = vmul.f32 0.6931472, %v4545_v27  ;;  %vm5509_vm9 = vcmp.lt.f32.partialorder %v939_v60, 0.0004427343  ;;  %4556 = vpow2.f32 %v878_v44  ;;  %vm852_vm11 = vcmp.gt.f32.partialorder %v5432_v51, 20.0 }
  0xde   : > { %v1009_v18 = vadd.f32 1.0, %v1008_v39  ;;  %v968_v24 = vsel %vm5494_vm5, %v965_v52, %v962_v0  ;;  %v977_v31 = vsel %vm5500_vm6, %v974_v19, %v971_v2  ;;  %vm853_vm12 = vcmp.gt.f32.partialorder %v5435_v56, 20.0 }
  0xdf   : > { %v5514_v41 = vpop.eup %4548  ;;  %v896_v1 = vsel %vm5484_vm3, %v5451_v4, %v890_v12  ;;  %4558 = vlog2.f32 %v5454_v5  ;;  %v901_v60 = vadd.f32 1.0, %v5457_v6  ;;  %vm5527_vm13 = vcmp.lt.f32.partialorder %v1002_v26, 0.0004427343 }
  0xe0   : > { %v4551_v44 = vpop.eup %4550  ;;  %vm5531_vm14 = vcmp.lt.f32.partialorder %v1011_v17, 0.0004427343  ;;  %v1052_v2 = vsel %vm844_vm4, %v5361_v49, %v1036_v3  ;;  %v941_v12 = vsel %vm5509_vm9, %v938_v53, %v935_v45  ;;  %v1001_v5 = vmul.f32 %v4537_v25, %v1000_v10  ;;  %v1481_v53 = vld [vmem:[%s8237_s6] sm:$0xff] }
  0xe1   : > { %v4553_v4 = vpop.eup %4552  ;;  %v1040_v6 = vmul.f32 0.01, %v968_v24  ;;  %v1041_v9 = vmul.f32 0.01, %v977_v31  ;;  %v1014_v36 = vadd.f32 1.0, %v5514_v41  ;;  %v1010_v62 = vmul.f32 %v4539_v47, %v1009_v18  ;;  %1487 = vperm.xlu2 %4511, %v1481_v53  }
  0xe2   : > { %v4555_v20 = vpop.eup %4554  ;;  %v998_v21 = vmul.f32 0.6931472, %v4553_v4  ;;  %v1032_v63 = vmul.f32 0.01, %v896_v1  ;;  %v1017_v39 = vmul.f32 -0.5, %v5514_v41  ;;  %vm841_vm2 = vcmp.gt.f32.partialorder %v5359_v48, 20.0 }
  0xe3   : > { %v1007_v19 = vmul.f32 0.6931472, %v4555_v20  ;;  %v1037_v54 = vmul.f32 0.01, %v941_v12  ;;  %4560 = vlog2.f32 %v1014_v36  ;;  %v1023_v49 = vadd.f32 1.0, %v4551_v44  ;;  %v5544_v3 = vpop.eup %4556 }
  0xe4   : > { %v1004_v10 = vsel %vm5527_vm13, %v1001_v5, %v998_v21  ;;  %v902_v25 = vmul.f32 %v5429_v46, %v901_v60  ;;  %v8260_v43 = vand.u32 2147483647, %v5429_v46  ;;  %v1026_v0 = vmul.f32 -0.5, %v4551_v44 }
  0xe5   : > { %v4559_v27 = vpop.eup %4558  ;;  %v1044_v26 = vmul.f32 0.01, %v1004_v10  ;;  %v1013_v17 = vsel %vm5531_vm14, %v1010_v62, %v1007_v19  ;;  %v1018_v45 = vadd.f32 1.0, %v1017_v39  ;;  %4562 = vlog2.f32 %v1023_v49 }
  0xe6   : > { %vm5551_vm3 = vcmp.lt.f32.partialorder %v8260_v43, 0.0004427343  ;;  %v1045_v23 = vmul.f32 0.01, %v1013_v17  ;;  %v1056_v46 = vsel %vm848_vm7, %v5389_v7, %v1040_v6  ;;  %v1057_v18 = vsel %vm849_vm8, %v5391_v8, %v1041_v9 }
  0xe7   : > { %v899_v24 = vmul.f32 0.6931472, %v4559_v27  ;;  %v1060_v31 = vsel %vm852_vm11, %v5421_v33, %v1044_v26  ;;  %v1020_v1 = vand.u32 2147483647, %v5514_v41  ;;  %v1027_v60 = vadd.f32 1.0, %v1026_v0 }
  0xe8   : > { %v1029_v30 = vand.u32 2147483647, %v4551_v44  ;;  %1117 = vmatpush.msrb.mxu0 %v1060_v31  ;;  %v1061_v13 = vsel %vm853_vm12, %v5424_v34, %v1045_v23  ;;  %v1048_v7 = vsel %vm840_vm10, %v5344_v37, %v1032_v63  ;;  %v978_v14 = vadd.f32 1.0, %v5504_v16 }
  0xe9   : > { %v905_v8 = vsel %vm5551_vm3, %v902_v25, %v899_v24  ;;  %v4561_v51 = vpop.eup %4560  ;;  %1146 = vmatpush.msrb.mxu1 %v1061_v13  ;;  %v1053_v33 = vsel %vm845_vm15, %v5363_v50, %v1037_v54  ;;  %v1019_v12 = vmul.f32 %v5514_v41, %v1018_v45  ;;  %v981_v34 = vmul.f32 -0.5, %v5504_v16  ;;  %v5593_v41 = vld [vmem:[%s8265_s24] sm:$0xff]  ;;  %v2311_v13 = vld [vmem:[%s8184_s11 + $0x10] sm:$0xff]  ;;  %s623_s24 = scalar_lea.vmem [#allocation2], %s4300_s23  ;;  %s4221_s23 = scalar_lea.sflag [#allocation3], %s621_s1 }
  0xea   : > { %v1033_v52 = vmul.f32 0.01, %v905_v8  ;;  %1118 = vmatpush.msrb.mxu0 %v1056_v46  ;;  %v1016_v56 = vmul.f32 0.6931472, %v4561_v51  ;;  %4564 = vlog2.f32 %v978_v14  ;;  %v987_v37 = vadd.f32 1.0, %v5544_v3  ;;  %s4234_s27 = sshll.u32 %s623_s24, 4  ;;  %s4235_s27 = int_to_ptr.vmem [resolvable:$true] %s4234_s27 }
  0xeb   : > { %v990_v38 = vmul.f32 -0.5, %v5544_v3  ;;  %v4563_v4 = vpop.eup %4562  ;;  %1147 = vmatpush.msrb.mxu1 %v1057_v18  ;;  %vm1021_vm4 = vcmp.lt.f32.partialorder %v1020_v1, 0.0004427343  ;;  %v1028_v5 = vmul.f32 %v4551_v44, %v1027_v60  ;;  %vm5586_vm5 = vcmp.lt.f32.partialorder %v1029_v30, 0.0004427343 }
  0xec   : > { %vm1092_vm6 = vcmask 261120   ;;  %1119 = vmatpush.msrb.mxu0 %v1052_v2  ;;  %v1022_v50 = vsel %vm1021_vm4, %v1019_v12, %v1016_v56  ;;  %v1025_v55 = vmul.f32 0.6931472, %v4563_v4  ;;  %v982_v9 = vadd.f32 1.0, %v981_v34 }
  0xed   : > { %4566 = vlog2.f32 %v987_v37  ;;  %1148 = vmatpush.msrb.mxu1 %v1053_v33  ;;  %vm854_vm7 = vcmp.gt.f32.partialorder %v5468_v32, 20.0  ;;  %v1046_v36 = vmul.f32 0.01, %v1022_v50  ;;  %v984_v44 = vand.u32 2147483647, %v5504_v16  ;;  %v1894_v32 = vld [vmem:[%s8181_s8 + $0x8] sm:$0xff] }
  0xee   : > { %v942_v20 = vadd.f32 1.0, %v5480_v58  ;;  %1120 = vmatpush.msrb.mxu0 %v1048_v7  ;;  %v1049_v2 = vsel %vm841_vm2, %v5351_v40, %v1033_v52  ;;  %v1031_v21 = vsel %vm5586_vm5, %v1028_v5, %v1025_v55  ;;  %v991_v62 = vadd.f32 1.0, %v990_v38  ;;  %1904 = vperm.xlu2 %4511, %v1894_v32   ;;  %v8267_v52 = vld [vmem:[#allocation18_spill] sm:$0xff]  ;;  %v8269_v50 = vld [vmem:[#allocation19_spill] sm:$0xff] }
  0xef   : > { %v945_v63 = vmul.f32 -0.5, %v5480_v58  ;;  %1149 = vmatpush.msrb.mxu1 %v1049_v2  ;;  %v1062_v39 = vsel %vm854_vm7, %v5461_v22, %v1046_v36  ;;  %vm855_vm8 = vcmp.gt.f32.partialorder %v5471_v35, 20.0  ;;  %v1047_v19 = vmul.f32 0.01, %v1031_v21  ;;  %4323 = vmatmul.msk.f32.vlgmr.msrb.gmra.mxu0 %vm1092_vm6, %v5593_v41  ;;  %v2897_v2 = vld [vmem:[%s8186_s13 + $0x18] sm:$0xff] }
  0xf0   : > { %4568 = vlog2.f32 %v942_v20  ;;  %v4565_v40 = vpop.eup %4564  ;;  %1175 = vmatpush.msrb.mxu2 %v1062_v39  ;;  %4327 = vmatmul.msk.f32.vlgmr.msrb.gmra.mxu1 %vm1092_vm6, %v5593_v41  ;;  %vm850_vm9 = vcmp.gt.f32.partialorder %v5427_v42, 20.0  ;;  %v983_v48 = vmul.f32 %v5504_v16, %v982_v9  ;;  %v993_v54 = vand.u32 2147483647, %v5544_v3  ;;  %v8270_v9 = vld [vmem:[#allocation17_spill] sm:$0xff]  ;;  %v8271_v21 = vld [vmem:[#allocation14_spill] sm:$0xff] }
  0xf1   : > { %v951_v22 = vadd.f32 1.0, %v5488_v11  ;;  %v1063_v35 = vsel %vm855_vm8, %v5464_v15, %v1047_v19  ;;  %v980_v49 = vmul.f32 0.6931472, %v4565_v40  ;;  %v946_v10 = vadd.f32 1.0, %v945_v63  ;;  %v5626_v15 = vld [vmem:[%s8266_s28 + $0x8] sm:$0xff]  ;;  %v8273_v19 = vld [vmem:[#allocation15_spill] sm:$0xff] }
  0xf2   : > { %v954_v25 = vmul.f32 -0.5, %v5488_v11  ;;  %1204 = vmatpush.msrb.mxu3 %v1063_v35  ;;  %vm985_vm10 = vcmp.lt.f32.partialorder %v984_v44, 0.0004427343  ;;  %v992_v47 = vmul.f32 %v5544_v3, %v991_v62  ;;  %v906_v0 = vadd.f32 1.0, %v5437_v57  ;;  %v8272_v62 = vld [vmem:[#allocation12_spill] sm:$0xff] }
  0xf3   : > { %v4567_v43 = vpop.eup %4566  ;;  %4570 = vlog2.f32 %v951_v22  ;;  %v986_v16 = vsel %vm985_vm10, %v983_v48, %v980_v49  ;;  %v948_v26 = vand.u32 2147483647, %v5480_v58  ;;  %v909_v17 = vmul.f32 -0.5, %v5437_v57  ;;  %v1067_v48 = vld [vmem:[%s8266_s28 + $0x18] sm:$0xff]  ;;  %v3307_v22 = vld [vmem:[%s8188_s15 + $0x8] sm:$0xff] }
  0xf4   : > { %v989_v27 = vmul.f32 0.6931472, %v4567_v43  ;;  %v1042_v45 = vmul.f32 0.01, %v986_v16  ;;  %vm994_vm11 = vcmp.lt.f32.partialorder %v993_v54, 0.0004427343  ;;  %4572 = vlog2.f32 %v906_v0  ;;  %v5696_v43 = vpop.permute.xlu0 %1079 }
  0xf5   : > { %v957_v53 = vand.u32 2147483647, %v5488_v11  ;;  %v947_v46 = vmul.f32 %v5480_v58, %v946_v10  ;;  %v955_v18 = vadd.f32 1.0, %v954_v25  ;;  %v915_v24 = vadd.f32 1.0, %v5444_v61  ;;  %v2894_v54 = vld [vmem:[%s8186_s13] sm:$0xff]  ;;  %v5694_v25 = vpop.permute.xlu2 %1089 }
  0xf6   : > { %v4569_v3 = vpop.eup %4568  ;;  %v995_v23 = vsel %vm994_vm11, %v992_v47, %v989_v27  ;;  %v1058_v31 = vsel %vm850_vm9, %v5415_v28, %v1042_v45  ;;  %v910_v30 = vadd.f32 1.0, %v909_v17  ;;  %vm851_vm12 = vcmp.gt.f32.partialorder %v5441_v59, 20.0  ;;  %2610 = vperm.xlu2 %4511, %v2311_v13   ;;  %v4127_v35 = vld [vmem:[%s8192_s19] sm:$0x1f]  ;;  %v1075_v27 = vpop.permute.xlu1 %1074 }
  0xf7   : > { %v1043_v1 = vmul.f32 0.01, %v995_v23  ;;  %v944_v60 = vmul.f32 0.6931472, %v4569_v3  ;;  %1176 = vmatpush.msrb.mxu2 %v1058_v31  ;;  %vm949_vm13 = vcmp.lt.f32.partialorder %v948_v26, 0.0004427343  ;;  %4574 = vlog2.f32 %v915_v24  ;;  %4324 = vmatmul.msk.f32.gmra.mxu0 %vm1092_vm6, %v5626_v15 }
  0xf8   : > { %v918_v58 = vmul.f32 -0.5, %v5444_v61  ;;  %v912_v8 = vand.u32 2147483647, %v5437_v57  ;;  %4328 = vmatmul.msk.f32.gmra.mxu1 %vm1092_vm6, %v5626_v15  ;;  %v956_v59 = vmul.f32 %v5488_v11, %v955_v18  ;;  %vm846_vm14 = vcmp.gt.f32.partialorder %v8267_v52, 20.0  ;;  %v1066_v11 = vld [vmem:[%s8266_s28 + $0x10] sm:$0xff] }
  0xf9   : > { %v4571_v7 = vpop.eup %4570  ;;  %v1059_v28 = vsel %vm851_vm12, %v5417_v29, %v1043_v1  ;;  %v950_v42 = vsel %vm949_vm13, %v947_v46, %v944_v60  ;;  %vm958_vm15 = vcmp.lt.f32.partialorder %v957_v53, 0.0004427343  ;;  %v911_v12 = vmul.f32 %v5437_v57, %v910_v30  ;;  %v8268_v29 = vld [vmem:[#allocation16_spill] sm:$0xff] }
  0xfa   : > { %1205 = vmatpush.msrb.mxu3 %v1059_v28  ;;  %v1038_v14 = vmul.f32 0.01, %v950_v42  ;;  %v953_v51 = vmul.f32 0.6931472, %v4571_v7  ;;  %v4573_v33 = vpop.eup %4572  ;;  %v919_v34 = vadd.f32 1.0, %v918_v58  ;;  %vm847_vm3 = vcmp.gt.f32.partialorder %v8269_v50, 20.0 }
  0xfb   : > { %v908_v38 = vmul.f32 0.6931472, %v4573_v33  ;;  %v921_v4 = vand.u32 2147483647, %v5444_v61  ;;  %vm913_vm2 = vcmp.lt.f32.partialorder %v912_v8, 0.0004427343 }
  0xfc   : > { %v1054_v56 = vsel %vm846_vm14, %v8268_v29, %v1038_v14  ;;  %v959_v37 = vsel %vm958_vm15, %v956_v59, %v953_v51  ;;  %v920_v20 = vmul.f32 %v5444_v61, %v919_v34  ;;  %vm842_vm4 = vcmp.gt.f32.partialorder %v8271_v21, 20.0  ;;  %v8274_v61 = vld [vmem:[#allocation13_spill] sm:$0xff] }
  0xfd   : > { %1177 = vmatpush.msrb.mxu2 %v1054_v56  ;;  %v1039_v5 = vmul.f32 0.01, %v959_v37  ;;  %v4575_v6 = vpop.eup %4574  ;;  %v914_v55 = vsel %vm913_vm2, %v911_v12, %v908_v38  ;;  %vm922_vm5 = vcmp.lt.f32.partialorder %v921_v4, 0.0004427343  ;;  %vm843_vm7 = vcmp.gt.f32.partialorder %v8273_v19, 20.0  ;;  %v5711_v53 = vpop.permute.xlu2 %1084 }
  0xfe   : > { %v1034_v36 = vmul.f32 0.01, %v914_v55  ;;  %v917_v44 = vmul.f32 0.6931472, %v4575_v6  ;;  %2915 = vperm.xlu2 %4511, %v2897_v2  }
  0xff   : > { %v1055_v57 = vsel %vm847_vm3, %v8270_v9, %v1039_v5  ;;  %4325 = vmatmul.msk.f32.gmra.mxu0 %vm1092_vm6, %v1066_v11 }
 0x100   : > { %1206 = vmatpush.msrb.mxu3 %v1055_v57  ;;  %v1050_v63 = vsel %vm842_vm4, %v8272_v62, %v1034_v36  ;;  %v923_v32 = vsel %vm922_vm5, %v920_v20, %v917_v44  ;;  %4329 = vmatmul.msk.f32.gmra.mxu1 %vm1092_vm6, %v1066_v11 }
 0x101   : > { %1178 = vmatpush.msrb.mxu2 %v1050_v63  ;;  %v1035_v39 = vmul.f32 0.01, %v923_v32 }
 0x102   : > { %4331 = vmatmul.msk.f32.vlgmr.msrb.gmra.mxu2 %vm1092_vm6, %v5593_v41 }
 0x103   : > { %v1051_v40 = vsel %vm843_vm7, %v8274_v61, %v1035_v39 }
 0x104   : > { %1207 = vmatpush.msrb.mxu3 %v1051_v40 }
 0x105   : > { %4335 = vmatmul.msk.f32.vlgmr.msrb.gmra.mxu3 %vm1092_vm6, %v5593_v41  ;;  %v3720_v41 = vld [vmem:[%s8190_s17 + $0x10] sm:$0xff] }
 0x106   : > { %2900 = vperm.xlu2 %4511, %v2894_v54  }
 0x107   : > { %4326 = vmatmul.msk.f32.gmra.mxu0 %vm1092_vm6, %v1067_v48 }
 0x108   : > { %4330 = vmatmul.msk.f32.gmra.mxu1 %vm1092_vm6, %v1067_v48 }
 0x10a   : > { %4332 = vmatmul.msk.f32.gmra.mxu2 %vm1092_vm6, %v5626_v15 }
 0x10d   : > { %4336 = vmatmul.msk.f32.gmra.mxu3 %vm1092_vm6, %v5626_v15 }
 0x10e   : > { %3317 = vperm.xlu2 %4511, %v3307_v22  }
 0x112   : > { %4333 = vmatmul.msk.f32.gmra.mxu2 %vm1092_vm6, %v1066_v11 }
 0x115   : > { %4337 = vmatmul.msk.f32.gmra.mxu3 %vm1092_vm6, %v1066_v11 }
 0x116   : > { %3734 = vperm.xlu2 %4511, %v3720_v41  }
 0x11a   : > { %4334 = vmatmul.msk.f32.gmra.mxu2 %vm1092_vm6, %v1067_v48 }
 0x11d   : > { %4338 = vmatmul.msk.f32.gmra.mxu3 %vm1092_vm6, %v1067_v48 }
 0x11e   : > { %4130 = vperm.xlu2 %4511, %v4127_v35  }
 0x16c   : > { %v1122_v49 = vpop.f32.mrf.mxu0 }
 0x16d   : > { %v1151_v10 = vpop.f32.mrf.mxu1  ;;  %v5704_v17 = vadd.f32 %v1122_v49, %v1075_v27 }
 0x16e   : > { %v5706_v15 = vadd.f32 %v1151_v10, %v1075_v27 }
 0x16f   : > { %v5715_v46 = vmul.f32 100.0, %v5704_v17 }
 0x170   : > { %v5721_v31 = vmul.f32 100.0, %v5706_v15 }
 0x171   : > { %v1237_v7 = vmin.f32 %v5715_v46, 20.0 }
 0x172   : > { %v1238_v42 = vmin.f32 %v5721_v31, 20.0 }
 0x173   : > { %v1269_v52 = vmul.f32 1.442695, %v1237_v7 }
 0x174   : > { %v1125_v47 = vpop.f32.mrf.mxu0  ;;  %v1271_v56 = vmul.f32 1.442695, %v1238_v42 }
 0x175   : > { %v5699_v0 = vadd.f32 %v1125_v47, %v5696_v43  ;;  %v1154_v16 = vpop.f32.mrf.mxu1 }
 0x176   : > { %v5709_v45 = vadd.f32 %v1154_v16, %v5696_v43 }
 0x177   : > { %v5702_v26 = vmul.f32 100.0, %v5699_v0 }
 0x178   : > { %v5727_v60 = vmul.f32 100.0, %v5709_v45 }
 0x179   : > { %v1241_v3 = vmin.f32 %v5702_v26, 20.0  ;;  %vm1257_vm2 = vcmp.gt.f32.partialorder %v5702_v26, 20.0 }
 0x17a   : > { %v1242_v14 = vmin.f32 %v5727_v60, 20.0  ;;  %vm1258_vm5 = vcmp.gt.f32.partialorder %v5727_v60, 20.0 }
 0x17b   : > { %v1277_v13 = vmul.f32 1.442695, %v1241_v3 }
 0x17c   : > { %v1128_v23 = vpop.f32.mrf.mxu0  ;;  %v1279_v4 = vmul.f32 1.442695, %v1242_v14 }
 0x17d   : > { %v5718_v18 = vadd.f32 %v1128_v23, %v5711_v53  ;;  %v1157_v24 = vpop.f32.mrf.mxu1  ;;  %4576 = vpow2.f32 %v1277_v13 }
 0x17e   : > { %v5724_v1 = vadd.f32 %v1157_v24, %v5711_v53 }
 0x17f   : > { %v5730_v30 = vmul.f32 100.0, %v5718_v18 }
 0x180   : > { %v5733_v58 = vmul.f32 100.0, %v5724_v1 }
 0x181   : > { %v1245_v28 = vmin.f32 %v5730_v30, 20.0  ;;  %vm1261_vm13 = vcmp.gt.f32.partialorder %v5730_v30, 20.0 }
 0x182   : > { %v1246_v8 = vmin.f32 %v5733_v58, 20.0  ;;  %vm1262_vm3 = vcmp.gt.f32.partialorder %v5733_v58, 20.0 }
 0x183   : > { %v1285_v51 = vmul.f32 1.442695, %v1245_v28  ;;  %v5760_v57 = vpop.eup %4576 }
 0x184   : > { %v1287_v59 = vmul.f32 1.442695, %v1246_v8  ;;  %v1131_v33 = vpop.f32.mrf.mxu0  ;;  %v1337_v49 = vadd.f32 1.0, %v5760_v57  ;;  %v1340_v28 = vmul.f32 -0.5, %v5760_v57 }
 0x185   : > { %v1180_v12 = vpop.f32.mrf.mxu2  ;;  %4578 = vpow2.f32 %v1285_v51  ;;  %v5741_v34 = vadd.f32 %v1131_v33, %v5694_v25  ;;  %v1160_v29 = vpop.f32.mrf.mxu1 }
 0x186   : > { %v5743_v37 = vadd.f32 %v1180_v12, %v1075_v27  ;;  %4580 = vpow2.f32 %v1287_v59  ;;  %v5746_v38 = vadd.f32 %v1160_v29, %v5694_v25 }
 0x187   : > { %v5749_v5 = vmul.f32 100.0, %v5741_v34  ;;  %4582 = vpow2.f32 %v1269_v52 }
 0x188   : > { %v5752_v11 = vmul.f32 100.0, %v5743_v37  ;;  %v1209_v6 = vpop.f32.mrf.mxu3  ;;  %v5755_v50 = vmul.f32 100.0, %v5746_v38  ;;  %4584 = vpow2.f32 %v1271_v56 }
 0x189   : > { %v5757_v55 = vadd.f32 %v1209_v6, %v1075_v27  ;;  %v1249_v9 = vmin.f32 %v5749_v5, 20.0  ;;  %4586 = vpow2.f32 %v1279_v4  ;;  %v1341_v6 = vadd.f32 1.0, %v1340_v28 }
 0x18a   : > { %v1239_v36 = vmin.f32 %v5752_v11, 20.0  ;;  %v1250_v44 = vmin.f32 %v5755_v50, 20.0  ;;  %vm1265_vm10 = vcmp.gt.f32.partialorder %v5749_v5, 20.0  ;;  %vm1266_vm14 = vcmp.gt.f32.partialorder %v5755_v50, 20.0 }
 0x18b   : > { %v4579_v20 = vpop.eup %4578  ;;  %v5765_v2 = vmul.f32 100.0, %v5757_v55  ;;  %v1293_v21 = vmul.f32 1.442695, %v1249_v9 }
 0x18c   : > { %v4581_v62 = vpop.eup %4580  ;;  %v1273_v63 = vmul.f32 1.442695, %v1239_v36  ;;  %v1295_v32 = vmul.f32 1.442695, %v1250_v44  ;;  %v1373_v39 = vadd.f32 1.0, %v4579_v20  ;;  %v1376_v19 = vmul.f32 -0.5, %v4579_v20 }
 0x18d   : > { %v1240_v61 = vmin.f32 %v5765_v2, 20.0  ;;  %v1183_v40 = vpop.f32.mrf.mxu2  ;;  %4588 = vpow2.f32 %v1293_v21  ;;  %v1382_v54 = vadd.f32 1.0, %v4581_v62  ;;  %v1385_v22 = vmul.f32 -0.5, %v4581_v62  ;;  %v5771_v41 = vpop.eup %4582 }
 0x18e   : > { %4590 = vpow2.f32 %v1273_v63  ;;  %v5769_v48 = vadd.f32 %v1183_v40, %v5696_v43  ;;  %v1379_v35 = vand.u32 2147483647, %v4579_v20  ;;  %v5774_v10 = vpop.eup %4584  ;;  %v1377_v3 = vadd.f32 1.0, %v1376_v19 }
 0x18f   : > { %4592 = vpow2.f32 %v1295_v32  ;;  %v1275_v47 = vmul.f32 1.442695, %v1240_v61  ;;  %v5779_v23 = vpop.eup %4586  ;;  %v1386_v13 = vadd.f32 1.0, %v1385_v22  ;;  %v1388_v7 = vand.u32 2147483647, %v4581_v62 }
 0x190   : > { %v5777_v16 = vmul.f32 100.0, %v5769_v48  ;;  %v1212_v27 = vpop.f32.mrf.mxu3  ;;  %4594 = vlog2.f32 %v1373_v39  ;;  %vm5786_vm8 = vcmp.lt.f32.partialorder %v1379_v35, 0.0004427343  ;;  %v1378_v52 = vmul.f32 %v4579_v20, %v1377_v3 }
 0x191   : > { %v5782_v24 = vadd.f32 %v1212_v27, %v5696_v43  ;;  %4596 = vlog2.f32 %v1382_v54  ;;  %v1387_v56 = vmul.f32 %v4581_v62, %v1386_v13  ;;  %vm5795_vm9 = vcmp.lt.f32.partialorder %v1388_v7, 0.0004427343 }
 0x192   : > { %v1243_v42 = vmin.f32 %v5777_v16, 20.0  ;;  %4598 = vlog2.f32 %v1337_v49  ;;  %v1343_v63 = vand.u32 2147483647, %v5760_v57  ;;  %v1346_v22 = vadd.f32 1.0, %v5779_v23 }
 0x193   : > { %v4589_v8 = vpop.eup %4588  ;;  %v5793_v59 = vmul.f32 100.0, %v5782_v24  ;;  %4600 = vpow2.f32 %v1275_v47  ;;  %v1342_v3 = vmul.f32 %v5760_v57, %v1341_v6  ;;  %v1349_v14 = vmul.f32 -0.5, %v5779_v23 }
 0x194   : > { %v5790_v51 = vpop.eup %4590  ;;  %v1409_v43 = vadd.f32 1.0, %v4589_v8  ;;  %v1412_v33 = vmul.f32 -0.5, %v4589_v8  ;;  %v5799_v36 = vmul.f32 1.442695, %v1243_v42  ;;  %v1415_v21 = vand.u32 2147483647, %v4589_v8 }
 0x195   : > { %v4593_v12 = vpop.eup %4592  ;;  %v1186_v29 = vpop.f32.mrf.mxu2  ;;  %v1244_v62 = vmin.f32 %v5793_v59, 20.0  ;;  %vm5816_vm11 = vcmp.lt.f32.partialorder %v1343_v63, 0.0004427343  ;;  %v1313_v26 = vmul.f32 -0.5, %v5774_v10 }
 0x196   : > { %v4595_v9 = vpop.eup %4594  ;;  %v5802_v44 = vadd.f32 %v1186_v29, %v5711_v53  ;;  %4602 = vlog2.f32 %v1409_v43  ;;  %v1413_v20 = vadd.f32 1.0, %v1412_v33  ;;  %v1418_v32 = vadd.f32 1.0, %v4593_v12 }
 0x197   : > { %v1421_v39 = vmul.f32 -0.5, %v4593_v12  ;;  %v4597_v19 = vpop.eup %4596  ;;  %v1375_v54 = vmul.f32 0.6931472, %v4595_v9  ;;  %v1424_v47 = vand.u32 2147483647, %v4593_v12 }
 0x198   : > { %v5807_v61 = vmul.f32 100.0, %v5802_v44  ;;  %v1215_v40 = vpop.f32.mrf.mxu3  ;;  %v4599_v35 = vpop.eup %4598  ;;  %v1384_v27 = vmul.f32 0.6931472, %v4597_v19  ;;  %4604 = vlog2.f32 %v1418_v32  ;;  %vm5825_vm12 = vcmp.lt.f32.partialorder %v1415_v21, 0.0004427343 }
 0x199   : > { %v5811_v49 = vadd.f32 %v1215_v40, %v5711_v53  ;;  %v1422_v7 = vadd.f32 1.0, %v1421_v39  ;;  %v5820_v42 = vpop.eup %4600  ;;  %v1414_v53 = vmul.f32 %v4589_v8, %v1413_v20  ;;  %v1381_v57 = vsel %vm5786_vm8, %v1378_v52, %v1375_v54 }
 0x19a   : > { %v1247_v13 = vmin.f32 %v5807_v61, 20.0  ;;  %v1390_v6 = vsel %vm5795_vm9, %v1387_v56, %v1384_v27  ;;  %v1339_v9 = vmul.f32 0.6931472, %v4599_v35  ;;  %4606 = vlog2.f32 %v1346_v22 }
 0x19b   : > { %v5823_v43 = vmul.f32 100.0, %v5811_v49  ;;  %vm5836_vm15 = vcmp.lt.f32.partialorder %v1424_v47, 0.0004427343  ;;  %v1352_v52 = vand.u32 2147483647, %v5779_v23  ;;  %v1423_v21 = vmul.f32 %v4593_v12, %v1422_v7 }
 0x19c   : > { %v1289_v29 = vmul.f32 1.442695, %v1247_v13  ;;  %v4603_v63 = vpop.eup %4602  ;;  %v1453_v20 = vmul.f32 0.01, %v1381_v57  ;;  %v1454_v40 = vmul.f32 0.01, %v1390_v6  ;;  %v1345_v54 = vsel %vm5816_vm11, %v1342_v3, %v1339_v9 }
 0x19d   : > { %v1248_v32 = vmin.f32 %v5823_v43, 20.0  ;;  %v1189_v39 = vpop.f32.mrf.mxu2  ;;  %v1411_v4 = vmul.f32 0.6931472, %v4603_v63  ;;  %v1350_v22 = vadd.f32 1.0, %v1349_v14  ;;  %vm5854_vm4 = vcmp.lt.f32.partialorder %v1352_v52, 0.0004427343 }
 0x19e   : > { %v5844_v56 = vadd.f32 %v1189_v39, %v5694_v25  ;;  %v4605_v35 = vpop.eup %4604  ;;  %4608 = vpow2.f32 %v1289_v29  ;;  %v1449_v3 = vmul.f32 0.01, %v1345_v54  ;;  %v1301_v63 = vadd.f32 1.0, %v5771_v41 }
 0x19f   : > { %v1291_v19 = vmul.f32 1.442695, %v1248_v32  ;;  %v1417_v13 = vsel %vm5825_vm12, %v1414_v53, %v1411_v4  ;;  %v1420_v28 = vmul.f32 0.6931472, %v4605_v35  ;;  %v1351_v9 = vmul.f32 %v5779_v23, %v1350_v22 }
 0x1a0   : > { %v5850_v47 = vmul.f32 100.0, %v5844_v56  ;;  %v1218_v27 = vpop.f32.mrf.mxu3  ;;  %v1457_v57 = vmul.f32 0.01, %v1417_v13  ;;  %v4607_v6 = vpop.eup %4606  ;;  %v1304_v52 = vmul.f32 -0.5, %v5771_v41  ;;  %v1283_v23 = vmul.f32 1.442695, %v1244_v62 }
 0x1a1   : > { %v5859_v7 = vadd.f32 %v1218_v27, %v5694_v25  ;;  %4610 = vpow2.f32 %v1291_v19  ;;  %v1426_v25 = vsel %vm5836_vm15, %v1423_v21, %v1420_v28  ;;  %v1348_v32 = vmul.f32 0.6931472, %v4607_v6 }
 0x1a2   : > { %v1251_v29 = vmin.f32 %v5850_v47, 20.0  ;;  %v1473_v33 = vsel %vm1265_vm10, %v5741_v34, %v1457_v57  ;;  %v1458_v14 = vmul.f32 0.01, %v1426_v25  ;;  %4612 = vlog2.f32 %v1301_v63 }
 0x1a3   : > { %v5865_v53 = vmul.f32 100.0, %v5859_v7  ;;  %1529 = vmatpush.msra.mxu0 %v1473_v33  ;;  %v1469_v5 = vsel %vm1261_vm13, %v5718_v18, %v1453_v20  ;;  %v1354_v34 = vsel %vm5854_vm4, %v1351_v9, %v1348_v32  ;;  %v1465_v62 = vsel %vm1257_vm2, %v5699_v0, %v1449_v3 }
 0x1a4   : > { %v1297_v39 = vmul.f32 1.442695, %v1251_v29  ;;  %v5881_v8 = vpop.eup %4608  ;;  %v1474_v21 = vsel %vm1266_vm14, %v5746_v38, %v1458_v14  ;;  %v1450_v19 = vmul.f32 0.01, %v1354_v34  ;;  %v1305_v30 = vadd.f32 1.0, %v1304_v52 }
 0x1a5   : > { %v1252_v4 = vmin.f32 %v5865_v53, 20.0  ;;  %1530 = vmatpush.msra.mxu0 %v1469_v5  ;;  %1558 = vmatpush.msra.mxu1 %v1474_v21  ;;  %v1307_v18 = vand.u32 2147483647, %v5771_v41  ;;  %v1310_v20 = vadd.f32 1.0, %v5774_v10  ;;  %v1470_v38 = vsel %vm1262_vm3, %v5724_v1, %v1454_v40 }
 0x1a6   : > { %4614 = vpow2.f32 %v1297_v39  ;;  %v1466_v50 = vsel %vm1258_vm5, %v5709_v45, %v1450_v19  ;;  %v1391_v35 = vadd.f32 1.0, %v5881_v8  ;;  %v1394_v27 = vmul.f32 -0.5, %v5881_v8 }
 0x1a7   : > { %v1299_v54 = vmul.f32 1.442695, %v1252_v4  ;;  %v5891_v22 = vpop.eup %4610  ;;  %4616 = vpow2.f32 %v5799_v36  ;;  %1531 = vmatpush.msra.mxu0 %v1465_v62  ;;  %1559 = vmatpush.msra.mxu1 %v1470_v38  ;;  %v1306_v1 = vmul.f32 %v5771_v41, %v1305_v30  ;;  %vm1308_vm7 = vcmp.lt.f32.partialorder %v1307_v18, 0.0004427343  ;;  %v5913_v41 = vld [vmem:[%s8287_s5] sm:$0xff] }
 0x1a8   : > { %v4613_v0 = vpop.eup %4612  ;;  %v1314_v40 = vadd.f32 1.0, %v1313_v26  ;;  %v1316_v13 = vand.u32 2147483647, %v5774_v10  ;;  %v1400_v60 = vadd.f32 1.0, %v5891_v22  ;;  %v1403_v28 = vmul.f32 -0.5, %v5891_v22 }
 0x1a9   : > { %4618 = vpow2.f32 %v1299_v54  ;;  %1560 = vmatpush.msra.mxu1 %v1466_v50  ;;  %v1303_v36 = vmul.f32 0.6931472, %v4613_v0  ;;  %v1395_v29 = vadd.f32 1.0, %v1394_v27  ;;  %vm1253_vm8 = vcmp.gt.f32.partialorder %v5715_v46, 20.0 }
 0x1aa   : > { %4620 = vlog2.f32 %v1310_v20  ;;  %vm1254_vm9 = vcmp.gt.f32.partialorder %v5721_v31, 20.0  ;;  %v1397_v63 = vand.u32 2147483647, %v5881_v8  ;;  %vm5917_vm10 = vcmp.lt.f32.partialorder %v1316_v13, 0.0004427343  ;;  %v6022_v13 = vpop.permute.xlu1 %1492 }
 0x1ab   : > { %4622 = vpow2.f32 %v1283_v23  ;;  %v1309_v12 = vsel %vm1308_vm7, %v1306_v1, %v1303_v36  ;;  %v1315_v23 = vmul.f32 %v5774_v10, %v1314_v40  ;;  %v1404_v5 = vadd.f32 1.0, %v1403_v28 }
 0x1ac   : > { %v4615_v58 = vpop.eup %4614  ;;  %4624 = vlog2.f32 %v1391_v35  ;;  %v1445_v6 = vmul.f32 0.01, %v1309_v12  ;;  %vm1267_vm11 = vcmp.gt.f32.partialorder %v5850_v47, 20.0  ;;  %v1396_v21 = vmul.f32 %v5881_v8, %v1395_v29 }
 0x1ad   : > { %v1427_v45 = vadd.f32 1.0, %v4615_v58  ;;  %v1430_v57 = vmul.f32 -0.5, %v4615_v58  ;;  %v5906_v3 = vpop.eup %4616  ;;  %4626 = vlog2.f32 %v1400_v60  ;;  %v1406_v62 = vand.u32 2147483647, %v5891_v22 }
 0x1ae   : > { %v1461_v25 = vsel %vm1253_vm8, %v5704_v17, %v1445_v6  ;;  %v1433_v17 = vand.u32 2147483647, %v4615_v58  ;;  %vm5931_vm12 = vcmp.lt.f32.partialorder %v1397_v63, 0.0004427343  ;;  %v1355_v30 = vadd.f32 1.0, %v5906_v3 }
 0x1af   : > { %v4619_v9 = vpop.eup %4618  ;;  %4628 = vlog2.f32 %v1427_v45  ;;  %1532 = vmatpush.msra.mxu0 %v1461_v25  ;;  %v1431_v4 = vadd.f32 1.0, %v1430_v57  ;;  %v1358_v0 = vmul.f32 -0.5, %v5906_v3  ;;  %vm1268_vm13 = vcmp.gt.f32.partialorder %v5865_v53, 20.0 }
 0x1b0   : > { %v4621_v33 = vpop.eup %4620  ;;  %v1436_v39 = vadd.f32 1.0, %v4619_v9  ;;  %v1439_v14 = vmul.f32 -0.5, %v4619_v9  ;;  %4339 = vmatmul.msk.f32.vlgmr.msra.gmra.mxu0 %vm1092_vm6, %v5913_v41  ;;  %v1442_v26 = vand.u32 2147483647, %v4619_v9  ;;  %v1405_v27 = vmul.f32 %v5891_v22, %v1404_v5  ;;  %v5953_v22 = vld [vmem:[%s8287_s5 + $0x8] sm:$0xff] }
 0x1b1   : > { %v5921_v46 = vpop.eup %4622  ;;  %v1312_v52 = vmul.f32 0.6931472, %v4621_v33  ;;  %v1432_v8 = vmul.f32 %v4615_v58, %v1431_v4  ;;  %vm5944_vm14 = vcmp.lt.f32.partialorder %v1406_v62, 0.0004427343  ;;  %vm1434_vm15 = vcmp.lt.f32.partialorder %v1433_v17, 0.0004427343 }
 0x1b2   : > { %v4625_v34 = vpop.eup %4624  ;;  %4630 = vlog2.f32 %v1436_v39  ;;  %v1440_v38 = vadd.f32 1.0, %v1439_v14  ;;  %v1359_v31 = vadd.f32 1.0, %v1358_v0  ;;  %v1361_v57 = vand.u32 2147483647, %v5906_v3 }
 0x1b3   : > { %v1318_v19 = vsel %vm5917_vm10, %v1315_v23, %v1312_v52  ;;  %v1393_v54 = vmul.f32 0.6931472, %v4625_v34  ;;  %v4627_v18 = vpop.eup %4626  ;;  %4632 = vlog2.f32 %v1355_v30  ;;  %v1367_v28 = vmul.f32 -0.5, %v5921_v46 }
 0x1b4   : > { %v1446_v20 = vmul.f32 0.01, %v1318_v19  ;;  %v1402_v35 = vmul.f32 0.6931472, %v4627_v18  ;;  %v1441_v45 = vmul.f32 %v4619_v9, %v1440_v38  ;;  %vm1443_vm2 = vcmp.lt.f32.partialorder %v1442_v26, 0.0004427343 }
 0x1b5   : > { %v4629_v50 = vpop.eup %4628  ;;  %v1399_v40 = vsel %vm5931_vm12, %v1396_v21, %v1393_v54  ;;  %vm1263_vm3 = vcmp.gt.f32.partialorder %v5807_v61, 20.0  ;;  %v1319_v25 = vadd.f32 1.0, %v5790_v51  ;;  %v1360_v14 = vmul.f32 %v5906_v3, %v1359_v31  ;;  %v1479_v19 = vld [vmem:[%s8287_s5 + $0x10] sm:$0xff] }
 0x1b6   : > { %v1462_v36 = vsel %vm1254_vm9, %v5706_v15, %v1446_v20  ;;  %v1429_v1 = vmul.f32 0.6931472, %v4629_v50  ;;  %v1408_v58 = vsel %vm5944_vm14, %v1405_v27, %v1402_v35  ;;  %v1364_v15 = vadd.f32 1.0, %v5921_v46 }
 0x1b7   : > { %1561 = vmatpush.msra.mxu1 %v1462_v36  ;;  %v1455_v63 = vmul.f32 0.01, %v1399_v40  ;;  %v1456_v33 = vmul.f32 0.01, %v1408_v58  ;;  %v1322_v52 = vmul.f32 -0.5, %v5790_v51  ;;  %v1368_v61 = vadd.f32 1.0, %v1367_v28  ;;  %v6017_v36 = vpop.permute.xlu0 %1497 }
 0x1b8   : > { %v4631_v60 = vpop.eup %4630  ;;  %4343 = vmatmul.msk.f32.vlgmr.msra.gmra.mxu1 %vm1092_vm6, %v5913_v41  ;;  %v1435_v12 = vsel %vm1434_vm15, %v1432_v8, %v1429_v1  ;;  %4634 = vlog2.f32 %v1364_v15  ;;  %4340 = vmatmul.msk.f32.gmra.mxu0 %vm1092_vm6, %v5953_v22  ;;  %vm1362_vm4 = vcmp.lt.f32.partialorder %v1361_v57, 0.0004427343  ;;  %v1370_v34 = vand.u32 2147483647, %v5921_v46 }
 0x1b9   : > { %v1459_v6 = vmul.f32 0.01, %v1435_v12  ;;  %v1438_v29 = vmul.f32 0.6931472, %v4631_v60  ;;  %v4633_v32 = vpop.eup %4632  ;;  %4636 = vlog2.f32 %v1319_v25  ;;  %v1471_v5 = vsel %vm1263_vm3, %v5802_v44, %v1455_v63 }
 0x1ba   : > { %v1357_v4 = vmul.f32 0.6931472, %v4633_v32  ;;  %v1328_v17 = vadd.f32 1.0, %v5820_v42  ;;  %vm1264_vm5 = vcmp.gt.f32.partialorder %v5823_v43, 20.0  ;;  %v1331_v3 = vmul.f32 -0.5, %v5820_v42 }
 0x1bb   : > { %v1475_v9 = vsel %vm1267_vm11, %v5844_v56, %v1459_v6  ;;  %v1444_v39 = vsel %vm1443_vm2, %v1441_v45, %v1438_v29  ;;  %vm1259_vm7 = vcmp.gt.f32.partialorder %v5777_v16, 20.0  ;;  %v1323_v62 = vadd.f32 1.0, %v1322_v52 }
 0x1bc   : > { %1587 = vmatpush.msra.mxu2 %v1475_v9  ;;  %v1460_v23 = vmul.f32 0.01, %v1444_v39  ;;  %v1363_v47 = vsel %vm1362_vm4, %v1360_v14, %v1357_v4  ;;  %4638 = vlog2.f32 %v1328_v17  ;;  %v1472_v53 = vsel %vm1264_vm5, %v5811_v49, %v1456_v33 }
 0x1bd   : > { %v1451_v44 = vmul.f32 0.01, %v1363_v47  ;;  %v1325_v54 = vand.u32 2147483647, %v5790_v51  ;;  %vm1371_vm8 = vcmp.lt.f32.partialorder %v1370_v34, 0.0004427343  ;;  %v1324_v38 = vmul.f32 %v5790_v51, %v1323_v62 }
 0x1be   : > { %v1476_v56 = vsel %vm1268_vm13, %v5859_v7, %v1460_v23  ;;  %1588 = vmatpush.msra.mxu2 %v1471_v5  ;;  %v4635_v21 = vpop.eup %4634  ;;  %v1369_v7 = vmul.f32 %v5921_v46, %v1368_v61  ;;  %v1332_v18 = vadd.f32 1.0, %v1331_v3  ;;  %v1334_v26 = vand.u32 2147483647, %v5820_v42  ;;  %v1480_v51 = vld [vmem:[%s8287_s5 + $0x18] sm:$0xff]  ;;  %s5040_s5 = scalar_lea.hbm %s5039_s4, 32 }
 0x1bf   : > { %1616 = vmatpush.msra.mxu3 %v1476_v56  ;;  %v1366_v43 = vmul.f32 0.6931472, %v4635_v21  ;;  %v1467_v16 = vsel %vm1259_vm7, %v5769_v48, %v1451_v44  ;;  %v4637_v10 = vpop.eup %4636  ;;  %vm1260_vm9 = vcmp.gt.f32.partialorder %v5793_v59, 20.0  ;;  %vm1326_vm10 = vcmp.lt.f32.partialorder %v1325_v54, 0.0004427343  ;;  %p5041_p11 = scmp.ne.s32.totalorder %s5039_s4, %s5040_s5  ;;  %p5046_p1 = scmp.lt.s32.totalorder %s5044_s30, %s5040_s5 }
 0x1c0   : > { %4344 = vmatmul.msk.f32.gmra.mxu1 %vm1092_vm6, %v5953_v22  ;;  %1589 = vmatpush.msra.mxu2 %v1467_v16  ;;  %v1321_v49 = vmul.f32 0.6931472, %v4637_v10  ;;  %v1333_v35 = vmul.f32 %v5820_v42, %v1332_v18  ;;  %vm1255_vm11 = vcmp.gt.f32.partialorder %v5752_v11, 20.0  ;;  %vm1335_vm12 = vcmp.lt.f32.partialorder %v1334_v26, 0.0004427343  ;;  %v6015_v42 = vpop.permute.xlu2 %1502 }
 0x1c1   : > { %1617 = vmatpush.msra.mxu3 %v1472_v53  ;;  %v1372_v30 = vsel %vm1371_vm8, %v1369_v7, %v1366_v43  ;;  %4341 = vmatmul.msk.f32.gmra.mxu0 %vm1092_vm6, %v1479_v19  ;;  %vm1256_vm13 = vcmp.gt.f32.partialorder %v5765_v2, 20.0  ;;  %p5042_p12 = pnand %p5041_p11, %p5232_p5  ;;  %p5047_p2 = por %p5046_p1, %p5045_p0 }
 0x1c2   : > { %v1452_v20 = vmul.f32 0.01, %v1372_v30  ;;  %v4639_v46 = vpop.eup %4638  ;;  %v1327_v48 = vsel %vm1326_vm10, %v1324_v38, %v1321_v49 }
 0x1c3   : > { %v1447_v50 = vmul.f32 0.01, %v1327_v48  ;;  %v1330_v8 = vmul.f32 0.6931472, %v4639_v46  ;;  %p5043_p13 = pneg %p5042_p12 }
 0x1c4   : > { %v1468_v0 = vsel %vm1260_vm9, %v5782_v24, %v1452_v20 }
 0x1c5   : > { %1618 = vmatpush.msra.mxu3 %v1468_v0  ;;  %v1463_v27 = vsel %vm1255_vm11, %v5743_v37, %v1447_v50  ;;  %v1336_v59 = vsel %vm1335_vm12, %v1333_v35, %v1330_v8  ;;  %p5048_p3 = pnand %p5047_p2, %p5043_p13 }
 0x1c6   : > { %1590 = vmatpush.msra.mxu2 %v1463_v27  ;;  %v1448_v24 = vmul.f32 0.01, %v1336_v59 }
 0x1c7   : > { %4347 = vmatmul.msk.f32.vlgmr.msra.gmra.mxu2 %vm1092_vm6, %v5913_v41 }
 0x1c8   : > { %4345 = vmatmul.msk.f32.gmra.mxu1 %vm1092_vm6, %v1479_v19  ;;  %v1464_v11 = vsel %vm1256_vm13, %v5757_v55, %v1448_v24  ;;  %v1488_v31 = vpop.permute.xlu2 %1487 }
 0x1c9   : > { %4342 = vmatmul.msk.f32.gmra.mxu0 %vm1092_vm6, %v1480_v51  ;;  %1619 = vmatpush.msra.mxu3 %v1464_v11 }
 0x1ca   : > { %4351 = vmatmul.msk.f32.vlgmr.msra.gmra.mxu3 %vm1092_vm6, %v5913_v41 }
 0x1cf   : > { %4348 = vmatmul.msk.f32.gmra.mxu2 %vm1092_vm6, %v5953_v22 }
 0x1d0   : > { %4346 = vmatmul.msk.f32.gmra.mxu1 %vm1092_vm6, %v1480_v51 }
 0x1d2   : > { %4352 = vmatmul.msk.f32.gmra.mxu3 %vm1092_vm6, %v5953_v22 }
 0x1d7   : > { %4349 = vmatmul.msk.f32.gmra.mxu2 %vm1092_vm6, %v1479_v19 }
 0x1da   : > { %4353 = vmatmul.msk.f32.gmra.mxu3 %vm1092_vm6, %v1479_v19 }
 0x1df   : > { %4350 = vmatmul.msk.f32.gmra.mxu2 %vm1092_vm6, %v1480_v51 }
 0x1e2   : > { %4354 = vmatmul.msk.f32.gmra.mxu3 %vm1092_vm6, %v1480_v51 }
 0x22d   : > { %v1534_v37 = vpop.f32.mrf.mxu0 }
 0x22e   : > { %v6031_v60 = vadd.f32 %v1534_v37, %v1488_v31 }
 0x230   : > { %v6046_v33 = vmul.f32 100.0, %v6031_v60 }
 0x232   : > { %v1649_v4 = vmin.f32 %v6046_v33, 20.0  ;;  %vm1665_vm11 = vcmp.gt.f32.partialorder %v6046_v33, 20.0 }
 0x234   : > { %v1681_v19 = vmul.f32 1.442695, %v1649_v4 }
 0x235   : > { %v1563_v55 = vpop.f32.mrf.mxu1  ;;  %v1537_v2 = vpop.f32.mrf.mxu0 }
 0x236   : > { %v6025_v58 = vadd.f32 %v1537_v2, %v6022_v13  ;;  %v6056_v14 = vadd.f32 %v1563_v55, %v1488_v31 }
 0x238   : > { %v6034_v45 = vmul.f32 100.0, %v6025_v58  ;;  %v6067_v21 = vmul.f32 100.0, %v6056_v14 }
 0x23a   : > { %v1653_v32 = vmin.f32 %v6034_v45, 20.0  ;;  %v1650_v30 = vmin.f32 %v6067_v21, 20.0  ;;  %vm1669_vm5 = vcmp.gt.f32.partialorder %v6034_v45, 20.0 }
 0x23c   : > { %v1689_v56 = vmul.f32 1.442695, %v1653_v32  ;;  %v1683_v27 = vmul.f32 1.442695, %v1650_v30 }
 0x23d   : > { %v1566_v41 = vpop.f32.mrf.mxu1 }
 0x23e   : > { %v1540_v1 = vpop.f32.mrf.mxu0  ;;  %v6049_v25 = vadd.f32 %v1566_v41, %v6022_v13 }
 0x23f   : > { %v6020_v40 = vadd.f32 %v1540_v1, %v6017_v36 }
 0x240   : > { %v6061_v61 = vmul.f32 100.0, %v6049_v25 }
 0x241   : > { %v6028_v22 = vmul.f32 100.0, %v6020_v40 }
 0x242   : > { %v1654_v53 = vmin.f32 %v6061_v61, 20.0  ;;  %vm1670_vm13 = vcmp.gt.f32.partialorder %v6061_v61, 20.0 }
 0x243   : > { %v1657_v15 = vmin.f32 %v6028_v22, 20.0  ;;  %vm1673_vm14 = vcmp.gt.f32.partialorder %v6028_v22, 20.0 }
 0x244   : > { %v1691_v20 = vmul.f32 1.442695, %v1654_v53 }
 0x245   : > { %v1569_v12 = vpop.f32.mrf.mxu1  ;;  %v1697_v57 = vmul.f32 1.442695, %v1657_v15 }
 0x246   : > { %v6037_v28 = vadd.f32 %v1569_v12, %v6017_v36  ;;  %v1543_v6 = vpop.f32.mrf.mxu0 }
 0x247   : > { %4640 = vpow2.f32 %v1697_v57  ;;  %v6043_v63 = vadd.f32 %v1543_v6, %v6015_v42 }
 0x248   : > { %v6040_v29 = vmul.f32 100.0, %v6037_v28 }
 0x249   : > { %v6054_v39 = vmul.f32 100.0, %v6043_v63 }
 0x24a   : > { %v1658_v9 = vmin.f32 %v6040_v29, 20.0  ;;  %v1592_v5 = vpop.f32.mrf.mxu2  ;;  %vm1674_vm10 = vcmp.gt.f32.partialorder %v6040_v29, 20.0 }
 0x24b   : > { %v1661_v23 = vmin.f32 %v6054_v39, 20.0  ;;  %v6073_v7 = vadd.f32 %v1592_v5, %v1488_v31  ;;  %vm1677_vm2 = vcmp.gt.f32.partialorder %v6054_v39, 20.0 }
 0x24c   : > { %v1699_v52 = vmul.f32 1.442695, %v1658_v9 }
 0x24d   : > { %v1572_v34 = vpop.f32.mrf.mxu1  ;;  %v4641_v17 = vpop.eup %4640  ;;  %v1705_v47 = vmul.f32 1.442695, %v1661_v23  ;;  %v6081_v46 = vmul.f32 100.0, %v6073_v7 }
 0x24e   : > { %4642 = vpow2.f32 %v1699_v52  ;;  %v6064_v3 = vadd.f32 %v1572_v34, %v6015_v42  ;;  %v1621_v44 = vpop.f32.mrf.mxu3  ;;  %v1785_v43 = vadd.f32 1.0, %v4641_v17  ;;  %v1788_v16 = vmul.f32 -0.5, %v4641_v17 }
 0x24f   : > { %4644 = vpow2.f32 %v1705_v47  ;;  %v6086_v50 = vadd.f32 %v1621_v44, %v1488_v31  ;;  %v1791_v35 = vand.u32 2147483647, %v4641_v17  ;;  %v1651_v41 = vmin.f32 %v6081_v46, 20.0 }
 0x250   : > { %v6070_v62 = vmul.f32 100.0, %v6064_v3  ;;  %4646 = vpow2.f32 %v1689_v56  ;;  %v1789_v48 = vadd.f32 1.0, %v1788_v16 }
 0x251   : > { %4648 = vlog2.f32 %v1785_v43  ;;  %v6098_v15 = vmul.f32 100.0, %v6086_v50  ;;  %vm6100_vm15 = vcmp.lt.f32.partialorder %v1791_v35, 0.0004427343 }
 0x252   : > { %v1662_v54 = vmin.f32 %v6070_v62, 20.0  ;;  %v1595_v49 = vpop.f32.mrf.mxu2  ;;  %4650 = vpow2.f32 %v1681_v19  ;;  %v1790_v31 = vmul.f32 %v4641_v17, %v1789_v48  ;;  %vm1678_vm7 = vcmp.gt.f32.partialorder %v6070_v62, 20.0 }
 0x253   : > { %v6084_v0 = vadd.f32 %v1595_v49, %v6022_v13 }
 0x254   : > { %v6076_v10 = vpop.eup %4642  ;;  %v1707_v18 = vmul.f32 1.442695, %v1662_v54 }
 0x255   : > { %v1794_v38 = vadd.f32 1.0, %v6076_v10  ;;  %v4645_v26 = vpop.eup %4644  ;;  %v1797_v11 = vmul.f32 -0.5, %v6076_v10  ;;  %v6092_v55 = vmul.f32 100.0, %v6084_v0  ;;  %v1800_v2 = vand.u32 2147483647, %v6076_v10 }
 0x256   : > { %4652 = vpow2.f32 %v1707_v18  ;;  %v1821_v8 = vadd.f32 1.0, %v4645_v26  ;;  %v6088_v51 = vpop.eup %4646  ;;  %v1624_v59 = vpop.f32.mrf.mxu3  ;;  %v1824_v24 = vmul.f32 -0.5, %v4645_v26  ;;  %v1827_v12 = vand.u32 2147483647, %v4645_v26 }
 0x257   : > { %4654 = vlog2.f32 %v1794_v38  ;;  %v4649_v37 = vpop.eup %4648  ;;  %v1749_v6 = vadd.f32 1.0, %v6088_v51  ;;  %v1798_v23 = vadd.f32 1.0, %v1797_v11  ;;  %v1752_v4 = vmul.f32 -0.5, %v6088_v51 }
 0x258   : > { %4656 = vpow2.f32 %v1691_v20  ;;  %v1787_v1 = vmul.f32 0.6931472, %v4649_v37  ;;  %v6105_v32 = vpop.eup %4650  ;;  %v1825_v9 = vadd.f32 1.0, %v1824_v24  ;;  %v1655_v34 = vmin.f32 %v6092_v55, 20.0 }
 0x259   : > { %4658 = vlog2.f32 %v1821_v8  ;;  %v6112_v17 = vadd.f32 %v1624_v59, %v6022_v13  ;;  %vm6115_vm3 = vcmp.lt.f32.partialorder %v1800_v2, 0.0004427343  ;;  %vm6124_vm4 = vcmp.lt.f32.partialorder %v1827_v12, 0.0004427343 }
 0x25a   : > { %v1793_v52 = vsel %vm6100_vm15, %v1790_v31, %v1787_v1  ;;  %v1598_v56 = vpop.f32.mrf.mxu2  ;;  %4660 = vlog2.f32 %v1749_v6  ;;  %v1826_v48 = vmul.f32 %v4645_v26, %v1825_v9  ;;  %v1753_v8 = vadd.f32 1.0, %v1752_v4 }
 0x25b   : > { %v6120_v19 = vadd.f32 %v1598_v56, %v6017_v36  ;;  %v1865_v54 = vmul.f32 0.01, %v1793_v52  ;;  %4662 = vpow2.f32 %v1683_v27  ;;  %v1799_v27 = vmul.f32 %v6076_v10, %v1798_v23 }
 0x25c   : > { %v4653_v5 = vpop.eup %4652  ;;  %v1755_v24 = vand.u32 2147483647, %v6088_v51  ;;  %v6138_v11 = vmul.f32 100.0, %v6112_v17 }
 0x25d   : > { %v4655_v44 = vpop.eup %4654  ;;  %v1830_v53 = vadd.f32 1.0, %v4653_v5  ;;  %v1833_v43 = vmul.f32 -0.5, %v4653_v5  ;;  %v1836_v30 = vand.u32 2147483647, %v4653_v5  ;;  %v6129_v49 = vmul.f32 100.0, %v6120_v19 }
 0x25e   : > { %v6122_v16 = vpop.eup %4656  ;;  %v1796_v18 = vmul.f32 0.6931472, %v4655_v44  ;;  %v1627_v38 = vpop.f32.mrf.mxu3  ;;  %v1881_v26 = vsel %vm1673_vm14, %v6020_v40, %v1865_v54  ;;  %v1754_v40 = vmul.f32 %v6088_v51, %v1753_v8  ;;  %vm1756_vm9 = vcmp.lt.f32.partialorder %v1755_v24, 0.0004427343 }
 0x25f   : > { %v4659_v20 = vpop.eup %4658  ;;  %4664 = vlog2.f32 %v1830_v53  ;;  %v6132_v35 = vadd.f32 %v1627_v38, %v6017_v36  ;;  %v1659_v37 = vmin.f32 %v6129_v49, 20.0  ;;  %v1834_v2 = vadd.f32 1.0, %v1833_v43 }
 0x260   : > { %v1823_v59 = vmul.f32 0.6931472, %v4659_v20  ;;  %v4661_v1 = vpop.eup %4660  ;;  %vm6150_vm8 = vcmp.lt.f32.partialorder %v1836_v30, 0.0004427343  ;;  %v1802_v12 = vsel %vm6115_vm3, %v1799_v27, %v1796_v18  ;;  %v1758_v4 = vadd.f32 1.0, %v6122_v16 }
 0x261   : > { %v6145_v36 = vmul.f32 100.0, %v6132_v35  ;;  %v1701_v57 = vmul.f32 1.442695, %v1659_v37  ;;  %v1751_v22 = vmul.f32 0.6931472, %v4661_v1  ;;  %v6157_v9 = vpop.eup %4662  ;;  %v1761_v56 = vmul.f32 -0.5, %v6122_v16 }
 0x262   : > { %v1829_v10 = vsel %vm6124_vm4, %v1826_v48, %v1823_v59  ;;  %v1601_v23 = vpop.f32.mrf.mxu2  ;;  %v1835_v43 = vmul.f32 %v4653_v5, %v1834_v2  ;;  %4666 = vlog2.f32 %v1758_v4  ;;  %v1866_v38 = vmul.f32 0.01, %v1802_v12 }
 0x263   : > { %v1869_v6 = vmul.f32 0.01, %v1829_v10  ;;  %v1660_v52 = vmin.f32 %v6145_v36, 20.0  ;;  %v6163_v53 = vadd.f32 %v1601_v23, %v6015_v42  ;;  %v1757_v51 = vsel %vm1756_vm9, %v1754_v40, %v1751_v22 }
 0x264   : > { %v1861_v30 = vmul.f32 0.01, %v1757_v51  ;;  %4668 = vpow2.f32 %v1701_v57  ;;  %v1713_v48 = vadd.f32 1.0, %v6105_v32  ;;  %v1762_v39 = vadd.f32 1.0, %v1761_v56 }
 0x265   : > { %v4665_v44 = vpop.eup %4664  ;;  %v1885_v47 = vsel %vm1677_vm2, %v6043_v63, %v1869_v6  ;;  %v1703_v54 = vmul.f32 1.442695, %v1660_v52  ;;  %v6169_v18 = vmul.f32 100.0, %v6163_v53  ;;  %v1716_v37 = vmul.f32 -0.5, %v6105_v32 }
 0x266   : > { %1941 = vmatpush.msrb.mxu0 %v1885_v47  ;;  %v1832_v13 = vmul.f32 0.6931472, %v4665_v44  ;;  %v1630_v20 = vpop.f32.mrf.mxu3  ;;  %v1877_v27 = vsel %vm1669_vm5, %v6025_v58, %v1861_v30  ;;  %v1693_v2 = vmul.f32 1.442695, %v1655_v34  ;;  %v1722_v45 = vadd.f32 1.0, %v6157_v9 }
 0x267   : > { %4670 = vpow2.f32 %v1703_v54  ;;  %v6173_v8 = vadd.f32 %v1630_v20, %v6015_v42  ;;  %v1663_v5 = vmin.f32 %v6169_v18, 20.0  ;;  %v1764_v42 = vand.u32 2147483647, %v6122_v16 }
 0x268   : > { %v1838_v63 = vsel %vm6150_vm8, %v1835_v43, %v1832_v13  ;;  %1942 = vmatpush.msrb.mxu0 %v1881_v26  ;;  %4672 = vlog2.f32 %v1713_v48  ;;  %v4667_v58 = vpop.eup %4666  ;;  %v1656_v1 = vmin.f32 %v6138_v11, 20.0  ;;  %v1882_v31 = vsel %vm1674_vm10, %v6037_v28, %v1866_v38 }
 0x269   : > { %v1870_v59 = vmul.f32 0.01, %v1838_v63  ;;  %v6183_v24 = vmul.f32 100.0, %v6173_v8  ;;  %v1709_v26 = vmul.f32 1.442695, %v1663_v5  ;;  %v1763_v12 = vmul.f32 %v6122_v16, %v1762_v39 }
 0x26a   : > { %1943 = vmatpush.msrb.mxu0 %v1877_v27  ;;  %v6197_v57 = vpop.eup %4668  ;;  %v1760_v34 = vmul.f32 0.6931472, %v4667_v58  ;;  %v1717_v62 = vadd.f32 1.0, %v1716_v37  ;;  %vm1765_vm12 = vcmp.lt.f32.partialorder %v1764_v42, 0.0004427343  ;;  %v1652_v28 = vmin.f32 %v6098_v15, 20.0 }
 0x26b   : > { %v1886_v29 = vsel %vm1678_vm7, %v6064_v3, %v1870_v59  ;;  %v1664_v10 = vmin.f32 %v6183_v24, 20.0  ;;  %4674 = vpow2.f32 %v1709_v26  ;;  %v1725_v3 = vmul.f32 -0.5, %v6157_v9 }
 0x26c   : > { %1970 = vmatpush.msrb.mxu1 %v1886_v29  ;;  %v1719_v40 = vand.u32 2147483647, %v6105_v32  ;;  %4676 = vlog2.f32 %v1722_v45  ;;  %v1766_v16 = vsel %vm1765_vm12, %v1763_v12, %v1760_v34  ;;  %v1695_v23 = vmul.f32 1.442695, %v1656_v1 }
 0x26d   : > { %v6201_v6 = vpop.eup %4670  ;;  %v1711_v22 = vmul.f32 1.442695, %v1664_v10  ;;  %4678 = vpow2.f32 %v1693_v2  ;;  %v1862_v4 = vmul.f32 0.01, %v1766_v16  ;;  %v1803_v56 = vadd.f32 1.0, %v6197_v57 }
 0x26e   : > { %1971 = vmatpush.msrb.mxu1 %v1882_v31  ;;  %v4673_v52 = vpop.eup %4672  ;;  %v1718_v47 = vmul.f32 %v6105_v32, %v1717_v62  ;;  %vm1666_vm14 = vcmp.gt.f32.partialorder %v6067_v21, 20.0  ;;  %v1726_v43 = vadd.f32 1.0, %v1725_v3  ;;  %v1812_v51 = vadd.f32 1.0, %v6201_v6 }
 0x26f   : > { %4680 = vpow2.f32 %v1711_v22  ;;  %v1715_v44 = vmul.f32 0.6931472, %v4673_v52  ;;  %v1878_v54 = vsel %vm1670_vm13, %v6049_v25, %v1862_v4  ;;  %vm1720_vm15 = vcmp.lt.f32.partialorder %v1719_v40, 0.0004427343 }
 0x270   : > { %v1728_v61 = vand.u32 2147483647, %v6157_v9  ;;  %4682 = vlog2.f32 %v1803_v56  ;;  %v1685_v30 = vmul.f32 1.442695, %v1651_v41  ;;  %1972 = vmatpush.msrb.mxu1 %v1878_v54  ;;  %v1806_v38 = vmul.f32 -0.5, %v6197_v57  ;;  %v6222_v41 = vld [vmem:[%s8302_s7] sm:$0xff] }
 0x271   : > { %v4675_v13 = vpop.eup %4674  ;;  %v1721_v20 = vsel %vm1720_vm15, %v1718_v47, %v1715_v44  ;;  %4684 = vlog2.f32 %v1812_v51  ;;  %v1687_v48 = vmul.f32 1.442695, %v1652_v28  ;;  %v1815_v5 = vmul.f32 -0.5, %v6201_v6  ;;  %v1892_v56 = vld [vmem:[%s8302_s7 + $0x18] sm:$0x1f] }
 0x272   : > { %v4677_v32 = vpop.eup %4676  ;;  %v1857_v63 = vmul.f32 0.01, %v1721_v20  ;;  %v1839_v39 = vadd.f32 1.0, %v4675_v13  ;;  %4686 = vpow2.f32 %v1695_v23  ;;  %v1727_v27 = vmul.f32 %v6157_v9, %v1726_v43 }
 0x273   : > { %v6216_v25 = vpop.eup %4678  ;;  %v1724_v59 = vmul.f32 0.6931472, %v4677_v32  ;;  %v1842_v42 = vmul.f32 -0.5, %v4675_v13  ;;  %vm1729_vm2 = vcmp.lt.f32.partialorder %v1728_v61, 0.0004427343  ;;  %v1807_v9 = vadd.f32 1.0, %v1806_v38 }
 0x274   : > { %v1873_v2 = vsel %vm1665_vm11, %v6031_v60, %v1857_v63  ;;  %4688 = vlog2.f32 %v1839_v39  ;;  %v1809_v26 = vand.u32 2147483647, %v6197_v57  ;;  %v1816_v31 = vadd.f32 1.0, %v1815_v5 }
 0x275   : > { %v4681_v37 = vpop.eup %4680  ;;  %1944 = vmatpush.msrb.mxu0 %v1873_v2  ;;  %v1730_v29 = vsel %vm1729_vm2, %v1727_v27, %v1724_v59  ;;  %4690 = vpow2.f32 %v1685_v30  ;;  %v1818_v12 = vand.u32 2147483647, %v6201_v6  ;;  %v1843_v60 = vadd.f32 1.0, %v1842_v42 }
 0x276   : > { %v1848_v45 = vadd.f32 1.0, %v4681_v37  ;;  %v1851_v58 = vmul.f32 -0.5, %v4681_v37  ;;  %v4683_v1 = vpop.eup %4682  ;;  %v1858_v10 = vmul.f32 0.01, %v1730_v29  ;;  %4355 = vmatmul.msk.f32.vlgmr.msrb.gmra.mxu0 %vm1092_vm6, %v6222_v41  ;;  %v1845_v34 = vand.u32 2147483647, %v4675_v13 }
 0x277   : > { %v4685_v33 = vpop.eup %4684  ;;  %v1805_v62 = vmul.f32 0.6931472, %v4683_v1  ;;  %v1767_v40 = vadd.f32 1.0, %v6216_v25  ;;  %v1770_v28 = vmul.f32 -0.5, %v6216_v25  ;;  %vm1679_vm3 = vcmp.gt.f32.partialorder %v6169_v18, 20.0 }
 0x278   : > { %4692 = vlog2.f32 %v1848_v45  ;;  %v1874_v3 = vsel %vm1666_vm14, %v6056_v14, %v1858_v10  ;;  %v1814_v22 = vmul.f32 0.6931472, %v4685_v33  ;;  %v6236_v16 = vpop.eup %4686  ;;  %v1852_v52 = vadd.f32 1.0, %v1851_v58 }
 0x279   : > { %4694 = vpow2.f32 %v1687_v48  ;;  %1973 = vmatpush.msrb.mxu1 %v1874_v3  ;;  %v1808_v23 = vmul.f32 %v6197_v57, %v1807_v9  ;;  %vm1680_vm4 = vcmp.gt.f32.partialorder %v6183_v24, 20.0  ;;  %vm6243_vm5 = vcmp.lt.f32.partialorder %v1809_v26, 0.0004427343  ;;  %v6255_v57 = vld [vmem:[%s8302_s7 + $0x8] sm:$0xff] }
 0x27a   : > { %v4689_v4 = vpop.eup %4688  ;;  %4359 = vmatmul.msk.f32.vlgmr.msrb.gmra.mxu1 %vm1092_vm6, %v6222_v41  ;;  %v1817_v21 = vmul.f32 %v6201_v6, %v1816_v31  ;;  %vm6248_vm7 = vcmp.lt.f32.partialorder %v1818_v12, 0.0004427343  ;;  %4696 = vlog2.f32 %v1767_v40  ;;  %v1844_v47 = vmul.f32 %v4675_v13, %v1843_v60  ;;  %v1891_v31 = vld [vmem:[%s8302_s7 + $0x10] sm:$0xff] }
 0x27b   : > { %v1841_v44 = vmul.f32 0.6931472, %v4689_v4  ;;  %v1854_v43 = vand.u32 2147483647, %v4681_v37  ;;  %v1811_v51 = vsel %vm6243_vm5, %v1808_v23, %v1805_v62  ;;  %v6259_v54 = vpop.eup %4690  ;;  %vm1846_vm8 = vcmp.lt.f32.partialorder %v1845_v34, 0.0004427343 }
 0x27c   : > { %v1820_v6 = vsel %vm6248_vm7, %v1817_v21, %v1814_v22  ;;  %v1771_v61 = vadd.f32 1.0, %v1770_v28  ;;  %v1776_v30 = vadd.f32 1.0, %v6236_v16  ;;  %v1853_v32 = vmul.f32 %v4681_v37, %v1852_v52 }
 0x27d   : > { %v1847_v38 = vsel %vm1846_vm8, %v1844_v47, %v1841_v44  ;;  %v1773_v48 = vand.u32 2147483647, %v6216_v25  ;;  %v1779_v13 = vmul.f32 -0.5, %v6236_v16  ;;  %v1867_v5 = vmul.f32 0.01, %v1811_v51 }
 0x27e   : > { %v4693_v20 = vpop.eup %4692  ;;  %4356 = vmatmul.msk.f32.gmra.mxu0 %vm1092_vm6, %v6255_v57  ;;  %v1871_v63 = vmul.f32 0.01, %v1847_v38  ;;  %4698 = vlog2.f32 %v1776_v30  ;;  %vm1855_vm9 = vcmp.lt.f32.partialorder %v1854_v43, 0.0004427343  ;;  %vm1675_vm10 = vcmp.gt.f32.partialorder %v6129_v49, 20.0 }
 0x27f   : > { %v1850_v39 = vmul.f32 0.6931472, %v4693_v20  ;;  %v4695_v59 = vpop.eup %4694  ;;  %v1868_v27 = vmul.f32 0.01, %v1820_v6  ;;  %v1731_v42 = vadd.f32 1.0, %v6259_v54  ;;  %v1772_v29 = vmul.f32 %v6216_v25, %v1771_v61  ;;  %v6330_v6 = vpop.permute.xlu2 %1904 }
 0x280   : > { %v4697_v2 = vpop.eup %4696  ;;  %v1887_v37 = vsel %vm1679_vm3, %v6163_v53, %v1871_v63  ;;  %v1734_v45 = vmul.f32 -0.5, %v6259_v54  ;;  %v1780_v1 = vadd.f32 1.0, %v1779_v13  ;;  %v1883_v49 = vsel %vm1675_vm10, %v6120_v19, %v1867_v5 }
 0x281   : > { %v1856_v26 = vsel %vm1855_vm9, %v1853_v32, %v1850_v39  ;;  %1999 = vmatpush.msrb.mxu2 %v1887_v37  ;;  %v1769_v9 = vmul.f32 0.6931472, %v4697_v2  ;;  %4700 = vlog2.f32 %v1731_v42  ;;  %vm1774_vm11 = vcmp.lt.f32.partialorder %v1773_v48, 0.0004427343  ;;  %v6339_v32 = vpop.permute.xlu1 %1909 }
 0x282   : > { %v1872_v58 = vmul.f32 0.01, %v1856_v26  ;;  %4360 = vmatmul.msk.f32.gmra.mxu1 %vm1092_vm6, %v6255_v57  ;;  %v1782_v10 = vand.u32 2147483647, %v6236_v16  ;;  %v1740_v18 = vadd.f32 1.0, %v4695_v59  ;;  %vm1676_vm12 = vcmp.gt.f32.partialorder %v6145_v36, 20.0 }
 0x283   : > { %2000 = vmatpush.msrb.mxu2 %v1883_v49  ;;  %v1775_v25 = vsel %vm1774_vm11, %v1772_v29, %v1769_v9  ;;  %v1743_v12 = vmul.f32 -0.5, %v4695_v59  ;;  %vm1671_vm13 = vcmp.gt.f32.partialorder %v6092_v55, 20.0  ;;  %v1735_v60 = vadd.f32 1.0, %v1734_v45  ;;  %v2316_v9 = vld.sshfl [vmem:[#allocation1] sm:$0xff pattern:$0x75316420] }
 0x284   : > { %v1888_v53 = vsel %vm1680_vm4, %v6173_v8, %v1872_v58  ;;  %v4699_v33 = vpop.eup %4698  ;;  %v1863_v19 = vmul.f32 0.01, %v1775_v25  ;;  %4702 = vlog2.f32 %v1740_v18  ;;  %v1884_v34 = vsel %vm1676_vm12, %v6132_v35, %v1868_v27  ;;  %4371 = vmatpush.msk.msra.mxu0 %vm683_vm0, %v2316_v9  ;;  %v2305_v25 = vld [vmem:[%s8183_s10] sm:$0xff] }
 0x285   : > { %2028 = vmatpush.msrb.mxu3 %v1888_v53  ;;  %v1778_v24 = vmul.f32 0.6931472, %v4699_v33  ;;  %v1781_v8 = vmul.f32 %v6236_v16, %v1780_v1  ;;  %v1737_v36 = vand.u32 2147483647, %v6259_v54  ;;  %vm1783_vm14 = vcmp.lt.f32.partialorder %v1782_v10, 0.0004427343 }
 0x286   : > { %v1879_v62 = vsel %vm1671_vm13, %v6084_v0, %v1863_v19  ;;  %4357 = vmatmul.msk.f32.gmra.mxu0 %vm1092_vm6, %v1891_v31  ;;  %v1744_v55 = vadd.f32 1.0, %v1743_v12  ;;  %v1736_v52 = vmul.f32 %v6259_v54, %v1735_v60  ;;  %v1746_v35 = vand.u32 2147483647, %v4695_v59  ;;  %v2317_v1 = vld.sshfl [vmem:[#allocation1 + $0x8] sm:$0xff pattern:$0x75316420] }
 0x287   : > { %2029 = vmatpush.msrb.mxu3 %v1884_v34  ;;  %v4701_v3 = vpop.eup %4700  ;;  %2001 = vmatpush.msrb.mxu2 %v1879_v62  ;;  %v1784_v22 = vsel %vm1783_vm14, %v1781_v8, %v1778_v24  ;;  %vm1672_vm15 = vcmp.gt.f32.partialorder %v6138_v11, 20.0  ;;  %vm1738_vm2 = vcmp.lt.f32.partialorder %v1737_v36, 0.0004427343  ;;  %vm1667_vm3 = vcmp.gt.f32.partialorder %v6081_v46, 20.0 }
 0x288   : > { %v1864_v40 = vmul.f32 0.01, %v1784_v22  ;;  %v1733_v28 = vmul.f32 0.6931472, %v4701_v3  ;;  %v1745_v21 = vmul.f32 %v4695_v59, %v1744_v55  ;;  %vm1747_vm4 = vcmp.lt.f32.partialorder %v1746_v35, 0.0004427343  ;;  %4376 = vmatpush.msk.msra.mxu1 %vm683_vm0, %v2317_v1 }
 0x289   : > { %vm1668_vm5 = vcmp.gt.f32.partialorder %v6098_v15, 20.0  ;;  %v2318_v12 = vld.sshfl [vmem:[#allocation1 + $0x10] sm:$0xff pattern:$0x75316420]  ;;  %vm2469_vm13 = vcmask 1044480  }
 0x28a   : > { %v4703_v16 = vpop.eup %4702  ;;  %v1880_v23 = vsel %vm1672_vm15, %v6112_v17, %v1864_v40  ;;  %4361 = vmatmul.msk.f32.gmra.mxu1 %vm1092_vm6, %v1891_v31  ;;  %v1739_v0 = vsel %vm1738_vm2, %v1736_v52, %v1733_v28  ;;  %v2319_v33 = vld.sshfl [vmem:[#allocation1 + $0x18] sm:$0xff pattern:$0x75316420]  ;;  %v2306_v52 = vld [vmem:[%s8183_s10 + $0x8] sm:$0xff] }
 0x28b   : > { %2030 = vmatpush.msrb.mxu3 %v1880_v23  ;;  %v1859_v4 = vmul.f32 0.01, %v1739_v0  ;;  %v1742_v14 = vmul.f32 0.6931472, %v4703_v16 }
 0x28d   : > { %v1875_v11 = vsel %vm1667_vm3, %v6073_v7, %v1859_v4  ;;  %v1748_v44 = vsel %vm1747_vm4, %v1745_v21, %v1742_v14  ;;  %v6317_v7 = vpop.permute.xlu0 %1914 }
 0x28e   : > { %2002 = vmatpush.msrb.mxu2 %v1875_v11  ;;  %v1860_v47 = vmul.f32 0.01, %v1748_v44  ;;  %4358 = vmatmul.msk.f32.gmra.mxu0 %vm1092_vm6, %v1892_v56 }
 0x28f   : > { %4363 = vmatmul.msk.f32.vlgmr.msrb.gmra.mxu2 %vm1092_vm6, %v6222_v41 }
 0x290   : > { %v1876_v17 = vsel %vm1668_vm5, %v6086_v50, %v1860_v47  ;;  %4381 = vmatpush.msk.msra.mxu2 %vm683_vm0, %v2318_v12 }
 0x291   : > { %2031 = vmatpush.msrb.mxu3 %v1876_v17 }
 0x292   : > { %4367 = vmatmul.msk.f32.vlgmr.msrb.gmra.mxu3 %vm1092_vm6, %v6222_v41  ;;  %4362 = vmatmul.msk.f32.gmra.mxu1 %vm1092_vm6, %v1892_v56 }
 0x293   : > { %4386 = vmatpush.msk.msra.mxu3 %vm683_vm0, %v2319_v33 }
 0x295   : > { %v6319_v15 = vpop.permute.xlu0 %1899 }
 0x296   : > { %4372 = vmatmul.msk.f32.vlgmr.msra.gmra.mxu0 %vm670_vm1, %v2305_v25 }
 0x297   : > { %4364 = vmatmul.msk.f32.gmra.mxu2 %vm1092_vm6, %v6255_v57 }
 0x29a   : > { %4368 = vmatmul.msk.f32.gmra.mxu3 %vm1092_vm6, %v6255_v57  ;;  %4377 = vmatmul.msk.f32.vlgmr.msra.gmra.mxu1 %vm670_vm1, %v2305_v25 }
 0x29e   : > { %4373 = vmatmul.msk.f32.gmra.mxu0 %vm670_vm1, %v2306_v52 }
 0x29f   : > { %4365 = vmatmul.msk.f32.gmra.mxu2 %vm1092_vm6, %v1891_v31 }
 0x2a2   : > { %4369 = vmatmul.msk.f32.gmra.mxu3 %vm1092_vm6, %v1891_v31  ;;  %4378 = vmatmul.msk.f32.gmra.mxu1 %vm670_vm1, %v2306_v52 }
 0x2a7   : > { %4366 = vmatmul.msk.f32.gmra.mxu2 %vm1092_vm6, %v1892_v56 }
 0x2aa   : > { %4370 = vmatmul.msk.f32.gmra.mxu3 %vm1092_vm6, %v1892_v56 }
 0x2af   : > { %4382 = vmatmul.msk.f32.vlgmr.msra.gmra.mxu2 %vm670_vm1, %v2305_v25 }
 0x2b2   : > { %4387 = vmatmul.msk.f32.vlgmr.msra.gmra.mxu3 %vm670_vm1, %v2305_v25 }
 0x2b7   : > { %4383 = vmatmul.msk.f32.gmra.mxu2 %vm670_vm1, %v2306_v52 }
 0x2ba   : > { %4388 = vmatmul.msk.f32.gmra.mxu3 %vm670_vm1, %v2306_v52 }
 0x2f3   : > { %v1946_v46 = vpop.f32.mrf.mxu0 }
 0x2f4   : > { %v6322_v43 = vadd.f32 %v1946_v46, %v6319_v15 }
 0x2f6   : > { %v6328_v54 = vmul.f32 100.0, %v6322_v43 }
 0x2f7   : > { %v1975_v50 = vpop.f32.mrf.mxu1 }
 0x2f8   : > { %v6325_v57 = vadd.f32 %v1975_v50, %v6319_v15  ;;  %v2061_v38 = vmin.f32 %v6328_v54, 20.0  ;;  %vm2077_vm3 = vcmp.gt.f32.partialorder %v6328_v54, 20.0 }
 0x2fa   : > { %v6333_v61 = vmul.f32 100.0, %v6325_v57  ;;  %v2093_v59 = vmul.f32 1.442695, %v2061_v38 }
 0x2fb   : > { %v1949_v41 = vpop.f32.mrf.mxu0 }
 0x2fc   : > { %v6336_v30 = vadd.f32 %v1949_v41, %v6330_v6  ;;  %v2062_v48 = vmin.f32 %v6333_v61, 20.0  ;;  %4704 = vpow2.f32 %v2093_v59 }
 0x2fe   : > { %v6343_v13 = vmul.f32 100.0, %v6336_v30  ;;  %v2095_v42 = vmul.f32 1.442695, %v2062_v48 }
 0x2ff   : > { %v1978_v51 = vpop.f32.mrf.mxu1 }
 0x300   : > { %v6346_v63 = vadd.f32 %v1978_v51, %v6330_v6  ;;  %v2065_v2 = vmin.f32 %v6343_v13, 20.0  ;;  %4706 = vpow2.f32 %v2095_v42  ;;  %vm2081_vm2 = vcmp.gt.f32.partialorder %v6343_v13, 20.0 }
 0x302   : > { %v6356_v37 = vmul.f32 100.0, %v6346_v63  ;;  %v2101_v49 = vmul.f32 1.442695, %v2065_v2  ;;  %v6388_v24 = vpop.eup %4704 }
 0x303   : > { %v1952_v20 = vpop.f32.mrf.mxu0  ;;  %v2125_v4 = vadd.f32 1.0, %v6388_v24  ;;  %v2128_v14 = vmul.f32 -0.5, %v6388_v24 }
 0x304   : > { %v6349_v39 = vadd.f32 %v1952_v20, %v6339_v32  ;;  %v2066_v10 = vmin.f32 %v6356_v37, 20.0  ;;  %4708 = vpow2.f32 %v2101_v49 }
 0x306   : > { %v6359_v26 = vmul.f32 100.0, %v6349_v39  ;;  %v2103_v8 = vmul.f32 1.442695, %v2066_v10  ;;  %v6393_v22 = vpop.eup %4706 }
 0x307   : > { %v1981_v5 = vpop.f32.mrf.mxu1  ;;  %v2134_v21 = vadd.f32 1.0, %v6393_v22  ;;  %v2137_v44 = vmul.f32 -0.5, %v6393_v22 }
 0x308   : > { %v6352_v27 = vadd.f32 %v1981_v5, %v6339_v32  ;;  %v2069_v18 = vmin.f32 %v6359_v26, 20.0  ;;  %v2307_v5 = vld [vmem:[%s8183_s10 + $0x10] sm:$0xff]  ;;  %vm2085_vm12 = vcmp.gt.f32.partialorder %v6359_v26, 20.0 }
 0x309   : > { %v2138_v1 = vadd.f32 1.0, %v2137_v44  ;;  %4374 = vmatmul.msk.f32.gmra.mxu0 %vm670_vm1, %v2307_v5  ;;  %4379 = vmatmul.msk.f32.gmra.mxu1 %vm670_vm1, %v2307_v5 }
 0x30a   : > { %v6362_v45 = vmul.f32 100.0, %v6352_v27  ;;  %v2109_v55 = vmul.f32 1.442695, %v2069_v18  ;;  %v6413_v11 = vpop.eup %4708  ;;  %4384 = vmatmul.msk.f32.gmra.mxu2 %vm670_vm1, %v2307_v5  ;;  %4389 = vmatmul.msk.f32.gmra.mxu3 %vm670_vm1, %v2307_v5 }
 0x30b   : > { %v1955_v29 = vpop.f32.mrf.mxu0  ;;  %v2161_v59 = vadd.f32 1.0, %v6413_v11  ;;  %v2164_v42 = vmul.f32 -0.5, %v6413_v11 }
 0x30c   : > { %v6365_v58 = vadd.f32 %v1955_v29, %v6317_v7  ;;  %v2070_v34 = vmin.f32 %v6362_v45, 20.0  ;;  %vm2086_vm14 = vcmp.gt.f32.partialorder %v6362_v45, 20.0 }
 0x30d   : > { %v2165_v12 = vadd.f32 1.0, %v2164_v42 }
 0x30e   : > { %v6370_v53 = vmul.f32 100.0, %v6365_v58  ;;  %v2111_v35 = vmul.f32 1.442695, %v2070_v34 }
 0x30f   : > { %v1984_v31 = vpop.f32.mrf.mxu1  ;;  %v6467_v44 = vmul.f32 %v6413_v11, %v2165_v12 }
 0x310   : > { %v2073_v19 = vmin.f32 %v6370_v53, 20.0  ;;  %v6381_v60 = vadd.f32 %v1984_v31, %v6317_v7  ;;  %vm2089_vm0 = vcmp.gt.f32.partialorder %v6370_v53, 20.0 }
 0x312   : > { %v2117_v36 = vmul.f32 1.442695, %v2073_v19  ;;  %v6391_v62 = vmul.f32 100.0, %v6381_v60  ;;  %v2004_v3 = vpop.f32.mrf.mxu2 }
 0x313   : > { %v6396_v40 = vadd.f32 %v2004_v3, %v6319_v15 }
 0x314   : > { %4710 = vpow2.f32 %v2117_v36  ;;  %v2074_v28 = vmin.f32 %v6391_v62, 20.0  ;;  %vm2090_vm9 = vcmp.gt.f32.partialorder %v6391_v62, 20.0 }
 0x315   : > { %v2033_v16 = vpop.f32.mrf.mxu3  ;;  %4712 = vpow2.f32 %v2103_v8  ;;  %v6403_v0 = vmul.f32 100.0, %v6396_v40 }
 0x316   : > { %v2119_v23 = vmul.f32 1.442695, %v2074_v28  ;;  %4714 = vpow2.f32 %v2109_v55  ;;  %v6411_v56 = vadd.f32 %v2033_v16, %v6319_v15  ;;  %v2129_v15 = vadd.f32 1.0, %v2128_v14 }
 0x317   : > { %v2063_v17 = vmin.f32 %v6403_v0, 20.0  ;;  %v2167_v28 = vand.u32 2147483647, %v6413_v11 }
 0x318   : > { %4716 = vpow2.f32 %v2119_v23  ;;  %v6423_v38 = vmul.f32 100.0, %v6411_v56  ;;  %v6458_v23 = vmul.f32 %v6388_v24, %v2129_v15 }
 0x319   : > { %4718 = vpow2.f32 %v2111_v35  ;;  %v6444_v36 = vmul.f32 1.442695, %v2063_v17  ;;  %v6470_v17 = vmul.f32 %v6393_v22, %v2138_v1  ;;  %vm6482_vm10 = vcmp.lt.f32.partialorder %v2167_v28, 0.0004427343 }
 0x31a   : > { %v4711_v47 = vpop.eup %4710  ;;  %v2007_v46 = vpop.f32.mrf.mxu2  ;;  %4720 = vlog2.f32 %v2125_v4 }
 0x31b   : > { %v2233_v41 = vadd.f32 1.0, %v4711_v47  ;;  %v2236_v51 = vmul.f32 -0.5, %v4711_v47  ;;  %4722 = vlog2.f32 %v2134_v21  ;;  %v6420_v20 = vpop.eup %4712  ;;  %v6426_v48 = vadd.f32 %v2007_v46, %v6330_v6 }
 0x31c   : > { %v6433_v2 = vpop.eup %4714  ;;  %v2239_v29 = vand.u32 2147483647, %v4711_v47  ;;  %v2170_v42 = vadd.f32 1.0, %v6420_v20  ;;  %v8321_v26 = vand.u32 2147483647, %v6420_v20 }
 0x31d   : > { %4724 = vlog2.f32 %v2233_v41  ;;  %v2036_v9 = vpop.f32.mrf.mxu3  ;;  %v2237_v18 = vadd.f32 1.0, %v2236_v51  ;;  %v6437_v25 = vmul.f32 100.0, %v6426_v48  ;;  %v2197_v11 = vadd.f32 1.0, %v6433_v2 }
 0x31e   : > { %v4717_v10 = vpop.eup %4716  ;;  %v6440_v31 = vadd.f32 %v2036_v9, %v6330_v6  ;;  %4726 = vlog2.f32 %v2161_v59  ;;  %vm6462_vm7 = vcmp.lt.f32.partialorder %v2239_v29, 0.0004427343  ;;  %v6488_v29 = vmul.f32 -0.5, %v6420_v20 }
 0x31f   : > { %v6442_v33 = vpop.eup %4718  ;;  %v2242_v19 = vadd.f32 1.0, %v4717_v10  ;;  %v2245_v34 = vmul.f32 -0.5, %v4717_v10  ;;  %v2248_v8 = vand.u32 2147483647, %v4717_v10  ;;  %v2067_v55 = vmin.f32 %v6437_v25, 20.0 }
 0x320   : > { %v4721_v3 = vpop.eup %4720  ;;  %v6451_v6 = vmul.f32 100.0, %v6440_v31  ;;  %v2238_v4 = vmul.f32 %v4711_v47, %v2237_v18  ;;  %v2200_v12 = vmul.f32 -0.5, %v6433_v2  ;;  %v2209_v28 = vmul.f32 -0.5, %v6442_v33 }
 0x321   : > { %v6454_v52 = vpop.eup %4722  ;;  %4728 = vlog2.f32 %v2242_v19  ;;  %v2246_v35 = vadd.f32 1.0, %v2245_v34  ;;  %vm6472_vm8 = vcmp.lt.f32.partialorder %v2248_v8, 0.0004427343  ;;  %v2105_v51 = vmul.f32 1.442695, %v2067_v55 }
 0x322   : > { %v2010_v21 = vpop.f32.mrf.mxu2  ;;  %v2068_v15 = vmin.f32 %v6451_v6, 20.0  ;;  %v2206_v19 = vadd.f32 1.0, %v6442_v33  ;;  %4730 = vlog2.f32 %v2197_v11  ;;  %v2127_v16 = vmul.f32 0.6931472, %v4721_v3 }
 0x323   : > { %v4725_v46 = vpop.eup %4724  ;;  %v6478_v47 = vadd.f32 %v2010_v21, %v6339_v32  ;;  %v2247_v9 = vmul.f32 %v4717_v10, %v2246_v35  ;;  %v2203_v14 = vand.u32 2147483647, %v6433_v2  ;;  %v2201_v3 = vadd.f32 1.0, %v2200_v12 }
 0x324   : > { %v2235_v5 = vmul.f32 0.6931472, %v4725_v46  ;;  %v4727_v34 = vpop.eup %4726  ;;  %4732 = vlog2.f32 %v2206_v19  ;;  %v2212_v53 = vand.u32 2147483647, %v6442_v33  ;;  %vm2177_vm5 = vcmp.lt.f32.partialorder %v8321_v26, 0.0004427343 }
 0x325   : > { %v6491_v1 = vmul.f32 100.0, %v6478_v47  ;;  %v2039_v18 = vpop.f32.mrf.mxu3  ;;  %4734 = vpow2.f32 %v2105_v51  ;;  %v2163_v19 = vmul.f32 0.6931472, %v4727_v34  ;;  %vm6530_vm15 = vcmp.lt.f32.partialorder %v2203_v14, 0.0004427343 }
 0x326   : > { %v2241_v8 = vsel %vm6462_vm7, %v2238_v4, %v2235_v5  ;;  %v6498_v55 = vadd.f32 %v2039_v18, %v6339_v32  ;;  %v8313_v32 = vand.u32 2147483647, %v6388_v24  ;;  %v2210_v24 = vadd.f32 1.0, %v2209_v28 }
 0x327   : > { %v4729_v10 = vpop.eup %4728  ;;  %v2281_v35 = vmul.f32 0.01, %v2241_v8  ;;  %v2071_v46 = vmin.f32 %v6491_v1, 20.0  ;;  %v2169_v28 = vsel %vm6482_vm10, %v6467_v44, %v2163_v19  ;;  %v2202_v62 = vmul.f32 %v6433_v2, %v2201_v3 }
 0x328   : > { %v2244_v49 = vmul.f32 0.6931472, %v4729_v10  ;;  %v6504_v50 = vmul.f32 100.0, %v6498_v55  ;;  %vm6509_vm11 = vcmp.lt.f32.partialorder %v8313_v32, 0.0004427343  ;;  %v2211_v14 = vmul.f32 %v6442_v33, %v2210_v24 }
 0x329   : > { %v2297_v5 = vsel %vm2089_vm0, %v6365_v58, %v2281_v35  ;;  %v2113_v11 = vmul.f32 1.442695, %v2071_v46  ;;  %v2308_v58 = vld [vmem:[%s8183_s10 + $0x18] sm:$0xff]  ;;  %vm2213_vm4 = vcmp.lt.f32.partialorder %v2212_v53, 0.0004427343  ;;  %v2174_v2 = vadd.f32 1.0, %v6488_v29 }
 0x32a   : > { %v2250_v18 = vsel %vm6472_vm8, %v2247_v9, %v2244_v49  ;;  %v2072_v8 = vmin.f32 %v6504_v50, 20.0  ;;  %v2013_v10 = vpop.f32.mrf.mxu2  ;;  %v2107_v49 = vmul.f32 1.442695, %v2068_v15  ;;  %4375 = vmatmul.msk.f32.gmra.mxu0 %vm670_vm1, %v2308_v58  ;;  %4380 = vmatmul.msk.f32.gmra.mxu1 %vm670_vm1, %v2308_v58  ;;  %v4731_v9 = vpop.eup %4730  ;;  %v2136_v53 = vmul.f32 0.6931472, %v6454_v52 }
 0x32b   : > { %v2282_v32 = vmul.f32 0.01, %v2250_v18  ;;  %v6521_v21 = vadd.f32 %v2013_v10, %v6317_v7  ;;  %4736 = vpow2.f32 %v2113_v11  ;;  %4391 = vmatpush.msk.msrb.mxu0 %vm2469_vm13, %v2297_v5  ;;  %4385 = vmatmul.msk.f32.gmra.mxu2 %vm670_vm1, %v2308_v58  ;;  %v4733_v35 = vpop.eup %4732  ;;  %v2273_v11 = vmul.f32 0.01, %v2169_v28 }
 0x32c   : > { %v2115_v41 = vmul.f32 1.442695, %v2072_v8  ;;  %4738 = vlog2.f32 %v2170_v42  ;;  %4390 = vmatmul.msk.f32.gmra.mxu3 %vm670_vm1, %v2308_v58  ;;  %v6554_v59 = vpop.eup %4734  ;;  %v2208_v42 = vmul.f32 0.6931472, %v4733_v35  ;;  %v2133_v8 = vsel %vm6509_vm11, %v6458_v23, %v2127_v16 }
 0x32d   : > { %v2298_v12 = vsel %vm2090_vm9, %v6381_v60, %v2282_v32  ;;  %v6539_v34 = vmul.f32 100.0, %v6521_v21  ;;  %v2042_v15 = vpop.f32.mrf.mxu3  ;;  %v2199_v60 = vmul.f32 0.6931472, %v4731_v9  ;;  %v2269_v32 = vmul.f32 0.01, %v2133_v8  ;;  %v6625_v8 = vld [vmem:[%s8182_s9 + $0x8] sm:$0xff] }
 0x32e   : > { %v6548_v46 = vadd.f32 %v2042_v15, %v6317_v7  ;;  %4396 = vmatpush.msk.msrb.mxu1 %vm2469_vm13, %v2298_v12  ;;  %4740 = vpow2.f32 %v2115_v41  ;;  %v2214_v18 = vsel %vm2213_vm4, %v2211_v14, %v2208_v42  ;;  %v8318_v41 = vand.u32 2147483647, %v6393_v22 }
 0x32f   : > { %v2075_v44 = vmin.f32 %v6539_v34, 20.0  ;;  %v2205_v7 = vsel %vm6530_vm15, %v2202_v62, %v2199_v60  ;;  %4742 = vpow2.f32 %v2107_v49  ;;  %v2278_v19 = vmul.f32 0.01, %v2214_v18 }
 0x330   : > { %v6558_v5 = vmul.f32 100.0, %v6548_v46  ;;  %v2277_v33 = vmul.f32 0.01, %v2205_v7  ;;  %vm6575_vm1 = vcmp.lt.f32.partialorder %v8318_v41, 0.0004427343  ;;  %v2175_v51 = vmul.f32 %v6420_v20, %v2174_v2 }
 0x331   : > { %v2121_v3 = vmul.f32 1.442695, %v2075_v44  ;;  %v6566_v10 = vpop.eup %4736  ;;  %v2294_v23 = vsel %vm2086_vm14, %v6352_v27, %v2278_v19  ;;  %v2142_v22 = vsel %vm6575_vm1, %v6470_v17, %v2136_v53  ;;  %v2285_v52 = vsel %vm2077_vm3, %v6322_v43, %v2269_v32 }
 0x332   : > { %v2076_v24 = vmin.f32 %v6558_v5, 20.0  ;;  %v4739_v58 = vpop.eup %4738  ;;  %v2293_v29 = vsel %vm2085_vm12, %v6349_v39, %v2277_v33  ;;  %2524 = vmatpush.msrb.mxu1 %v2294_v23  ;;  %v2289_v39 = vsel %vm2081_vm2, %v6336_v30, %v2273_v11  ;;  %v2215_v45 = vadd.f32 1.0, %v6566_v10  ;;  %v6600_v30 = vld [vmem:[%s8182_s9] sm:$0xff] }
 0x333   : > { %4744 = vpow2.f32 %v2121_v3  ;;  %2495 = vmatpush.msrb.mxu0 %v2293_v29  ;;  %v2172_v49 = vmul.f32 0.6931472, %v4739_v58  ;;  %vm2456_vm0 = vcmask 236544   ;;  %v2270_v20 = vmul.f32 0.01, %v2142_v22 }
 0x334   : > { %v2123_v16 = vmul.f32 1.442695, %v2076_v24  ;;  %v6583_v9 = vpop.eup %4740  ;;  %v2218_v17 = vmul.f32 -0.5, %v6566_v10  ;;  %vm2082_vm7 = vcmp.gt.f32.partialorder %v6356_v37, 20.0  ;;  %vm2078_vm8 = vcmp.gt.f32.partialorder %v6333_v61, 20.0 }
 0x335   : > { %2496 = vmatpush.msrb.mxu0 %v2289_v39  ;;  %v2178_v27 = vsel %vm2177_vm5, %v2175_v51, %v2172_v49  ;;  %v6603_v12 = vpop.eup %4742  ;;  %v2224_v43 = vadd.f32 1.0, %v6583_v9  ;;  %v8322_v15 = vmin.f32 %v6423_v38, 20.0  ;;  %v2227_v60 = vmul.f32 -0.5, %v6583_v9 }
 0x336   : > { %4746 = vpow2.f32 %v2123_v16  ;;  %v2274_v13 = vmul.f32 0.01, %v2178_v27  ;;  %v2221_v61 = vand.u32 2147483647, %v6566_v10  ;;  %v2286_v14 = vsel %vm2078_vm8, %v6325_v57, %v2270_v20 }
 0x337   : > { %4748 = vlog2.f32 %v2215_v45  ;;  %2497 = vmatpush.msrb.mxu0 %v2285_v52  ;;  %v2099_v28 = vmul.f32 1.442695, %v8322_v15  ;;  %v2219_v44 = vadd.f32 1.0, %v2218_v17  ;;  %v2179_v42 = vadd.f32 1.0, %v6554_v59  ;;  %v6665_v15 = vld [vmem:[%s8182_s9 + $0x10] sm:$0xff] }
 0x338   : > { %4750 = vpow2.f32 %v6444_v36  ;;  %v2290_v35 = vsel %vm2082_vm7, %v6346_v63, %v2274_v13  ;;  %4392 = vmatmul.msk.f32.vlgmr.msrb.gmra.mxu0 %vm2456_vm0, %v6600_v30  ;;  %v2230_v36 = vand.u32 2147483647, %v6583_v9  ;;  %v2182_v11 = vmul.f32 -0.5, %v6554_v59 }
 0x339   : > { %v4745_v54 = vpop.eup %4744  ;;  %2525 = vmatpush.msrb.mxu1 %v2290_v35  ;;  %4752 = vlog2.f32 %v2224_v43  ;;  %v2228_v18 = vadd.f32 1.0, %v2227_v60  ;;  %vm6627_vm9 = vcmp.lt.f32.partialorder %v2221_v61, 0.0004427343  ;;  %vm2091_vm10 = vcmp.gt.f32.partialorder %v6539_v34, 20.0 }
 0x33a   : > { %v2251_v62 = vadd.f32 1.0, %v4745_v54  ;;  %v2254_v37 = vmul.f32 -0.5, %v4745_v54  ;;  %v2257_v63 = vand.u32 2147483647, %v4745_v54  ;;  %v2220_v29 = vmul.f32 %v6566_v10, %v2219_v44 }
 0x33b   : > { %2526 = vmatpush.msrb.mxu1 %v2286_v14  ;;  %vm6635_vm11 = vcmp.lt.f32.partialorder %v2230_v36, 0.0004427343  ;;  %v2183_v16 = vadd.f32 1.0, %v2182_v11  ;;  %v2185_v23 = vand.u32 2147483647, %v6554_v59  ;;  %v2188_v49 = vadd.f32 1.0, %v6603_v12 }
 0x33c   : > { %v4747_v7 = vpop.eup %4746  ;;  %4754 = vlog2.f32 %v2251_v62  ;;  %v2255_v3 = vadd.f32 1.0, %v2254_v37  ;;  %4397 = vmatmul.msk.f32.vlgmr.msrb.gmra.mxu1 %vm2456_vm0, %v6600_v30  ;;  %vm6639_vm12 = vcmp.lt.f32.partialorder %v2257_v63, 0.0004427343  ;;  %vm2087_vm14 = vcmp.gt.f32.partialorder %v6491_v1, 20.0 }
 0x33d   : > { %v4749_v2 = vpop.eup %4748  ;;  %4756 = vpow2.f32 %v2099_v28  ;;  %v2260_v33 = vadd.f32 1.0, %v4747_v7  ;;  %v2263_v57 = vmul.f32 -0.5, %v4747_v7  ;;  %v2266_v58 = vand.u32 2147483647, %v4747_v7 }
 0x33e   : > { %v2217_v24 = vmul.f32 0.6931472, %v4749_v2  ;;  %4758 = vlog2.f32 %v2179_v42  ;;  %v6631_v32 = vpop.eup %4750  ;;  %v2256_v51 = vmul.f32 %v4745_v54, %v2255_v3  ;;  %v2229_v39 = vmul.f32 %v6583_v9, %v2228_v18 }
 0x33f   : > { %4760 = vlog2.f32 %v2260_v33  ;;  %v4753_v41 = vpop.eup %4752  ;;  %v2191_v26 = vmul.f32 -0.5, %v6603_v12  ;;  %vm2092_vm15 = vcmp.gt.f32.partialorder %v6558_v5, 20.0  ;;  %v2264_v45 = vadd.f32 1.0, %v2263_v57 }
 0x340   : > { %4393 = vmatmul.msk.f32.gmra.mxu0 %vm2456_vm0, %v6625_v8  ;;  %v2226_v10 = vmul.f32 0.6931472, %v4753_v41  ;;  %v2223_v27 = vsel %vm6627_vm9, %v2220_v29, %v2217_v24  ;;  %4762 = vlog2.f32 %v2188_v49  ;;  %v2143_v52 = vadd.f32 1.0, %v6631_v32 }
 0x341   : > { %vm6656_vm2 = vcmp.lt.f32.partialorder %v2266_v58, 0.0004427343  ;;  %v2192_v43 = vadd.f32 1.0, %v2191_v26  ;;  %v2184_v28 = vmul.f32 %v6554_v59, %v2183_v16  ;;  %vm6668_vm3 = vcmp.lt.f32.partialorder %v2185_v23, 0.0004427343 }
 0x342   : > { %v4755_v22 = vpop.eup %4754  ;;  %v2232_v9 = vsel %vm6635_vm11, %v2229_v39, %v2226_v10  ;;  %4764 = vlog2.f32 %v2143_v52  ;;  %v2146_v60 = vmul.f32 -0.5, %v6631_v32  ;;  %v2279_v61 = vmul.f32 0.01, %v2223_v27  ;;  %v6735_v52 = vpop.permute.xlu1 %2615 }
 0x343   : > { %v6654_v13 = vpop.eup %4756  ;;  %v2253_v20 = vmul.f32 0.6931472, %v4755_v22  ;;  %v2194_v44 = vand.u32 2147483647, %v6603_v12  ;;  %v2265_v42 = vmul.f32 %v4747_v7, %v2264_v45  ;;  %v2280_v63 = vmul.f32 0.01, %v2232_v9  ;;  %v2415_v45 = vpop.f32.mrf.mxu2 }
 0x344   : > { %v4759_v54 = vpop.eup %4758  ;;  %4398 = vmatmul.msk.f32.gmra.mxu1 %vm2456_vm0, %v6625_v8  ;;  %v2193_v2 = vmul.f32 %v6603_v12, %v2192_v43  ;;  %v2147_v3 = vadd.f32 1.0, %v2146_v60  ;;  %v2152_v33 = vadd.f32 1.0, %v6654_v13  ;;  %v2149_v7 = vand.u32 2147483647, %v6631_v32 }
 0x345   : > { %v4761_v62 = vpop.eup %4760  ;;  %v2259_v37 = vsel %vm6639_vm12, %v2256_v51, %v2253_v20  ;;  %v2181_v14 = vmul.f32 0.6931472, %v4759_v54  ;;  %v2155_v29 = vmul.f32 -0.5, %v6654_v13  ;;  %vm2088_vm4 = vcmp.gt.f32.partialorder %v6504_v50, 20.0 }
 0x346   : > { %v2283_v36 = vmul.f32 0.01, %v2259_v37  ;;  %v2262_v59 = vmul.f32 0.6931472, %v4761_v62  ;;  %v4763_v18 = vpop.eup %4762  ;;  %4766 = vlog2.f32 %v2152_v33  ;;  %vm2083_vm1 = vcmp.gt.f32.partialorder %v6437_v25, 20.0 }
 0x347   : > { %v2187_v11 = vsel %vm6668_vm3, %v2184_v28, %v2181_v14  ;;  %v2190_v12 = vmul.f32 0.6931472, %v4763_v18  ;;  %vm2195_vm5 = vcmp.lt.f32.partialorder %v2194_v44, 0.0004427343  ;;  %v2148_v16 = vmul.f32 %v6631_v32, %v2147_v3 }
 0x348   : > { %v2299_v57 = vsel %vm2091_vm10, %v6521_v21, %v2283_v36  ;;  %v2268_v24 = vsel %vm6656_vm2, %v2265_v42, %v2262_v59  ;;  %v2275_v19 = vmul.f32 0.01, %v2187_v11  ;;  %4394 = vmatmul.msk.f32.gmra.mxu0 %vm2456_vm0, %v6665_v15  ;;  %v4765_v53 = vpop.eup %4764  ;;  %v2295_v21 = vsel %vm2087_vm14, %v6478_v47, %v2279_v61  ;;  %v6759_v42 = vpop.permute.xlu2 %2610 }
 0x349   : > { %v2284_v58 = vmul.f32 0.01, %v2268_v24  ;;  %4401 = vmatpush.msk.msrb.mxu2 %vm2469_vm13, %v2299_v57  ;;  %v2196_v41 = vsel %vm2195_vm5, %v2193_v2, %v2190_v12  ;;  %v2145_v4 = vmul.f32 0.6931472, %v4765_v53  ;;  %vm2150_vm7 = vcmp.lt.f32.partialorder %v2149_v7, 0.0004427343  ;;  %v6766_v57 = vpop.permute.xlu0 %2605 }
 0x34a   : > { %v2291_v23 = vsel %vm2083_vm1, %v6426_v48, %v2275_v19  ;;  %v2276_v1 = vmul.f32 0.01, %v2196_v41  ;;  %v2156_v47 = vadd.f32 1.0, %v2155_v29  ;;  %v2296_v50 = vsel %vm2088_vm4, %v6498_v55, %v2280_v63  ;;  %v2304_v48 = vld [vmem:[%s8182_s9 + $0x18] sm:$0xff]  ;;  %v6741_v28 = vpop.permute.xlu1 %2600 }
 0x34b   : > { %v2300_v34 = vsel %vm2092_vm15, %v6548_v46, %v2284_v58  ;;  %2553 = vmatpush.msrb.mxu2 %v2295_v21  ;;  %v2151_v25 = vsel %vm2150_vm7, %v2148_v16, %v2145_v4  ;;  %v2158_v46 = vand.u32 2147483647, %v6654_v13  ;;  %vm2084_vm8 = vcmp.gt.f32.partialorder %v6451_v6, 20.0  ;;  %v6737_v20 = vpop.f32.mrf.mxu2 }
 0x34c   : > { %4406 = vmatpush.msk.msrb.mxu3 %vm2469_vm13, %v2300_v34  ;;  %4399 = vmatmul.msk.f32.gmra.mxu1 %vm2456_vm0, %v6665_v15  ;;  %v2271_v5 = vmul.f32 0.01, %v2151_v25  ;;  %v4767_v32 = vpop.eup %4766  ;;  %v2292_v49 = vsel %vm2084_vm8, %v6440_v31, %v2276_v1  ;;  %vm2079_vm13 = vcmp.gt.f32.partialorder %v6403_v0, 20.0  ;;  %v2157_v10 = vmul.f32 %v6654_v13, %v2156_v47  ;;  %v2386_v0 = vpop.f32.mrf.mxu1 }
 0x34d   : > { %2554 = vmatpush.msrb.mxu2 %v2291_v23  ;;  %v2154_v51 = vmul.f32 0.6931472, %v4767_v32  ;;  %vm2159_vm9 = vcmp.lt.f32.partialorder %v2158_v46, 0.0004427343  ;;  %vm2080_vm10 = vcmp.gt.f32.partialorder %v6423_v38, 20.0 }
 0x34e   : > { %2582 = vmatpush.msrb.mxu3 %v2296_v50  ;;  %v2287_v55 = vsel %vm2079_vm13, %v6396_v40, %v2271_v5  ;;  %v2357_v40 = vpop.f32.mrf.mxu0 }
 0x34f   : > { %2555 = vmatpush.msrb.mxu2 %v2287_v55  ;;  %v2160_v6 = vsel %vm2159_vm9, %v2157_v10, %v2154_v51 }
 0x350   : > { %2583 = vmatpush.msrb.mxu3 %v2292_v49  ;;  %4395 = vmatmul.msk.f32.gmra.mxu0 %vm2456_vm0, %v2304_v48  ;;  %v2272_v39 = vmul.f32 0.01, %v2160_v6 }
 0x351   : > { %4402 = vmatmul.msk.f32.vlgmr.msrb.gmra.mxu2 %vm2456_vm0, %v6600_v30 }
 0x352   : > { %v2288_v31 = vsel %vm2080_vm10, %v6411_v56, %v2272_v39 }
 0x353   : > { %2584 = vmatpush.msrb.mxu3 %v2288_v31 }
 0x354   : > { %4400 = vmatmul.msk.f32.gmra.mxu1 %vm2456_vm0, %v2304_v48  ;;  %4407 = vmatmul.msk.f32.vlgmr.msrb.gmra.mxu3 %vm2456_vm0, %v6600_v30  ;;  %v2389_v38 = vpop.f32.mrf.mxu1 }
 0x356   : > { %v2360_v56 = vpop.f32.mrf.mxu0 }
 0x359   : > { %4403 = vmatmul.msk.f32.gmra.mxu2 %vm2456_vm0, %v6625_v8 }
 0x35c   : > { %4408 = vmatmul.msk.f32.gmra.mxu3 %vm2456_vm0, %v6625_v8  ;;  %v6733_v8 = vpop.f32.mrf.mxu3 }
 0x361   : > { %4404 = vmatmul.msk.f32.gmra.mxu2 %vm2456_vm0, %v6665_v15 }
 0x364   : > { %4409 = vmatmul.msk.f32.gmra.mxu3 %vm2456_vm0, %v6665_v15  ;;  %v6739_v43 = vpop.f32.mrf.mxu3 }
 0x369   : > { %4405 = vmatmul.msk.f32.gmra.mxu2 %vm2456_vm0, %v2304_v48 }
 0x36c   : > { %4410 = vmatmul.msk.f32.gmra.mxu3 %vm2456_vm0, %v2304_v48 }
 0x386   : > { %v2363_v30 = vpop.f32.mrf.mxu0  ;;  %v2392_v26 = vpop.f32.mrf.mxu1 }
 0x38d   : > { %v6746_v60 = vpop.f32.mrf.mxu2  ;;  %v6757_v44 = vpop.f32.mrf.mxu3 }
 0x3a7   : > { %v2366_v22 = vpop.f32.mrf.mxu0  ;;  %v2395_v27 = vpop.f32.mrf.mxu1 }
 0x3ae   : > { %v6771_v7 = vpop.f32.mrf.mxu2 }
 0x3af   : > { %v6789_v1 = vpop.f32.mrf.mxu3 }
 0x3b5   : > { %v2499_v13 = vpop.f32.mrf.mxu0 }
 0x3b6   : > { %v2500_v9 = vadd.f32 %v2499_v13, %v2357_v40 }
 0x3b8   : > { %v6744_v35 = vadd.f32 %v6741_v28, %v2500_v9 }
 0x3b9   : > { %v2528_v17 = vpop.f32.mrf.mxu1 }
 0x3ba   : > { %v2529_v54 = vadd.f32 %v2528_v17, %v2386_v0  ;;  %v6752_v61 = vmul.f32 100.0, %v6744_v35 }
 0x3bc   : > { %v6749_v62 = vadd.f32 %v6741_v28, %v2529_v54  ;;  %v2650_v63 = vmin.f32 %v6752_v61, 20.0  ;;  %vm2666_vm8 = vcmp.gt.f32.partialorder %v6752_v61, 20.0 }
 0x3bd   : > { %v2502_v15 = vpop.f32.mrf.mxu0 }
 0x3be   : > { %v6755_v14 = vmul.f32 100.0, %v6749_v62  ;;  %v2503_v11 = vadd.f32 %v2502_v15, %v2360_v56  ;;  %v2682_v58 = vmul.f32 1.442695, %v2650_v63 }
 0x3c0   : > { %v2651_v3 = vmin.f32 %v6755_v14, 20.0  ;;  %v6774_v12 = vadd.f32 %v6766_v57, %v2503_v11  ;;  %4768 = vpow2.f32 %v2682_v58 }
 0x3c1   : > { %v2531_v37 = vpop.f32.mrf.mxu1 }
 0x3c2   : > { %v2532_v33 = vadd.f32 %v2531_v37, %v2389_v38  ;;  %v2684_v21 = vmul.f32 1.442695, %v2651_v3  ;;  %v6787_v23 = vmul.f32 100.0, %v6774_v12 }
 0x3c4   : > { %v6781_v34 = vadd.f32 %v6766_v57, %v2532_v33  ;;  %4770 = vpow2.f32 %v2684_v21  ;;  %v2654_v49 = vmin.f32 %v6787_v23, 20.0  ;;  %vm2670_vm5 = vcmp.gt.f32.partialorder %v6787_v23, 20.0  ;;  %v6978_v23 = vld [vmem:[%s8185_s12] sm:$0xff] }
 0x3c5   : > { %v2505_v36 = vpop.f32.mrf.mxu0 }
 0x3c6   : > { %v2506_v59 = vadd.f32 %v2505_v36, %v2363_v30  ;;  %v6796_v46 = vmul.f32 100.0, %v6781_v34  ;;  %v6806_v39 = vpop.eup %4768  ;;  %v2690_v30 = vmul.f32 1.442695, %v2654_v49 }
 0x3c7   : > { %v2714_v15 = vadd.f32 1.0, %v6806_v39 }
 0x3c8   : > { %v6763_v2 = vadd.f32 %v6759_v42, %v2506_v59  ;;  %v2655_v31 = vmin.f32 %v6796_v46, 20.0  ;;  %vm2671_vm10 = vcmp.gt.f32.partialorder %v6796_v46, 20.0 }
 0x3c9   : > { %v2534_v18 = vpop.f32.mrf.mxu1 }
 0x3ca   : > { %v6769_v24 = vmul.f32 100.0, %v6763_v2  ;;  %v2535_v19 = vadd.f32 %v2534_v18, %v2392_v26  ;;  %v6812_v38 = vpop.eup %4770  ;;  %v2692_v13 = vmul.f32 1.442695, %v2655_v31 }
 0x3cb   : > { %v2726_v37 = vmul.f32 -0.5, %v6812_v38  ;;  %v2723_v36 = vadd.f32 1.0, %v6812_v38 }
 0x3cc   : > { %v2658_v29 = vmin.f32 %v6769_v24, 20.0  ;;  %v6778_v53 = vadd.f32 %v6759_v42, %v2535_v19  ;;  %v2720_v19 = vand.u32 2147483647, %v6806_v39  ;;  %vm2674_vm12 = vcmp.gt.f32.partialorder %v6769_v24, 20.0 }
 0x3cd   : > { %v2508_v41 = vpop.f32.mrf.mxu0  ;;  %v6833_v21 = vadd.f32 1.0, %v2726_v37 }
 0x3ce   : > { %v6784_v4 = vmul.f32 100.0, %v6778_v53  ;;  %v2509_v16 = vadd.f32 %v2508_v41, %v2366_v22  ;;  %v2698_v47 = vmul.f32 1.442695, %v2658_v29  ;;  %vm6916_vm4 = vcmp.lt.f32.partialorder %v2720_v19, 0.0004427343 }
 0x3d0   : > { %v2659_v50 = vmin.f32 %v6784_v4, 20.0  ;;  %v6793_v25 = vadd.f32 %v6735_v52, %v2509_v16  ;;  %4772 = vpow2.f32 %v2698_v47  ;;  %vm2675_vm3 = vcmp.gt.f32.partialorder %v6784_v4, 20.0 }
 0x3d1   : > { %v2537_v5 = vpop.f32.mrf.mxu1 }
 0x3d2   : > { %v6799_v48 = vmul.f32 100.0, %v6793_v25  ;;  %v2538_v32 = vadd.f32 %v2537_v5, %v2395_v27  ;;  %v2700_v55 = vmul.f32 1.442695, %v2659_v50  ;;  %v2717_v27 = vmul.f32 -0.5, %v6806_v39 }
 0x3d4   : > { %v2662_v51 = vmin.f32 %v6799_v48, 20.0  ;;  %v6804_v10 = vadd.f32 %v6735_v52, %v2538_v32  ;;  %v2557_v6 = vpop.f32.mrf.mxu2  ;;  %4774 = vpow2.f32 %v2700_v55  ;;  %v2718_v3 = vadd.f32 1.0, %v2717_v27 }
 0x3d5   : > { %v2558_v40 = vadd.f32 %v2557_v6, %v2415_v45  ;;  %vm2678_vm0 = vcmp.gt.f32.partialorder %v6799_v48, 20.0 }
 0x3d6   : > { %v2706_v0 = vmul.f32 1.442695, %v2662_v51  ;;  %v6810_v56 = vmul.f32 100.0, %v6804_v10  ;;  %v4773_v9 = vpop.eup %4772  ;;  %v6844_v5 = vmul.f32 %v6806_v39, %v2718_v3 }
 0x3d7   : > { %v6816_v22 = vadd.f32 %v6741_v28, %v2558_v40  ;;  %v2586_v17 = vpop.f32.mrf.mxu3  ;;  %v2786_v18 = vadd.f32 1.0, %v4773_v9  ;;  %v2789_v29 = vmul.f32 -0.5, %v4773_v9  ;;  %v2792_v51 = vand.u32 2147483647, %v4773_v9 }
 0x3d8   : > { %4776 = vpow2.f32 %v2706_v0  ;;  %v2663_v26 = vmin.f32 %v6810_v56, 20.0  ;;  %v2587_v54 = vadd.f32 %v2586_v17, %v6733_v8  ;;  %vm2679_vm15 = vcmp.gt.f32.partialorder %v6810_v56, 20.0 }
 0x3d9   : > { %4778 = vpow2.f32 %v2690_v30  ;;  %v6824_v59 = vmul.f32 100.0, %v6816_v22  ;;  %v2790_v30 = vadd.f32 1.0, %v2789_v29  ;;  %vm6874_vm14 = vcmp.lt.f32.partialorder %v2792_v51, 0.0004427343 }
 0x3da   : > { %v2708_v45 = vmul.f32 1.442695, %v2663_v26  ;;  %v6827_v63 = vadd.f32 %v6741_v28, %v2587_v54  ;;  %v6829_v33 = vpop.eup %4774 }
 0x3db   : > { %v2652_v50 = vmin.f32 %v6824_v59, 20.0  ;;  %v2798_v6 = vmul.f32 -0.5, %v6829_v33  ;;  %v2795_v26 = vadd.f32 1.0, %v6829_v33 }
 0x3dc   : > { %4780 = vpow2.f32 %v2708_v45  ;;  %v2560_v11 = vpop.f32.mrf.mxu2 }
 0x3dd   : > { %4782 = vpow2.f32 %v2692_v13  ;;  %v2561_v8 = vadd.f32 %v2560_v11, %v6737_v20  ;;  %v6841_v20 = vmul.f32 100.0, %v6827_v63  ;;  %v6859_v37 = vmul.f32 1.442695, %v2652_v50 }
 0x3de   : > { %v4777_v58 = vpop.eup %4776  ;;  %4784 = vlog2.f32 %v2714_v15 }
 0x3df   : > { %v6837_v28 = vadd.f32 %v6766_v57, %v2561_v8  ;;  %v2822_v16 = vadd.f32 1.0, %v4777_v58  ;;  %v2825_v47 = vmul.f32 -0.5, %v4777_v58  ;;  %4786 = vlog2.f32 %v2723_v36  ;;  %v6846_v32 = vpop.eup %4778  ;;  %v2589_v55 = vpop.f32.mrf.mxu3 }
 0x3e0   : > { %4788 = vlog2.f32 %v2786_v18  ;;  %v2590_v40 = vadd.f32 %v2589_v55, %v6739_v43  ;;  %v2828_v0 = vand.u32 2147483647, %v4777_v58  ;;  %v2750_v51 = vadd.f32 1.0, %v6846_v32 }
 0x3e1   : > { %v6849_v49 = vmul.f32 100.0, %v6837_v28  ;;  %4790 = vlog2.f32 %v2822_v16  ;;  %v2826_v17 = vadd.f32 1.0, %v2825_v47  ;;  %v2799_v16 = vadd.f32 1.0, %v2798_v6 }
 0x3e2   : > { %v4781_v31 = vpop.eup %4780  ;;  %v6863_v11 = vadd.f32 %v6766_v57, %v2590_v40  ;;  %vm6869_vm11 = vcmp.lt.f32.partialorder %v2828_v0, 0.0004427343  ;;  %v2791_v57 = vmul.f32 %v4773_v9, %v2790_v30 }
 0x3e3   : > { %v6854_v27 = vpop.eup %4782  ;;  %v2656_v13 = vmin.f32 %v6849_v49, 20.0  ;;  %v2831_v45 = vadd.f32 1.0, %v4781_v31  ;;  %v2834_v54 = vmul.f32 -0.5, %v4781_v31  ;;  %v2837_v3 = vand.u32 2147483647, %v4781_v31 }
 0x3e4   : > { %v6857_v15 = vpop.eup %4784  ;;  %v2563_v43 = vpop.f32.mrf.mxu2  ;;  %v2827_v6 = vmul.f32 %v4777_v58, %v2826_v17  ;;  %v6884_v0 = vmul.f32 100.0, %v6863_v11  ;;  %v2800_v17 = vmul.f32 %v6829_v33, %v2799_v16  ;;  %v2759_v9 = vadd.f32 1.0, %v6854_v27 }
 0x3e5   : > { %v6866_v8 = vpop.eup %4786  ;;  %v2564_v18 = vadd.f32 %v2563_v43, %v6746_v60  ;;  %4792 = vlog2.f32 %v2831_v45  ;;  %v2835_v29 = vadd.f32 1.0, %v2834_v54  ;;  %v6878_v36 = vmul.f32 1.442695, %v2656_v13 }
 0x3e6   : > { %v4789_v47 = vpop.eup %4788  ;;  %4794 = vlog2.f32 %v2795_v26  ;;  %vm6887_vm2 = vcmp.lt.f32.partialorder %v2837_v3, 0.0004427343  ;;  %v2657_v16 = vmin.f32 %v6884_v0, 20.0 }
 0x3e7   : > { %v4791_v40 = vpop.eup %4790  ;;  %v6881_v60 = vadd.f32 %v6759_v42, %v2564_v18  ;;  %v2788_v45 = vmul.f32 0.6931472, %v4789_v47  ;;  %v2592_v26 = vpop.f32.mrf.mxu3  ;;  %v2836_v13 = vmul.f32 %v4781_v31, %v2835_v29  ;;  %v2801_v18 = vand.u32 2147483647, %v6829_v33 }
 0x3e8   : > { %v2824_v54 = vmul.f32 0.6931472, %v4791_v40  ;;  %v2593_v43 = vadd.f32 %v2592_v26, %v6757_v44  ;;  %v2753_v47 = vmul.f32 -0.5, %v6846_v32  ;;  %4796 = vlog2.f32 %v2750_v51 }
 0x3e9   : > { %v6893_v30 = vmul.f32 100.0, %v6881_v60  ;;  %v2794_v58 = vsel %vm6874_vm14, %v2791_v57, %v2788_v45  ;;  %vm2802_vm1 = vcmp.lt.f32.partialorder %v2801_v18, 0.0004427343 }
 0x3ea   : > { %v2830_v3 = vsel %vm6869_vm11, %v2827_v6, %v2824_v54  ;;  %v2866_v29 = vmul.f32 0.01, %v2794_v58  ;;  %v6907_v44 = vadd.f32 %v6759_v42, %v2593_v43  ;;  %v2756_v6 = vand.u32 2147483647, %v6846_v32 }
 0x3eb   : > { %v4793_v40 = vpop.eup %4792  ;;  %v2660_v41 = vmin.f32 %v6893_v30, 20.0  ;;  %v2870_v31 = vmul.f32 0.01, %v2830_v3  ;;  %v2696_v58 = vmul.f32 1.442695, %v2657_v16  ;;  %vm2676_vm14 = vcmp.gt.f32.partialorder %v6893_v30, 20.0 }
 0x3ec   : > { %v4795_v57 = vpop.eup %4794  ;;  %v2566_v50 = vpop.f32.mrf.mxu2  ;;  %v2833_v55 = vmul.f32 0.6931472, %v4793_v40  ;;  %v6921_v42 = vmul.f32 100.0, %v6907_v44  ;;  %v2882_v39 = vsel %vm2674_vm12, %v6763_v2, %v2866_v29  ;;  %v2762_v29 = vmul.f32 -0.5, %v6854_v27 }
 0x3ed   : > { %v2702_v45 = vmul.f32 1.442695, %v2660_v41  ;;  %v2567_v33 = vadd.f32 %v2566_v50, %v6771_v7  ;;  %v2886_v54 = vsel %vm2678_vm0, %v6793_v25, %v2870_v31  ;;  %v2797_v26 = vmul.f32 0.6931472, %v4795_v57 }
 0x3ee   : > { %2942 = vmatpush.msra.mxu0 %v2886_v54  ;;  %v2839_v41 = vsel %vm6887_vm2, %v2836_v13, %v2833_v55  ;;  %v2754_v7 = vadd.f32 1.0, %v2753_v47  ;;  %v2661_v43 = vmin.f32 %v6921_v42, 20.0  ;;  %v4797_v13 = vpop.eup %4796  ;;  %vm2757_vm7 = vcmp.lt.f32.partialorder %v2756_v6, 0.0004427343 }
 0x3ef   : > { %v6927_v25 = vadd.f32 %v6735_v52, %v2567_v33  ;;  %v2871_v48 = vmul.f32 0.01, %v2839_v41  ;;  %v2803_v19 = vsel %vm2802_vm1, %v2800_v17, %v2797_v26  ;;  %4798 = vpow2.f32 %v2702_v45  ;;  %v2595_v47 = vpop.f32.mrf.mxu3 }
 0x3f0   : > { %2943 = vmatpush.msra.mxu0 %v2882_v39  ;;  %v2867_v3 = vmul.f32 0.01, %v2803_v19  ;;  %v2755_v2 = vmul.f32 %v6846_v32, %v2754_v7  ;;  %v2704_v24 = vmul.f32 1.442695, %v2661_v43  ;;  %v2596_v17 = vadd.f32 %v2595_v47, %v6789_v1 }
 0x3f1   : > { %v6935_v18 = vmul.f32 100.0, %v6927_v25  ;;  %v2887_v40 = vsel %vm2679_vm15, %v6804_v10, %v2871_v48  ;;  %v2752_v31 = vmul.f32 0.6931472, %v4797_v13  ;;  %4800 = vlog2.f32 %v2759_v9 }
 0x3f2   : > { %2971 = vmatpush.msra.mxu1 %v2887_v40  ;;  %v2883_v16 = vsel %vm2675_vm3, %v6778_v53, %v2867_v3  ;;  %4802 = vpow2.f32 %v2704_v24  ;;  %v6948_v10 = vadd.f32 %v6735_v52, %v2596_v17  ;;  %v2716_v1 = vmul.f32 0.6931472, %v6857_v15 }
 0x3f3   : > { %v2664_v57 = vmin.f32 %v6935_v18, 20.0  ;;  %v2758_v56 = vsel %vm2757_vm7, %v2755_v2, %v2752_v31  ;;  %v2725_v55 = vmul.f32 0.6931472, %v6866_v8  ;;  %v2728_v45 = vmul.f32 %v6812_v38, %v6833_v21  ;;  %v7009_v31 = vld [vmem:[%s8185_s12 + $0x8] sm:$0xff] }
 0x3f4   : > { %2972 = vmatpush.msra.mxu1 %v2883_v16  ;;  %v2862_v50 = vmul.f32 0.01, %v2758_v56  ;;  %4804 = vpow2.f32 %v6878_v36  ;;  %v6956_v53 = vmul.f32 100.0, %v6948_v10  ;;  %v2763_v4 = vadd.f32 1.0, %v2762_v29 }
 0x3f5   : > { %v2710_v32 = vmul.f32 1.442695, %v2664_v57  ;;  %v2722_v52 = vsel %vm6916_vm4, %v6844_v5, %v2716_v1  ;;  %v6961_v6 = vpop.eup %4798  ;;  %v2765_v8 = vand.u32 2147483647, %v6854_v27  ;;  %v8341_v33 = vand.u32 2147483647, %v6812_v38 }
 0x3f6   : > { %v2878_v15 = vsel %vm2670_vm5, %v6774_v12, %v2862_v50  ;;  %v2858_v21 = vmul.f32 0.01, %v2722_v52  ;;  %v2665_v36 = vmin.f32 %v6956_v53, 20.0  ;;  %v2764_v41 = vmul.f32 %v6854_v27, %v2763_v4 }
 0x3f7   : > { %4806 = vpow2.f32 %v2710_v32  ;;  %2944 = vmatpush.msra.mxu0 %v2878_v15  ;;  %vm6971_vm13 = vcmp.lt.f32.partialorder %v8341_v33, 0.0004427343  ;;  %v4801_v12 = vpop.eup %4800  ;;  %v8344_v7 = vmin.f32 %v6841_v20, 20.0  ;;  %vm2766_vm9 = vcmp.lt.f32.partialorder %v2765_v8, 0.0004427343 }
 0x3f8   : > { %4808 = vpow2.f32 %v2696_v58  ;;  %v2874_v54 = vsel %vm2666_vm8, %v6744_v35, %v2858_v21  ;;  %v2731_v26 = vsel %vm6971_vm13, %v2728_v45, %v2725_v55  ;;  %v6983_v51 = vpop.eup %4802  ;;  %v2712_v61 = vmul.f32 1.442695, %v2665_v36 }
 0x3f9   : > { %4810 = vpow2.f32 %v6859_v37  ;;  %v2761_v38 = vmul.f32 0.6931472, %v4801_v12  ;;  %2945 = vmatpush.msra.mxu0 %v2874_v54  ;;  %v2688_v48 = vmul.f32 1.442695, %v8344_v7  ;;  %v2804_v35 = vadd.f32 1.0, %v6961_v6 }
 0x3fa   : > { %4411 = vmatmul.msk.f32.vlgmr.msra.gmra.mxu0 %vm1092_vm6, %v6978_v23  ;;  %v2813_v39 = vadd.f32 1.0, %v6983_v51  ;;  %v6993_v19 = vpop.eup %4804  ;;  %4812 = vpow2.f32 %v2712_v61  ;;  %v2859_v58 = vmul.f32 0.01, %v2731_v26  ;;  %v2807_v43 = vmul.f32 -0.5, %v6961_v6  ;;  %v7037_v61 = vld [vmem:[%s8185_s12 + $0x10] sm:$0xff] }
 0x3fb   : > { %v2767_v37 = vsel %vm2766_vm9, %v2764_v41, %v2761_v38  ;;  %4814 = vlog2.f32 %v2804_v35  ;;  %v2816_v40 = vmul.f32 -0.5, %v6983_v51  ;;  %vm2667_vm0 = vcmp.gt.f32.partialorder %v6755_v14, 20.0 }
 0x3fc   : > { %v2863_v3 = vmul.f32 0.01, %v2767_v37  ;;  %4816 = vlog2.f32 %v2813_v39  ;;  %v2810_v24 = vand.u32 2147483647, %v6961_v6  ;;  %v2875_v46 = vsel %vm2667_vm0, %v6749_v62, %v2859_v58 }
 0x3fd   : > { %v4807_v27 = vpop.eup %4806  ;;  %4818 = vpow2.f32 %v2688_v48  ;;  %v2808_v29 = vadd.f32 1.0, %v2807_v43  ;;  %v2768_v57 = vadd.f32 1.0, %v6993_v19  ;;  %v2771_v14 = vmul.f32 -0.5, %v6993_v19 }
 0x3fe   : > { %v6997_v9 = vpop.eup %4808  ;;  %v2840_v13 = vadd.f32 1.0, %v4807_v27  ;;  %v2843_v47 = vmul.f32 -0.5, %v4807_v27  ;;  %v2879_v2 = vsel %vm2671_vm10, %v6781_v34, %v2863_v3  ;;  %v2846_v16 = vand.u32 2147483647, %v4807_v27 }
 0x3ff   : > { %v7003_v17 = vpop.eup %4810  ;;  %2973 = vmatpush.msra.mxu1 %v2879_v2  ;;  %v2819_v34 = vand.u32 2147483647, %v6983_v51  ;;  %v2777_v56 = vadd.f32 1.0, %v6997_v9  ;;  %v2817_v62 = vadd.f32 1.0, %v2816_v40  ;;  %v2780_v50 = vmul.f32 -0.5, %v6997_v9 }
 0x400   : > { %4820 = vlog2.f32 %v2840_v13  ;;  %v4813_v1 = vpop.eup %4812  ;;  %v2844_v32 = vadd.f32 1.0, %v2843_v47  ;;  %vm2680_vm11 = vcmp.gt.f32.partialorder %v6935_v18, 20.0  ;;  %vm7021_vm12 = vcmp.lt.f32.partialorder %v2810_v24, 0.0004427343 }
 0x401   : > { %2974 = vmatpush.msra.mxu1 %v2875_v46  ;;  %4822 = vlog2.f32 %v2768_v57  ;;  %v4815_v55 = vpop.eup %4814  ;;  %v2849_v45 = vadd.f32 1.0, %v4813_v1  ;;  %v2852_v4 = vmul.f32 -0.5, %v4813_v1  ;;  %v2809_v21 = vmul.f32 %v6961_v6, %v2808_v29 }
 0x402   : > { %4415 = vmatmul.msk.f32.vlgmr.msra.gmra.mxu1 %vm1092_vm6, %v6978_v23  ;;  %4412 = vmatmul.msk.f32.gmra.mxu0 %vm1092_vm6, %v7009_v31  ;;  %v4817_v15 = vpop.eup %4816  ;;  %v2806_v8 = vmul.f32 0.6931472, %v4815_v55  ;;  %v2774_v36 = vand.u32 2147483647, %v6993_v19  ;;  %4824 = vlog2.f32 %v2777_v56  ;;  %vm7030_vm15 = vcmp.lt.f32.partialorder %v2819_v34, 0.0004427343 }
 0x403   : > { %v7027_v33 = vpop.eup %4818  ;;  %4826 = vlog2.f32 %v2849_v45  ;;  %v2772_v12 = vadd.f32 1.0, %v2771_v14  ;;  %v2781_v54 = vadd.f32 1.0, %v2780_v50  ;;  %v2845_v6 = vmul.f32 %v4807_v27, %v2844_v32 }
 0x404   : > { %vm7039_vm2 = vcmp.lt.f32.partialorder %v2846_v16, 0.0004427343  ;;  %v2853_v41 = vadd.f32 1.0, %v2852_v4  ;;  %v2818_v7 = vmul.f32 %v6983_v51, %v2817_v62  ;;  %v2812_v35 = vsel %vm7021_vm12, %v2809_v21, %v2806_v8  ;;  %v2893_v21 = vld [vmem:[%s8185_s12 + $0x18] sm:$0xff] }
 0x405   : > { %v2815_v39 = vmul.f32 0.6931472, %v4817_v15  ;;  %v2783_v37 = vand.u32 2147483647, %v6997_v9  ;;  %v2855_v43 = vand.u32 2147483647, %v4813_v1  ;;  %v2773_v40 = vmul.f32 %v6993_v19, %v2772_v12 }
 0x406   : > { %v4821_v26 = vpop.eup %4820  ;;  %vm7047_vm3 = vcmp.lt.f32.partialorder %v2774_v36, 0.0004427343  ;;  %v2732_v27 = vadd.f32 1.0, %v7003_v17  ;;  %v2735_v13 = vmul.f32 -0.5, %v7003_v17  ;;  %v2782_v2 = vmul.f32 %v6997_v9, %v2781_v54 }
 0x407   : > { %v2842_v48 = vmul.f32 0.6931472, %v4821_v26  ;;  %v4823_v58 = vpop.eup %4822  ;;  %v2854_v29 = vmul.f32 %v4813_v1, %v2853_v41  ;;  %v2868_v57 = vmul.f32 0.01, %v2812_v35  ;;  %v2821_v34 = vsel %vm7030_vm15, %v2818_v7, %v2815_v39 }
 0x408   : > { %v2770_v47 = vmul.f32 0.6931472, %v4823_v58  ;;  %v4825_v24 = vpop.eup %4824  ;;  %4828 = vlog2.f32 %v2732_v27  ;;  %v2741_v9 = vadd.f32 1.0, %v7027_v33  ;;  %v2736_v62 = vadd.f32 1.0, %v2735_v13 }
 0x409   : > { %v2848_v51 = vsel %vm7039_vm2, %v2845_v6, %v2842_v48  ;;  %v4827_v16 = vpop.eup %4826  ;;  %v2779_v14 = vmul.f32 0.6931472, %v4825_v24  ;;  %vm2856_vm4 = vcmp.lt.f32.partialorder %v2855_v43, 0.0004427343  ;;  %vm7069_vm1 = vcmp.lt.f32.partialorder %v2783_v37, 0.0004427343  ;;  %v7141_v37 = vpop.permute.xlu0 %2910 }
 0x40a   : > { %v2872_v46 = vmul.f32 0.01, %v2848_v51  ;;  %4416 = vmatmul.msk.f32.gmra.mxu1 %vm1092_vm6, %v7009_v31  ;;  %4413 = vmatmul.msk.f32.gmra.mxu0 %vm1092_vm6, %v7037_v61  ;;  %v2776_v19 = vsel %vm7047_vm3, %v2773_v40, %v2770_v47  ;;  %v2851_v1 = vmul.f32 0.6931472, %v4827_v16  ;;  %4830 = vlog2.f32 %v2741_v9 }
 0x40b   : > { %v2864_v32 = vmul.f32 0.01, %v2776_v19  ;;  %v2744_v55 = vmul.f32 -0.5, %v7027_v33  ;;  %v2884_v4 = vsel %vm2676_vm14, %v6881_v60, %v2868_v57  ;;  %v2738_v18 = vand.u32 2147483647, %v7003_v17 }
 0x40c   : > { %v2888_v56 = vsel %vm2680_vm11, %v6927_v25, %v2872_v46  ;;  %v2857_v45 = vsel %vm2856_vm4, %v2854_v29, %v2851_v1  ;;  %v2785_v25 = vsel %vm7069_vm1, %v2782_v2, %v2779_v14  ;;  %v2869_v15 = vmul.f32 0.01, %v2821_v34 }
 0x40d   : > { %3000 = vmatpush.msra.mxu2 %v2888_v56  ;;  %v2873_v52 = vmul.f32 0.01, %v2857_v45  ;;  %vm2672_vm5 = vcmp.gt.f32.partialorder %v6849_v49, 20.0  ;;  %vm2681_vm7 = vcmp.gt.f32.partialorder %v6956_v53, 20.0  ;;  %v2737_v60 = vmul.f32 %v7003_v17, %v2736_v62 }
 0x40e   : > { %v4829_v8 = vpop.eup %4828  ;;  %v2880_v30 = vsel %vm2672_vm5, %v6837_v28, %v2864_v32  ;;  %v2745_v36 = vadd.f32 1.0, %v2744_v55  ;;  %v2865_v12 = vmul.f32 0.01, %v2785_v25  ;;  %v2747_v26 = vand.u32 2147483647, %v7027_v33 }
 0x40f   : > { %3001 = vmatpush.msra.mxu2 %v2884_v4  ;;  %v2889_v5 = vsel %vm2681_vm7, %v6948_v10, %v2873_v52  ;;  %v2734_v54 = vmul.f32 0.6931472, %v4829_v8  ;;  %vm2677_vm8 = vcmp.gt.f32.partialorder %v6921_v42, 20.0  ;;  %vm2739_vm13 = vcmp.lt.f32.partialorder %v2738_v18, 0.0004427343 }
 0x410   : > { %3029 = vmatpush.msra.mxu3 %v2889_v5  ;;  %v4831_v49 = vpop.eup %4830  ;;  %v2885_v28 = vsel %vm2677_vm8, %v6907_v44, %v2869_v15  ;;  %vm2673_vm9 = vcmp.gt.f32.partialorder %v6884_v0, 20.0  ;;  %v2746_v6 = vmul.f32 %v7027_v33, %v2745_v36  ;;  %vm2668_vm10 = vcmp.gt.f32.partialorder %v6824_v59, 20.0 }
 0x411   : > { %3002 = vmatpush.msra.mxu2 %v2880_v30  ;;  %v2740_v53 = vsel %vm2739_vm13, %v2737_v60, %v2734_v54  ;;  %v2743_v17 = vmul.f32 0.6931472, %v4831_v49  ;;  %v2881_v38 = vsel %vm2673_vm9, %v6863_v11, %v2865_v12  ;;  %vm2748_vm0 = vcmp.lt.f32.partialorder %v2747_v26, 0.0004427343  ;;  %v7123_v11 = vpop.permute.xlu1 %2905 }
 0x412   : > { %4417 = vmatmul.msk.f32.gmra.mxu1 %vm1092_vm6, %v7037_v61  ;;  %4414 = vmatmul.msk.f32.gmra.mxu0 %vm1092_vm6, %v2893_v21  ;;  %v2860_v10 = vmul.f32 0.01, %v2740_v53  ;;  %vm2669_vm11 = vcmp.gt.f32.partialorder %v6841_v20, 20.0 }
 0x413   : > { %3030 = vmatpush.msra.mxu3 %v2885_v28  ;;  %v2749_v41 = vsel %vm2748_vm0, %v2746_v6, %v2743_v17 }
 0x414   : > { %v2876_v42 = vsel %vm2668_vm10, %v6816_v22, %v2860_v10  ;;  %v2861_v7 = vmul.f32 0.01, %v2749_v41  ;;  %v7116_v22 = vpop.permute.xlu2 %2915 }
 0x415   : > { %3031 = vmatpush.msra.mxu3 %v2881_v38  ;;  %3003 = vmatpush.msra.mxu2 %v2876_v42 }
 0x416   : > { %4419 = vmatmul.msk.f32.vlgmr.msra.gmra.mxu2 %vm1092_vm6, %v6978_v23  ;;  %v2877_v0 = vsel %vm2669_vm11, %v6827_v63, %v2861_v7 }
 0x417   : > { %3032 = vmatpush.msra.mxu3 %v2877_v0 }
 0x418   : > { %4423 = vmatmul.msk.f32.vlgmr.msra.gmra.mxu3 %vm1092_vm6, %v6978_v23 }
 0x41a   : > { %4418 = vmatmul.msk.f32.gmra.mxu1 %vm1092_vm6, %v2893_v21 }
 0x41c   : > { %v7118_v63 = vpop.permute.xlu2 %2900 }
 0x41e   : > { %4420 = vmatmul.msk.f32.gmra.mxu2 %vm1092_vm6, %v7009_v31 }
 0x420   : > { %4424 = vmatmul.msk.f32.gmra.mxu3 %vm1092_vm6, %v7009_v31 }
 0x426   : > { %4421 = vmatmul.msk.f32.gmra.mxu2 %vm1092_vm6, %v7037_v61 }
 0x428   : > { %4425 = vmatmul.msk.f32.gmra.mxu3 %vm1092_vm6, %v7037_v61 }
 0x42e   : > { %4422 = vmatmul.msk.f32.gmra.mxu2 %vm1092_vm6, %v2893_v21 }
 0x430   : > { %4426 = vmatmul.msk.f32.gmra.mxu3 %vm1092_vm6, %v2893_v21 }
 0x477   : > { %v2947_v59 = vpop.f32.mrf.mxu0 }
 0x478   : > { %v7121_v20 = vadd.f32 %v2947_v59, %v7118_v63 }
 0x47a   : > { %v7132_v61 = vmul.f32 100.0, %v7121_v20 }
 0x47c   : > { %v3062_v39 = vmin.f32 %v7132_v61, 20.0  ;;  %vm3078_vm7 = vcmp.gt.f32.partialorder %v7132_v61, 20.0 }
 0x47e   : > { %v3094_v47 = vmul.f32 1.442695, %v3062_v39 }
 0x47f   : > { %v2976_v44 = vpop.f32.mrf.mxu1  ;;  %v2950_v23 = vpop.f32.mrf.mxu0 }
 0x480   : > { %v7126_v31 = vadd.f32 %v2976_v44, %v7118_v63  ;;  %v7129_v33 = vadd.f32 %v2950_v23, %v7123_v11  ;;  %4832 = vpow2.f32 %v3094_v47 }
 0x482   : > { %v7135_v48 = vmul.f32 100.0, %v7126_v31  ;;  %v7138_v35 = vmul.f32 100.0, %v7129_v33 }
 0x484   : > { %v3063_v58 = vmin.f32 %v7135_v48, 20.0  ;;  %v3066_v27 = vmin.f32 %v7138_v35, 20.0  ;;  %vm3082_vm1 = vcmp.gt.f32.partialorder %v7138_v35, 20.0  ;;  %v7326_v35 = vld [vmem:[%s8187_s14] sm:$0xff] }
 0x486   : > { %v3096_v40 = vmul.f32 1.442695, %v3063_v58  ;;  %v3102_v46 = vmul.f32 1.442695, %v3066_v27  ;;  %v7171_v32 = vpop.eup %4832 }
 0x487   : > { %v2979_v43 = vpop.f32.mrf.mxu1  ;;  %v2953_v3 = vpop.f32.mrf.mxu0  ;;  %v3129_v52 = vmul.f32 -0.5, %v7171_v32  ;;  %v3126_v21 = vadd.f32 1.0, %v7171_v32  ;;  %v3132_v7 = vand.u32 2147483647, %v7171_v32 }
 0x488   : > { %v7146_v13 = vadd.f32 %v2979_v43, %v7123_v11  ;;  %v7149_v51 = vadd.f32 %v2953_v3, %v7141_v37  ;;  %4834 = vpow2.f32 %v3096_v40 }
 0x489   : > { %4836 = vpow2.f32 %v3102_v46  ;;  %v3130_v28 = vadd.f32 1.0, %v3129_v52  ;;  %vm7238_vm2 = vcmp.lt.f32.partialorder %v3132_v7, 0.0004427343 }
 0x48a   : > { %v7152_v2 = vmul.f32 100.0, %v7149_v51  ;;  %v7155_v24 = vmul.f32 100.0, %v7146_v13 }
 0x48b   : > { %v7203_v58 = vmul.f32 %v7171_v32, %v3130_v28 }
 0x48c   : > { %v3070_v29 = vmin.f32 %v7152_v2, 20.0  ;;  %v3067_v16 = vmin.f32 %v7155_v24, 20.0  ;;  %vm3086_vm15 = vcmp.gt.f32.partialorder %v7152_v2, 20.0  ;;  %vm3083_vm11 = vcmp.gt.f32.partialorder %v7155_v24, 20.0 }
 0x48e   : > { %v3110_v57 = vmul.f32 1.442695, %v3070_v29  ;;  %v3104_v62 = vmul.f32 1.442695, %v3067_v16  ;;  %v7173_v50 = vpop.eup %4834 }
 0x48f   : > { %v2982_v34 = vpop.f32.mrf.mxu1  ;;  %v2956_v19 = vpop.f32.mrf.mxu0  ;;  %v3138_v30 = vmul.f32 -0.5, %v7173_v50  ;;  %v3135_v5 = vadd.f32 1.0, %v7173_v50  ;;  %v3141_v0 = vand.u32 2147483647, %v7173_v50 }
 0x490   : > { %v7160_v14 = vadd.f32 %v2982_v34, %v7141_v37  ;;  %v7163_v9 = vadd.f32 %v2956_v19, %v7116_v22  ;;  %4838 = vpow2.f32 %v3110_v57  ;;  %v7177_v4 = vpop.eup %4836 }
 0x491   : > { %4840 = vpow2.f32 %v3104_v62  ;;  %v3162_v12 = vadd.f32 1.0, %v7177_v4  ;;  %v3139_v10 = vadd.f32 1.0, %v3138_v30  ;;  %v3165_v38 = vmul.f32 -0.5, %v7177_v4 }
 0x492   : > { %v7166_v56 = vmul.f32 100.0, %v7160_v14  ;;  %v7169_v1 = vmul.f32 100.0, %v7163_v9  ;;  %v3168_v39 = vand.u32 2147483647, %v7177_v4  ;;  %vm7280_vm8 = vcmp.lt.f32.partialorder %v3141_v0, 0.0004427343 }
 0x493   : > { %v7213_v40 = vmul.f32 %v7173_v50, %v3139_v10  ;;  %v3166_v16 = vadd.f32 1.0, %v3165_v38 }
 0x494   : > { %v3071_v55 = vmin.f32 %v7166_v56, 20.0  ;;  %v3074_v45 = vmin.f32 %v7169_v1, 20.0  ;;  %vm7223_vm14 = vcmp.lt.f32.partialorder %v3168_v39, 0.0004427343  ;;  %vm3090_vm3 = vcmp.gt.f32.partialorder %v7169_v1, 20.0  ;;  %v7395_v1 = vld [vmem:[%s8187_s14 + $0x10] sm:$0xff] }
 0x495   : > { %vm3087_vm0 = vcmp.gt.f32.partialorder %v7166_v56, 20.0 }
 0x496   : > { %v3112_v25 = vmul.f32 1.442695, %v3071_v55  ;;  %v3118_v18 = vmul.f32 1.442695, %v3074_v45  ;;  %v4839_v15 = vpop.eup %4838 }
 0x497   : > { %v2985_v8 = vpop.f32.mrf.mxu1  ;;  %v3198_v36 = vadd.f32 1.0, %v4839_v15  ;;  %v3201_v49 = vmul.f32 -0.5, %v4839_v15  ;;  %v3204_v6 = vand.u32 2147483647, %v4839_v15  ;;  %v7195_v42 = vpop.eup %4840 }
 0x498   : > { %4842 = vpow2.f32 %v3112_v25  ;;  %v7183_v60 = vadd.f32 %v2985_v8, %v7116_v22 }
 0x499   : > { %4844 = vpow2.f32 %v3118_v18  ;;  %v3005_v26 = vpop.f32.mrf.mxu2  ;;  %v3202_v23 = vadd.f32 1.0, %v3201_v49  ;;  %vm7215_vm12 = vcmp.lt.f32.partialorder %v3204_v6, 0.0004427343 }
 0x49a   : > { %v7188_v54 = vmul.f32 100.0, %v7183_v60  ;;  %4846 = vlog2.f32 %v3198_v36  ;;  %v7191_v53 = vadd.f32 %v3005_v26, %v7118_v63  ;;  %v3174_v36 = vmul.f32 -0.5, %v7195_v42 }
 0x49b   : > { %4848 = vlog2.f32 %v3126_v21  ;;  %v3034_v41 = vpop.f32.mrf.mxu3  ;;  %v3203_v45 = vmul.f32 %v4839_v15, %v3202_v23 }
 0x49c   : > { %v3075_v17 = vmin.f32 %v7188_v54, 20.0  ;;  %4850 = vlog2.f32 %v3135_v5  ;;  %v7206_v3 = vmul.f32 100.0, %v7191_v53  ;;  %v7209_v27 = vadd.f32 %v3034_v41, %v7118_v63 }
 0x49d   : > { %4852 = vlog2.f32 %v3162_v12  ;;  %v3171_v63 = vadd.f32 1.0, %v7195_v42  ;;  %v3167_v5 = vmul.f32 %v7177_v4, %v3166_v16  ;;  %v3177_v12 = vand.u32 2147483647, %v7195_v42 }
 0x49e   : > { %v7199_v59 = vpop.eup %4842  ;;  %v3120_v44 = vmul.f32 1.442695, %v3075_v17  ;;  %v3064_v8 = vmin.f32 %v7206_v3, 20.0  ;;  %v7229_v21 = vmul.f32 100.0, %v7209_v27  ;;  %vm3091_vm13 = vcmp.gt.f32.partialorder %v7188_v54, 20.0 }
 0x49f   : > { %v4845_v43 = vpop.eup %4844  ;;  %v3207_v47 = vadd.f32 1.0, %v7199_v59  ;;  %v3210_v25 = vmul.f32 -0.5, %v7199_v59  ;;  %v3213_v7 = vand.u32 2147483647, %v7199_v59  ;;  %vm7313_vm10 = vcmp.lt.f32.partialorder %v3177_v12, 0.0004427343 }
 0x4a0   : > { %v4847_v46 = vpop.eup %4846  ;;  %4854 = vpow2.f32 %v3120_v44  ;;  %v3234_v29 = vadd.f32 1.0, %v4845_v43  ;;  %v3237_v19 = vmul.f32 -0.5, %v4845_v43  ;;  %v3240_v15 = vand.u32 2147483647, %v4845_v43 }
 0x4a1   : > { %v4849_v34 = vpop.eup %4848  ;;  %v3200_v32 = vmul.f32 0.6931472, %v4847_v46  ;;  %4856 = vlog2.f32 %v3207_v47  ;;  %v3008_v55 = vpop.f32.mrf.mxu2  ;;  %v3211_v41 = vadd.f32 1.0, %v3210_v25  ;;  %v7252_v39 = vmul.f32 1.442695, %v3064_v8 }
 0x4a2   : > { %v7220_v62 = vpop.eup %4850  ;;  %4858 = vlog2.f32 %v3234_v29  ;;  %v7232_v30 = vadd.f32 %v3008_v55, %v7123_v11  ;;  %v3128_v26 = vmul.f32 0.6931472, %v4849_v34  ;;  %v3238_v17 = vadd.f32 1.0, %v3237_v19 }
 0x4a3   : > { %v4853_v52 = vpop.eup %4852  ;;  %v3037_v10 = vpop.f32.mrf.mxu3  ;;  %v3206_v6 = vsel %vm7215_vm12, %v3203_v45, %v3200_v32  ;;  %4860 = vlog2.f32 %v3171_v63  ;;  %vm7259_vm4 = vcmp.lt.f32.partialorder %v3240_v15, 0.0004427343  ;;  %v3175_v55 = vadd.f32 1.0, %v3174_v36 }
 0x4a4   : > { %v7244_v28 = vmul.f32 100.0, %v7232_v30  ;;  %v7249_v4 = vadd.f32 %v3037_v10, %v7123_v11  ;;  %v3164_v44 = vmul.f32 0.6931472, %v4853_v52  ;;  %v3278_v19 = vmul.f32 0.01, %v3206_v6 }
 0x4a5   : > { %v3239_v63 = vmul.f32 %v4845_v43, %v3238_v17  ;;  %v3212_v52 = vmul.f32 %v7199_v59, %v3211_v41  ;;  %vm7266_vm5 = vcmp.lt.f32.partialorder %v3213_v7, 0.0004427343  ;;  %v3176_v50 = vmul.f32 %v7195_v42, %v3175_v55 }
 0x4a6   : > { %v4855_v38 = vpop.eup %4854  ;;  %v3068_v46 = vmin.f32 %v7244_v28, 20.0  ;;  %v7257_v57 = vmul.f32 100.0, %v7249_v4  ;;  %v3170_v15 = vsel %vm7223_vm14, %v3167_v5, %v3164_v44  ;;  %v3294_v41 = vsel %vm3086_vm15, %v7149_v51, %v3278_v19 }
 0x4a7   : > { %v4857_v23 = vpop.eup %4856  ;;  %v3243_v29 = vadd.f32 1.0, %v4855_v38  ;;  %v3246_v11 = vmul.f32 -0.5, %v4855_v38  ;;  %v3249_v17 = vand.u32 2147483647, %v4855_v38  ;;  %v3134_v0 = vsel %vm7238_vm2, %v7203_v58, %v3128_v26 }
 0x4a8   : > { %v4859_v16 = vpop.eup %4858  ;;  %v3069_v45 = vmin.f32 %v7257_v57, 20.0  ;;  %v3106_v6 = vmul.f32 1.442695, %v3068_v46  ;;  %v3209_v36 = vmul.f32 0.6931472, %v4857_v23  ;;  %v8369_v42 = vmin.f32 %v7229_v21, 20.0 }
 0x4a9   : > { %v3236_v32 = vmul.f32 0.6931472, %v4859_v16  ;;  %4862 = vlog2.f32 %v3243_v29  ;;  %v3011_v25 = vpop.f32.mrf.mxu2  ;;  %v4861_v10 = vpop.eup %4860  ;;  %v3247_v5 = vadd.f32 1.0, %v3246_v11  ;;  %v3274_v23 = vmul.f32 0.01, %v3170_v15 }
 0x4aa   : > { %v7273_v47 = vadd.f32 %v3011_v25, %v7141_v37  ;;  %v3108_v46 = vmul.f32 1.442695, %v3069_v45  ;;  %v3173_v51 = vmul.f32 0.6931472, %v4861_v10  ;;  %4864 = vpow2.f32 %v3106_v6 }
 0x4ab   : > { %v3242_v43 = vsel %vm7259_vm4, %v3239_v63, %v3236_v32  ;;  %v3040_v44 = vpop.f32.mrf.mxu3  ;;  %v3215_v11 = vsel %vm7266_vm5, %v3212_v52, %v3209_v36  ;;  %v3270_v19 = vmul.f32 0.01, %v3134_v0  ;;  %v3137_v49 = vmul.f32 0.6931472, %v7220_v62 }
 0x4ac   : > { %v3282_v18 = vmul.f32 0.01, %v3242_v43  ;;  %v7289_v7 = vmul.f32 100.0, %v7273_v47  ;;  %v7296_v29 = vadd.f32 %v3040_v44, %v7141_v37  ;;  %v3248_v37 = vmul.f32 %v4855_v38, %v3247_v5  ;;  %v7372_v44 = vld [vmem:[%s8187_s14 + $0x8] sm:$0xff] }
 0x4ad   : > { %vm3250_vm9 = vcmp.lt.f32.partialorder %v3249_v17, 0.0004427343  ;;  %4866 = vpow2.f32 %v3108_v46  ;;  %v3179_v62 = vsel %vm7313_vm10, %v3176_v50, %v3173_v51  ;;  %v3279_v25 = vmul.f32 0.01, %v3215_v11 }
 0x4ae   : > { %v3298_v2 = vsel %vm3090_vm3, %v7163_v9, %v3282_v18  ;;  %v3072_v34 = vmin.f32 %v7289_v7, 20.0  ;;  %v7305_v58 = vmul.f32 100.0, %v7296_v29  ;;  %v3290_v9 = vsel %vm3082_vm1, %v7129_v33, %v3274_v23 }
 0x4af   : > { %v4863_v16 = vpop.eup %4862  ;;  %3354 = vmatpush.msrb.mxu0 %v3298_v2  ;;  %v3100_v12 = vmul.f32 1.442695, %v8369_v42  ;;  %v3286_v8 = vsel %vm3078_vm7, %v7121_v20, %v3270_v19  ;;  %v3143_v15 = vsel %vm7280_vm8, %v7213_v40, %v3137_v49  ;;  %v3275_v43 = vmul.f32 0.01, %v3179_v62 }
 0x4b0   : > { %v3245_v26 = vmul.f32 0.6931472, %v4863_v16  ;;  %v3114_v32 = vmul.f32 1.442695, %v3072_v34  ;;  %v3073_v63 = vmin.f32 %v7305_v58, 20.0  ;;  %v7336_v10 = vpop.eup %4864  ;;  %v3295_v61 = vsel %vm3087_vm0, %v7160_v14, %v3279_v25 }
 0x4b1   : > { %3355 = vmatpush.msrb.mxu0 %v3294_v41  ;;  %v3014_v38 = vpop.f32.mrf.mxu2  ;;  %v3271_v54 = vmul.f32 0.01, %v3143_v15  ;;  %v3291_v59 = vsel %vm3083_vm11, %v7146_v13, %v3275_v43  ;;  %vm3079_vm12 = vcmp.gt.f32.partialorder %v7135_v48, 20.0  ;;  %v3183_v48 = vmul.f32 -0.5, %v7336_v10 }
 0x4b2   : > { %v3251_v55 = vsel %vm3250_vm9, %v3248_v37, %v3245_v26  ;;  %4868 = vpow2.f32 %v3114_v32  ;;  %v7321_v33 = vadd.f32 %v3014_v38, %v7116_v22  ;;  %v3116_v52 = vmul.f32 1.442695, %v3073_v63 }
 0x4b3   : > { %v3283_v45 = vmul.f32 0.01, %v3251_v55  ;;  %3356 = vmatpush.msrb.mxu0 %v3290_v9  ;;  %4870 = vpow2.f32 %v7252_v39  ;;  %v3043_v18 = vpop.f32.mrf.mxu3  ;;  %v7353_v40 = vpop.eup %4866  ;;  %v3287_v24 = vsel %vm3079_vm12, %v7126_v31, %v3271_v54  ;;  %v3186_v2 = vand.u32 2147483647, %v7336_v10 }
 0x4b4   : > { %v7343_v36 = vmul.f32 100.0, %v7321_v33  ;;  %4872 = vpow2.f32 %v3116_v52  ;;  %v7347_v20 = vadd.f32 %v3043_v18, %v7116_v22  ;;  %v3180_v22 = vadd.f32 1.0, %v7336_v10 }
 0x4b5   : > { %v3299_v6 = vsel %vm3091_vm13, %v7183_v60, %v3283_v45  ;;  %3357 = vmatpush.msrb.mxu0 %v3286_v8  ;;  %4874 = vpow2.f32 %v3100_v12  ;;  %v3189_v13 = vadd.f32 1.0, %v7353_v40  ;;  %v3184_v16 = vadd.f32 1.0, %v3183_v48 }
 0x4b6   : > { %3383 = vmatpush.msrb.mxu1 %v3299_v6  ;;  %4427 = vmatmul.msk.f32.vlgmr.msrb.gmra.mxu0 %vm1092_vm6, %v7326_v35  ;;  %v3076_v60 = vmin.f32 %v7343_v36, 20.0  ;;  %v7357_v39 = vmul.f32 100.0, %v7347_v20  ;;  %v3192_v11 = vmul.f32 -0.5, %v7353_v40  ;;  %vm7398_vm14 = vcmp.lt.f32.partialorder %v3186_v2, 0.0004427343  ;;  %v7426_v2 = vld [vmem:[%s8187_s14 + $0x18] sm:$0xff] }
 0x4b7   : > { %v3185_v25 = vmul.f32 %v7336_v10, %v3184_v16  ;;  %v3195_v42 = vand.u32 2147483647, %v7353_v40  ;;  %vm3092_vm15 = vcmp.gt.f32.partialorder %v7343_v36, 20.0  ;;  %vm3088_vm3 = vcmp.gt.f32.partialorder %v7289_v7, 20.0 }
 0x4b8   : > { %3384 = vmatpush.msrb.mxu1 %v3295_v61  ;;  %v7360_v56 = vpop.eup %4868  ;;  %v3122_v5 = vmul.f32 1.442695, %v3076_v60  ;;  %v3077_v14 = vmin.f32 %v7357_v39, 20.0  ;;  %v3193_v15 = vadd.f32 1.0, %v3192_v11  ;;  %vm3093_vm9 = vcmp.gt.f32.partialorder %v7357_v39, 20.0 }
 0x4b9   : > { %v3216_v17 = vadd.f32 1.0, %v7360_v56  ;;  %v7366_v41 = vpop.eup %4870  ;;  %v3219_v51 = vmul.f32 -0.5, %v7360_v56  ;;  %v3222_v55 = vand.u32 2147483647, %v7360_v56  ;;  %vm7445_vm8 = vcmp.lt.f32.partialorder %v3195_v42, 0.0004427343 }
 0x4ba   : > { %3385 = vmatpush.msrb.mxu1 %v3291_v59  ;;  %4876 = vpow2.f32 %v3122_v5  ;;  %v7375_v23 = vpop.eup %4872  ;;  %v3124_v50 = vmul.f32 1.442695, %v3077_v14  ;;  %v3144_v46 = vadd.f32 1.0, %v7366_v41  ;;  %v3147_v32 = vmul.f32 -0.5, %v7366_v41 }
 0x4bb   : > { %4878 = vlog2.f32 %v3180_v22  ;;  %v3225_v31 = vadd.f32 1.0, %v7375_v23  ;;  %v7381_v0 = vpop.eup %4874  ;;  %v3228_v49 = vmul.f32 -0.5, %v7375_v23  ;;  %v3220_v45 = vadd.f32 1.0, %v3219_v51 }
 0x4bc   : > { %3386 = vmatpush.msrb.mxu1 %v3287_v24  ;;  %4880 = vlog2.f32 %v3216_v17  ;;  %v3153_v19 = vadd.f32 1.0, %v7381_v0  ;;  %v3231_v8 = vand.u32 2147483647, %v7375_v23  ;;  %v3148_v60 = vadd.f32 1.0, %v3147_v32 }
 0x4bd   : > { %4431 = vmatmul.msk.f32.vlgmr.msrb.gmra.mxu1 %vm1092_vm6, %v7326_v35  ;;  %4882 = vpow2.f32 %v3124_v50  ;;  %v3229_v61 = vadd.f32 1.0, %v3228_v49  ;;  %vm7410_vm2 = vcmp.lt.f32.partialorder %v3222_v55, 0.0004427343  ;;  %v3221_v14 = vmul.f32 %v7360_v56, %v3220_v45 }
 0x4be   : > { %4428 = vmatmul.msk.f32.gmra.mxu0 %vm1092_vm6, %v7372_v44  ;;  %4884 = vlog2.f32 %v3189_v13  ;;  %v3150_v17 = vand.u32 2147483647, %v7366_v41  ;;  %v3156_v24 = vmul.f32 -0.5, %v7381_v0  ;;  %vm7418_vm4 = vcmp.lt.f32.partialorder %v3231_v8, 0.0004427343 }
 0x4bf   : > { %4886 = vlog2.f32 %v3225_v31  ;;  %v3194_v31 = vmul.f32 %v7353_v40, %v3193_v15  ;;  %v3230_v16 = vmul.f32 %v7375_v23, %v3229_v61  ;;  %v3149_v11 = vmul.f32 %v7366_v41, %v3148_v60 }
 0x4c0   : > { %v4877_v34 = vpop.eup %4876  ;;  %4888 = vlog2.f32 %v3144_v46  ;;  %vm7434_vm5 = vcmp.lt.f32.partialorder %v3150_v17, 0.0004427343  ;;  %v3159_v45 = vand.u32 2147483647, %v7381_v0  ;;  %vm3084_vm10 = vcmp.gt.f32.partialorder %v7244_v28, 20.0  ;;  %v7521_v17 = vpop.permute.xlu1 %3322 }
 0x4c1   : > { %v4879_v26 = vpop.eup %4878  ;;  %v3252_v37 = vadd.f32 1.0, %v4877_v34  ;;  %v3255_v63 = vmul.f32 -0.5, %v4877_v34  ;;  %v3258_v5 = vand.u32 2147483647, %v4877_v34  ;;  %vm3089_vm0 = vcmp.gt.f32.partialorder %v7305_v58, 20.0 }
 0x4c2   : > { %v4881_v9 = vpop.eup %4880  ;;  %v3182_v22 = vmul.f32 0.6931472, %v4879_v26  ;;  %vm7457_vm13 = vcmp.lt.f32.partialorder %v3159_v45, 0.0004427343  ;;  %vm3080_vm11 = vcmp.gt.f32.partialorder %v7206_v3, 20.0  ;;  %vm3085_vm12 = vcmp.gt.f32.partialorder %v7257_v57, 20.0  ;;  %v7503_v57 = vpop.permute.xlu2 %3317 }
 0x4c3   : > { %v4883_v38 = vpop.eup %4882  ;;  %4890 = vlog2.f32 %v3252_v37  ;;  %v3218_v18 = vmul.f32 0.6931472, %v4881_v9  ;;  %v3256_v10 = vadd.f32 1.0, %v3255_v63  ;;  %vm3259_vm1 = vcmp.lt.f32.partialorder %v3258_v5, 0.0004427343 }
 0x4c4   : > { %v4885_v12 = vpop.eup %4884  ;;  %v3261_v52 = vadd.f32 1.0, %v4883_v38  ;;  %4892 = vlog2.f32 %v3153_v19  ;;  %v3264_v43 = vmul.f32 -0.5, %v4883_v38  ;;  %v3267_v49 = vand.u32 2147483647, %v4883_v38 }
 0x4c5   : > { %4432 = vmatmul.msk.f32.gmra.mxu1 %vm1092_vm6, %v7372_v44  ;;  %v4887_v6 = vpop.eup %4886  ;;  %v3191_v48 = vmul.f32 0.6931472, %v4885_v12  ;;  %v3224_v51 = vsel %vm7410_vm2, %v3221_v14, %v3218_v18  ;;  %v3257_v37 = vmul.f32 %v4877_v34, %v3256_v10  ;;  %v3188_v40 = vsel %vm7398_vm14, %v3185_v25, %v3182_v22 }
 0x4c6   : > { %4429 = vmatmul.msk.f32.gmra.mxu0 %vm1092_vm6, %v7395_v1  ;;  %4894 = vlog2.f32 %v3261_v52  ;;  %v4889_v59 = vpop.eup %4888  ;;  %v3227_v13 = vmul.f32 0.6931472, %v4887_v6  ;;  %v3265_v56 = vadd.f32 1.0, %v3264_v43  ;;  %v3157_v63 = vadd.f32 1.0, %v3156_v24 }
 0x4c7   : > { %v3146_v32 = vmul.f32 0.6931472, %v4889_v59  ;;  %v3280_v41 = vmul.f32 0.01, %v3224_v51  ;;  %vm3268_vm7 = vcmp.lt.f32.partialorder %v3267_v49, 0.0004427343  ;;  %v3197_v61 = vsel %vm7445_vm8, %v3194_v31, %v3191_v48 }
 0x4c8   : > { %v3233_v34 = vsel %vm7418_vm4, %v3230_v16, %v3227_v13  ;;  %v3266_v12 = vmul.f32 %v4883_v38, %v3265_v56  ;;  %v3276_v8 = vmul.f32 0.01, %v3188_v40  ;;  %v3158_v38 = vmul.f32 %v7381_v0, %v3157_v63 }
 0x4c9   : > { %v4891_v46 = vpop.eup %4890  ;;  %v3152_v6 = vsel %vm7434_vm5, %v3149_v11, %v3146_v32  ;;  %v3281_v10 = vmul.f32 0.01, %v3233_v34  ;;  %v3296_v36 = vsel %vm3088_vm3, %v7273_v47, %v3280_v41  ;;  %v3277_v0 = vmul.f32 0.01, %v3197_v61 }
 0x4ca   : > { %v4893_v19 = vpop.eup %4892  ;;  %v3254_v26 = vmul.f32 0.6931472, %v4891_v46  ;;  %v3292_v59 = vsel %vm3084_vm10, %v7232_v30, %v3276_v8  ;;  %vm3081_vm14 = vcmp.gt.f32.partialorder %v7229_v21, 20.0 }
 0x4cb   : > { %v3155_v52 = vmul.f32 0.6931472, %v4893_v19  ;;  %v3297_v47 = vsel %vm3089_vm0, %v7296_v29, %v3281_v10 }
 0x4cc   : > { %v4895_v55 = vpop.eup %4894  ;;  %v3260_v23 = vsel %vm3259_vm1, %v3257_v37, %v3254_v26 }
 0x4cd   : > { %4433 = vmatmul.msk.f32.gmra.mxu1 %vm1092_vm6, %v7395_v1  ;;  %v3284_v62 = vmul.f32 0.01, %v3260_v23  ;;  %v3263_v25 = vmul.f32 0.6931472, %v4895_v55  ;;  %v3161_v54 = vsel %vm7457_vm13, %v3158_v38, %v3155_v52 }
 0x4ce   : > { %4430 = vmatmul.msk.f32.gmra.mxu0 %vm1092_vm6, %v7426_v2  ;;  %v3273_v7 = vmul.f32 0.01, %v3161_v54 }
 0x4cf   : > { %v3300_v43 = vsel %vm3092_vm15, %v7321_v33, %v3284_v62  ;;  %v3269_v18 = vsel %vm3268_vm7, %v3266_v12, %v3263_v25  ;;  %v3272_v33 = vmul.f32 0.01, %v3152_v6 }
 0x4d0   : > { %3412 = vmatpush.msrb.mxu2 %v3300_v43  ;;  %v3285_v60 = vmul.f32 0.01, %v3269_v18  ;;  %v3289_v30 = vsel %vm3081_vm14, %v7209_v27, %v3273_v7 }
 0x4d1   : > { %v3288_v28 = vsel %vm3080_vm11, %v7191_v53, %v3272_v33  ;;  %v7496_v53 = vpop.permute.xlu0 %3327 }
 0x4d2   : > { %v3301_v22 = vsel %vm3093_vm9, %v7347_v20, %v3285_v60  ;;  %3413 = vmatpush.msrb.mxu2 %v3296_v36  ;;  %v3293_v20 = vsel %vm3085_vm12, %v7249_v4, %v3277_v0 }
 0x4d3   : > { %3441 = vmatpush.msrb.mxu3 %v3301_v22 }
 0x4d4   : > { %3414 = vmatpush.msrb.mxu2 %v3292_v59 }
 0x4d5   : > { %4434 = vmatmul.msk.f32.gmra.mxu1 %vm1092_vm6, %v7426_v2  ;;  %3442 = vmatpush.msrb.mxu3 %v3297_v47 }
 0x4d6   : > { %3415 = vmatpush.msrb.mxu2 %v3288_v28 }
 0x4d7   : > { %3443 = vmatpush.msrb.mxu3 %v3293_v20  ;;  %4435 = vmatmul.msk.f32.vlgmr.msrb.gmra.mxu2 %vm1092_vm6, %v7326_v35 }
 0x4d9   : > { %3444 = vmatpush.msrb.mxu3 %v3289_v30  ;;  %v7498_v27 = vpop.permute.xlu0 %3312 }
 0x4da   : > { %4439 = vmatmul.msk.f32.vlgmr.msrb.gmra.mxu3 %vm1092_vm6, %v7326_v35 }
 0x4df   : > { %4436 = vmatmul.msk.f32.gmra.mxu2 %vm1092_vm6, %v7372_v44 }
 0x4e2   : > { %4440 = vmatmul.msk.f32.gmra.mxu3 %vm1092_vm6, %v7372_v44 }
 0x4e7   : > { %4437 = vmatmul.msk.f32.gmra.mxu2 %vm1092_vm6, %v7395_v1 }
 0x4ea   : > { %4441 = vmatmul.msk.f32.gmra.mxu3 %vm1092_vm6, %v7395_v1 }
 0x4ef   : > { %4438 = vmatmul.msk.f32.gmra.mxu2 %vm1092_vm6, %v7426_v2 }
 0x4f2   : > { %4442 = vmatmul.msk.f32.gmra.mxu3 %vm1092_vm6, %v7426_v2 }
 0x533   : > { %v3359_v3 = vpop.f32.mrf.mxu0 }
 0x534   : > { %v7501_v21 = vadd.f32 %v3359_v3, %v7498_v27 }
 0x536   : > { %v7512_v39 = vmul.f32 100.0, %v7501_v21 }
 0x538   : > { %v3474_v5 = vmin.f32 %v7512_v39, 20.0  ;;  %vm3490_vm8 = vcmp.gt.f32.partialorder %v7512_v39, 20.0 }
 0x53a   : > { %v3388_v4 = vpop.f32.mrf.mxu1  ;;  %v3506_v46 = vmul.f32 1.442695, %v3474_v5 }
 0x53b   : > { %v3362_v29 = vpop.f32.mrf.mxu0  ;;  %v7509_v35 = vadd.f32 %v3388_v4, %v7498_v27 }
 0x53c   : > { %v7506_v58 = vadd.f32 %v3362_v29, %v7503_v57  ;;  %4896 = vpow2.f32 %v3506_v46 }
 0x53d   : > { %v7518_v1 = vmul.f32 100.0, %v7509_v35 }
 0x53e   : > { %v7515_v44 = vmul.f32 100.0, %v7506_v58 }
 0x53f   : > { %v3475_v31 = vmin.f32 %v7518_v1, 20.0 }
 0x540   : > { %v3478_v24 = vmin.f32 %v7515_v44, 20.0  ;;  %vm3494_vm5 = vcmp.gt.f32.partialorder %v7515_v44, 20.0 }
 0x541   : > { %v3508_v11 = vmul.f32 1.442695, %v3475_v31 }
 0x542   : > { %v3391_v14 = vpop.f32.mrf.mxu1  ;;  %v3514_v51 = vmul.f32 1.442695, %v3478_v24  ;;  %v4897_v41 = vpop.eup %4896 }
 0x543   : > { %v7525_v13 = vadd.f32 %v3391_v14, %v7503_v57  ;;  %v3365_v50 = vpop.f32.mrf.mxu0  ;;  %v3538_v43 = vadd.f32 1.0, %v4897_v41  ;;  %v3541_v38 = vmul.f32 -0.5, %v4897_v41  ;;  %v3544_v28 = vand.u32 2147483647, %v4897_v41 }
 0x544   : > { %v7528_v48 = vadd.f32 %v3365_v50, %v7521_v17  ;;  %4898 = vpow2.f32 %v3514_v51 }
 0x545   : > { %v7532_v2 = vmul.f32 100.0, %v7525_v13  ;;  %v3542_v7 = vadd.f32 1.0, %v3541_v38  ;;  %vm7578_vm2 = vcmp.lt.f32.partialorder %v3544_v28, 0.0004427343 }
 0x546   : > { %v7535_v56 = vmul.f32 100.0, %v7528_v48 }
 0x547   : > { %v3479_v19 = vmin.f32 %v7532_v2, 20.0  ;;  %vm3495_vm14 = vcmp.gt.f32.partialorder %v7532_v2, 20.0  ;;  %v7712_v2 = vld [vmem:[%s8189_s16 + $0x8] sm:$0xff] }
 0x548   : > { %v3482_v16 = vmin.f32 %v7535_v56, 20.0  ;;  %vm3498_vm1 = vcmp.gt.f32.partialorder %v7535_v56, 20.0 }
 0x549   : > { %v3516_v63 = vmul.f32 1.442695, %v3479_v19 }
 0x54a   : > { %v3522_v26 = vmul.f32 1.442695, %v3482_v16  ;;  %v3394_v37 = vpop.f32.mrf.mxu1  ;;  %v4899_v45 = vpop.eup %4898 }
 0x54b   : > { %v7540_v49 = vadd.f32 %v3394_v37, %v7521_v17  ;;  %v3368_v32 = vpop.f32.mrf.mxu0  ;;  %v3574_v61 = vadd.f32 1.0, %v4899_v45  ;;  %v3577_v54 = vmul.f32 -0.5, %v4899_v45  ;;  %v3580_v50 = vand.u32 2147483647, %v4899_v45 }
 0x54c   : > { %4900 = vpow2.f32 %v3522_v26  ;;  %v7543_v40 = vadd.f32 %v3368_v32, %v7496_v53  ;;  %v7576_v32 = vmul.f32 %v4897_v41, %v3542_v7 }
 0x54d   : > { %4902 = vpow2.f32 %v3508_v11  ;;  %v7546_v9 = vmul.f32 100.0, %v7540_v49  ;;  %v3578_v24 = vadd.f32 1.0, %v3577_v54  ;;  %vm7586_vm4 = vcmp.lt.f32.partialorder %v3580_v50, 0.0004427343 }
 0x54e   : > { %v7549_v55 = vmul.f32 100.0, %v7543_v40  ;;  %4904 = vpow2.f32 %v3516_v63 }
 0x54f   : > { %v3483_v23 = vmin.f32 %v7546_v9, 20.0  ;;  %vm3499_vm12 = vcmp.gt.f32.partialorder %v7546_v9, 20.0 }
 0x550   : > { %v3486_v34 = vmin.f32 %v7549_v55, 20.0  ;;  %vm3502_vm3 = vcmp.gt.f32.partialorder %v7549_v55, 20.0 }
 0x551   : > { %v3524_v62 = vmul.f32 1.442695, %v3483_v23 }
 0x552   : > { %v4901_v25 = vpop.eup %4900  ;;  %v3530_v12 = vmul.f32 1.442695, %v3486_v34  ;;  %v3397_v52 = vpop.f32.mrf.mxu1 }
 0x553   : > { %v7553_v8 = vpop.eup %4902  ;;  %4906 = vpow2.f32 %v3524_v62  ;;  %v7556_v15 = vadd.f32 %v3397_v52, %v7496_v53  ;;  %v3610_v6 = vadd.f32 1.0, %v4901_v25  ;;  %v3613_v33 = vmul.f32 -0.5, %v4901_v25 }
 0x554   : > { %4908 = vpow2.f32 %v3530_v12  ;;  %v3547_v60 = vadd.f32 1.0, %v7553_v8  ;;  %v3550_v42 = vmul.f32 -0.5, %v7553_v8  ;;  %v7564_v36 = vpop.eup %4904  ;;  %v3616_v3 = vand.u32 2147483647, %v4901_v25 }
 0x555   : > { %v7559_v18 = vmul.f32 100.0, %v7556_v15  ;;  %4910 = vlog2.f32 %v3610_v6  ;;  %v3614_v14 = vadd.f32 1.0, %v3613_v33  ;;  %v3583_v31 = vadd.f32 1.0, %v7564_v36 }
 0x556   : > { %4912 = vlog2.f32 %v3538_v43  ;;  %v3551_v4 = vadd.f32 1.0, %v3550_v42  ;;  %v3553_v11 = vand.u32 2147483647, %v7553_v8  ;;  %vm7572_vm15 = vcmp.lt.f32.partialorder %v3616_v3, 0.0004427343 }
 0x557   : > { %v3487_v10 = vmin.f32 %v7559_v18, 20.0  ;;  %4914 = vlog2.f32 %v3574_v61  ;;  %v3615_v12 = vmul.f32 %v4901_v25, %v3614_v14  ;;  %v3579_v52 = vmul.f32 %v4899_v45, %v3578_v24 }
 0x558   : > { %4916 = vlog2.f32 %v3547_v60  ;;  %v7583_v23 = vmul.f32 %v7553_v8, %v3551_v4  ;;  %v3586_v8 = vmul.f32 -0.5, %v7564_v36  ;;  %v3589_v45 = vand.u32 2147483647, %v7564_v36 }
 0x559   : > { %v7566_v22 = vpop.eup %4906  ;;  %v3532_v0 = vmul.f32 1.442695, %v3487_v10  ;;  %vm7622_vm13 = vcmp.lt.f32.partialorder %v3553_v11, 0.0004427343  ;;  %vm3503_vm11 = vcmp.gt.f32.partialorder %v7559_v18, 20.0 }
 0x55a   : > { %v4909_v59 = vpop.eup %4908  ;;  %v3619_v47 = vadd.f32 1.0, %v7566_v22  ;;  %v3417_v20 = vpop.f32.mrf.mxu2  ;;  %v3622_v16 = vmul.f32 -0.5, %v7566_v22  ;;  %v3625_v54 = vand.u32 2147483647, %v7566_v22  ;;  %vm7662_vm0 = vcmp.lt.f32.partialorder %v3589_v45, 0.0004427343 }
 0x55b   : > { %4918 = vpow2.f32 %v3532_v0  ;;  %v3646_v30 = vadd.f32 1.0, %v4909_v59  ;;  %v4911_v29 = vpop.eup %4910  ;;  %v3649_v5 = vmul.f32 -0.5, %v4909_v59  ;;  %v7593_v41 = vadd.f32 %v3417_v20, %v7498_v27 }
 0x55c   : > { %v4913_v46 = vpop.eup %4912  ;;  %v3612_v26 = vmul.f32 0.6931472, %v4911_v29  ;;  %v3652_v61 = vand.u32 2147483647, %v4909_v59  ;;  %v3623_v60 = vadd.f32 1.0, %v3622_v16  ;;  %v3587_v29 = vadd.f32 1.0, %v3586_v8 }
 0x55d   : > { %4920 = vlog2.f32 %v3646_v30  ;;  %v3446_v51 = vpop.f32.mrf.mxu3  ;;  %v4915_v19 = vpop.eup %4914  ;;  %v3650_v62 = vadd.f32 1.0, %v3649_v5  ;;  %v3540_v0 = vmul.f32 0.6931472, %v4913_v46  ;;  %v7610_v4 = vmul.f32 100.0, %v7593_v41 }
 0x55e   : > { %4922 = vlog2.f32 %v3619_v47  ;;  %v4917_v34 = vpop.eup %4916  ;;  %v3576_v25 = vmul.f32 0.6931472, %v4915_v19  ;;  %v3618_v33 = vsel %vm7572_vm15, %v3615_v12, %v3612_v26  ;;  %vm3653_vm7 = vcmp.lt.f32.partialorder %v3652_v61, 0.0004427343 }
 0x55f   : > { %4924 = vlog2.f32 %v3583_v31  ;;  %v7602_v47 = vmul.f32 0.6931472, %v4917_v34  ;;  %v3651_v30 = vmul.f32 %v4909_v59, %v3650_v62  ;;  %v3624_v50 = vmul.f32 %v7566_v22, %v3623_v60 }
 0x560   : > { %v3582_v59 = vsel %vm7586_vm4, %v3579_v52, %v3576_v25  ;;  %v3690_v19 = vmul.f32 0.01, %v3618_v33  ;;  %v7627_v34 = vadd.f32 %v3446_v51, %v7498_v27  ;;  %v3546_v12 = vsel %vm7578_vm2, %v7576_v32, %v3540_v0 }
 0x561   : > { %v7590_v43 = vpop.eup %4918  ;;  %v3686_v6 = vmul.f32 0.01, %v3582_v59  ;;  %v3476_v27 = vmin.f32 %v7610_v4, 20.0  ;;  %vm7641_vm9 = vcmp.lt.f32.partialorder %v3625_v54, 0.0004427343  ;;  %v3588_v32 = vmul.f32 %v7564_v36, %v3587_v29 }
 0x562   : > { %v3655_v38 = vadd.f32 1.0, %v7590_v43  ;;  %v3420_v42 = vpop.f32.mrf.mxu2  ;;  %v3658_v3 = vmul.f32 -0.5, %v7590_v43  ;;  %v3661_v52 = vand.u32 2147483647, %v7590_v43  ;;  %v3682_v60 = vmul.f32 0.01, %v3546_v12 }
 0x563   : > { %v4921_v10 = vpop.eup %4920  ;;  %v7605_v28 = vadd.f32 %v3420_v42, %v7503_v57  ;;  %v7657_v36 = vmul.f32 100.0, %v7627_v34  ;;  %vm3491_vm15 = vcmp.gt.f32.partialorder %v7518_v1, 20.0 }
 0x564   : > { %v4923_v7 = vpop.eup %4922  ;;  %v3648_v20 = vmul.f32 0.6931472, %v4921_v10  ;;  %4926 = vlog2.f32 %v3655_v38  ;;  %v3659_v62 = vadd.f32 1.0, %v3658_v3  ;;  %vm3662_vm10 = vcmp.lt.f32.partialorder %v3661_v52, 0.0004427343 }
 0x565   : > { %v7613_v5 = vmul.f32 100.0, %v7605_v28  ;;  %v3449_v14 = vpop.f32.mrf.mxu3  ;;  %v4925_v31 = vpop.eup %4924  ;;  %v3621_v26 = vmul.f32 0.6931472, %v4923_v7  ;;  %v3698_v3 = vsel %vm3490_vm8, %v7501_v21, %v3682_v60  ;;  %v3510_v21 = vmul.f32 1.442695, %v3476_v27 }
 0x566   : > { %v3654_v24 = vsel %vm3653_vm7, %v3651_v30, %v3648_v20  ;;  %v7620_v46 = vadd.f32 %v3449_v14, %v7503_v57  ;;  %v3585_v61 = vmul.f32 0.6931472, %v4925_v31  ;;  %v3660_v42 = vmul.f32 %v7590_v43, %v3659_v62  ;;  %v7674_v30 = vld [vmem:[%s8189_s16] sm:$0xff] }
 0x567   : > { %v3694_v16 = vmul.f32 0.01, %v3654_v24  ;;  %v3480_v22 = vmin.f32 %v7613_v5, 20.0  ;;  %v3627_v55 = vsel %vm7641_vm9, %v3624_v50, %v3621_v26  ;;  %v3555_v14 = vsel %vm7622_vm13, %v7583_v23, %v7602_v47 }
 0x568   : > { %v7634_v57 = vmul.f32 100.0, %v7620_v46  ;;  %v3691_v0 = vmul.f32 0.01, %v3627_v55  ;;  %v3591_v20 = vsel %vm7662_vm0, %v3588_v32, %v3585_v61  ;;  %v3477_v24 = vmin.f32 %v7657_v36, 20.0 }
 0x569   : > { %v3710_v11 = vsel %vm3502_vm3, %v7543_v40, %v3694_v16  ;;  %v3706_v40 = vsel %vm3498_vm1, %v7528_v48, %v3690_v19  ;;  %v3518_v25 = vmul.f32 1.442695, %v3480_v22  ;;  %v3702_v48 = vsel %vm3494_vm5, %v7506_v58, %v3686_v6 }
 0x56a   : > { %3766 = vmatpush.msra.mxu0 %v3710_v11  ;;  %v4927_v63 = vpop.eup %4926  ;;  %v3481_v8 = vmin.f32 %v7634_v57, 20.0  ;;  %v3423_v38 = vpop.f32.mrf.mxu2  ;;  %v3687_v39 = vmul.f32 0.01, %v3591_v20  ;;  %v3707_v59 = vsel %vm3499_vm12, %v7540_v49, %v3691_v0  ;;  %v3683_v47 = vmul.f32 0.01, %v3555_v14 }
 0x56b   : > { %v3657_v10 = vmul.f32 0.6931472, %v4927_v63  ;;  %v7654_v33 = vadd.f32 %v3423_v38, %v7521_v17  ;;  %4928 = vpow2.f32 %v3518_v25  ;;  %v3512_v16 = vmul.f32 1.442695, %v3477_v24  ;;  %v7738_v63 = vld [vmem:[%s8189_s16 + $0x10] sm:$0xff] }
 0x56c   : > { %3767 = vmatpush.msra.mxu0 %v3706_v40  ;;  %v3520_v58 = vmul.f32 1.442695, %v3481_v8  ;;  %v3703_v26 = vsel %vm3495_vm14, %v7525_v13, %v3687_v39  ;;  %v3699_v22 = vsel %vm3491_vm15, %v7509_v35, %v3683_v47  ;;  %vm3492_vm14 = vcmp.gt.f32.partialorder %v7610_v4, 20.0 }
 0x56d   : > { %v3663_v54 = vsel %vm3662_vm10, %v3660_v42, %v3657_v10  ;;  %v7667_v43 = vmul.f32 100.0, %v7654_v33  ;;  %v3452_v7 = vpop.f32.mrf.mxu3  ;;  %vm3497_vm15 = vcmp.gt.f32.partialorder %v7634_v57, 20.0 }
 0x56e   : > { %3768 = vmatpush.msra.mxu0 %v3702_v48  ;;  %v3695_v44 = vmul.f32 0.01, %v3663_v54  ;;  %v7677_v45 = vadd.f32 %v3452_v7, %v7521_v17  ;;  %4930 = vpow2.f32 %v3520_v58 }
 0x56f   : > { %v3484_v29 = vmin.f32 %v7667_v43, 20.0  ;;  %vm3500_vm1 = vcmp.gt.f32.partialorder %v7667_v43, 20.0 }
 0x570   : > { %3769 = vmatpush.msra.mxu0 %v3698_v3  ;;  %v3711_v17 = vsel %vm3503_vm11, %v7556_v15, %v3695_v44  ;;  %v7691_v50 = vmul.f32 100.0, %v7677_v45  ;;  %vm3496_vm11 = vcmp.gt.f32.partialorder %v7613_v5, 20.0  ;;  %v7843_v5 = vpop.permute.xlu0 %3729 }
 0x571   : > { %4443 = vmatmul.msk.f32.vlgmr.msra.gmra.mxu0 %vm1092_vm6, %v7674_v30  ;;  %3795 = vmatpush.msra.mxu1 %v3711_v17  ;;  %v3526_v18 = vmul.f32 1.442695, %v3484_v29  ;;  %v7703_v9 = vpop.eup %4928 }
 0x572   : > { %v3485_v23 = vmin.f32 %v7691_v50, 20.0  ;;  %v3426_v31 = vpop.f32.mrf.mxu2  ;;  %v3592_v35 = vadd.f32 1.0, %v7703_v9  ;;  %v3595_v38 = vmul.f32 -0.5, %v7703_v9  ;;  %v3598_v25 = vand.u32 2147483647, %v7703_v9 }
 0x573   : > { %3796 = vmatpush.msra.mxu1 %v3707_v59  ;;  %4932 = vpow2.f32 %v3526_v18  ;;  %v7700_v15 = vadd.f32 %v3426_v31, %v7496_v53  ;;  %v7763_v18 = vld [vmem:[%s8189_s16 + $0x18] sm:$0xff]  ;;  %vm3501_vm12 = vcmp.gt.f32.partialorder %v7691_v50, 20.0  ;;  %v7856_v50 = vpop.permute.xlu2 %3734 }
 0x574   : > { %v3528_v19 = vmul.f32 1.442695, %v3485_v23  ;;  %4934 = vpow2.f32 %v3510_v21  ;;  %v7719_v12 = vpop.eup %4930  ;;  %v3596_v3 = vadd.f32 1.0, %v3595_v38  ;;  %vm7755_vm2 = vcmp.lt.f32.partialorder %v3598_v25, 0.0004427343 }
 0x575   : > { %3797 = vmatpush.msra.mxu1 %v3703_v26  ;;  %v7707_v49 = vmul.f32 100.0, %v7700_v15  ;;  %v3455_v37 = vpop.f32.mrf.mxu3  ;;  %v3601_v51 = vadd.f32 1.0, %v7719_v12  ;;  %v3604_v42 = vmul.f32 -0.5, %v7719_v12  ;;  %v3607_v39 = vand.u32 2147483647, %v7719_v12 }
 0x576   : > { %4936 = vpow2.f32 %v3528_v19  ;;  %v7716_v13 = vadd.f32 %v3455_v37, %v7496_v53 }
 0x577   : > { %3798 = vmatpush.msra.mxu1 %v3699_v22  ;;  %v3488_v62 = vmin.f32 %v7707_v49, 20.0  ;;  %4938 = vpow2.f32 %v3512_v16  ;;  %v3605_v47 = vadd.f32 1.0, %v3604_v42  ;;  %vm3504_vm3 = vcmp.gt.f32.partialorder %v7707_v49, 20.0 }
 0x578   : > { %4447 = vmatmul.msk.f32.vlgmr.msra.gmra.mxu1 %vm1092_vm6, %v7674_v30  ;;  %v7724_v1 = vmul.f32 100.0, %v7716_v13  ;;  %vm7796_vm9 = vcmp.lt.f32.partialorder %v3607_v39, 0.0004427343 }
 0x579   : > { %4444 = vmatmul.msk.f32.gmra.mxu0 %vm1092_vm6, %v7712_v2  ;;  %v4933_v11 = vpop.eup %4932  ;;  %v3534_v53 = vmul.f32 1.442695, %v3488_v62  ;;  %v3606_v38 = vmul.f32 %v7719_v12, %v3605_v47 }
 0x57a   : > { %v3489_v52 = vmin.f32 %v7724_v1, 20.0  ;;  %v3628_v6 = vadd.f32 1.0, %v4933_v11  ;;  %v7730_v27 = vpop.eup %4934  ;;  %v3631_v60 = vmul.f32 -0.5, %v4933_v11  ;;  %v3634_v44 = vand.u32 2147483647, %v4933_v11 }
 0x57b   : > { %4940 = vpow2.f32 %v3534_v53  ;;  %v3556_v55 = vadd.f32 1.0, %v7730_v27  ;;  %v3559_v7 = vmul.f32 -0.5, %v7730_v27  ;;  %v3562_v29 = vand.u32 2147483647, %v7730_v27 }
 0x57c   : > { %v7733_v61 = vpop.eup %4936  ;;  %v3536_v32 = vmul.f32 1.442695, %v3489_v52  ;;  %4942 = vlog2.f32 %v3592_v35  ;;  %v3632_v24 = vadd.f32 1.0, %v3631_v60  ;;  %vm7767_vm4 = vcmp.lt.f32.partialorder %v3634_v44, 0.0004427343 }
 0x57d   : > { %4944 = vlog2.f32 %v3628_v6  ;;  %v3637_v8 = vadd.f32 1.0, %v7733_v61  ;;  %v7741_v40 = vpop.eup %4938  ;;  %v3640_v0 = vmul.f32 -0.5, %v7733_v61  ;;  %v3643_v23 = vand.u32 2147483647, %v7733_v61 }
 0x57e   : > { %4946 = vpow2.f32 %v3536_v32  ;;  %v3565_v48 = vadd.f32 1.0, %v7741_v40  ;;  %v3560_v37 = vadd.f32 1.0, %v3559_v7  ;;  %v3597_v35 = vmul.f32 %v7703_v9, %v3596_v3 }
 0x57f   : > { %4948 = vlog2.f32 %v3601_v51  ;;  %v3641_v26 = vadd.f32 1.0, %v3640_v0  ;;  %v3633_v6 = vmul.f32 %v4933_v11, %v3632_v24  ;;  %v3568_v32 = vmul.f32 -0.5, %v7741_v40 }
 0x580   : > { %4448 = vmatmul.msk.f32.gmra.mxu1 %vm1092_vm6, %v7712_v2  ;;  %4950 = vlog2.f32 %v3637_v8  ;;  %vm7778_vm5 = vcmp.lt.f32.partialorder %v3643_v23, 0.0004427343  ;;  %vm7789_vm8 = vcmp.lt.f32.partialorder %v3562_v29, 0.0004427343  ;;  %vm3505_vm0 = vcmp.gt.f32.partialorder %v7724_v1, 20.0 }
 0x581   : > { %4445 = vmatmul.msk.f32.gmra.mxu0 %vm1092_vm6, %v7738_v63  ;;  %v4941_v10 = vpop.eup %4940  ;;  %4952 = vlog2.f32 %v3556_v55  ;;  %v3642_v11 = vmul.f32 %v7733_v61, %v3641_v26  ;;  %v3569_v44 = vadd.f32 1.0, %v3568_v32  ;;  %v3571_v61 = vand.u32 2147483647, %v7741_v40 }
 0x582   : > { %v4943_v56 = vpop.eup %4942  ;;  %v3664_v54 = vadd.f32 1.0, %v4941_v10  ;;  %v3667_v58 = vmul.f32 -0.5, %v4941_v10  ;;  %v3670_v52 = vand.u32 2147483647, %v4941_v10 }
 0x583   : > { %v4945_v20 = vpop.eup %4944  ;;  %v3594_v51 = vmul.f32 0.6931472, %v4943_v56  ;;  %v3570_v26 = vmul.f32 %v7741_v40, %v3569_v44  ;;  %vm3572_vm10 = vcmp.lt.f32.partialorder %v3571_v61, 0.0004427343 }
 0x584   : > { %v4947_v14 = vpop.eup %4946  ;;  %4954 = vlog2.f32 %v3664_v54  ;;  %v3630_v19 = vmul.f32 0.6931472, %v4945_v20  ;;  %v3668_v22 = vadd.f32 1.0, %v3667_v58  ;;  %vm3671_vm7 = vcmp.lt.f32.partialorder %v3670_v52, 0.0004427343 }
 0x585   : > { %v4949_v21 = vpop.eup %4948  ;;  %v3673_v59 = vadd.f32 1.0, %v4947_v14  ;;  %4956 = vlog2.f32 %v3565_v48  ;;  %v3676_v16 = vmul.f32 -0.5, %v4947_v14  ;;  %v3561_v48 = vmul.f32 %v7730_v27, %v3560_v37 }
 0x586   : > { %v4951_v31 = vpop.eup %4950  ;;  %v3603_v9 = vmul.f32 0.6931472, %v4949_v21  ;;  %v3636_v42 = vsel %vm7767_vm4, %v3633_v6, %v3630_v19  ;;  %v3669_v0 = vmul.f32 %v4941_v10, %v3668_v22  ;;  %v3679_v7 = vand.u32 2147483647, %v4947_v14 }
 0x587   : > { %4958 = vlog2.f32 %v3673_v59  ;;  %v4953_v53 = vpop.eup %4952  ;;  %v3639_v8 = vmul.f32 0.6931472, %v4951_v31  ;;  %v3677_v25 = vadd.f32 1.0, %v3676_v16  ;;  %v3600_v58 = vsel %vm7755_vm2, %v3597_v35, %v3594_v51 }
 0x588   : > { %4449 = vmatmul.msk.f32.gmra.mxu1 %vm1092_vm6, %v7738_v63  ;;  %v3558_v20 = vmul.f32 0.6931472, %v4953_v53  ;;  %v3692_v21 = vmul.f32 0.01, %v3636_v42  ;;  %vm3680_vm13 = vcmp.lt.f32.partialorder %v3679_v7, 0.0004427343 }
 0x589   : > { %4446 = vmatmul.msk.f32.gmra.mxu0 %vm1092_vm6, %v7763_v18  ;;  %v3645_v27 = vsel %vm7778_vm5, %v3642_v11, %v3639_v8  ;;  %v3678_v23 = vmul.f32 %v4947_v14, %v3677_v25  ;;  %v3688_v17 = vmul.f32 0.01, %v3600_v58  ;;  %v3609_v14 = vsel %vm7796_vm9, %v3606_v38, %v3603_v9 }
 0x58a   : > { %v4955_v60 = vpop.eup %4954  ;;  %v3564_v31 = vsel %vm7789_vm8, %v3561_v48, %v3558_v20  ;;  %v3693_v37 = vmul.f32 0.01, %v3645_v27  ;;  %v3708_v22 = vsel %vm3500_vm1, %v7654_v33, %v3692_v21  ;;  %v3689_v49 = vmul.f32 0.01, %v3609_v14 }
 0x58b   : > { %v4957_v56 = vpop.eup %4956  ;;  %v3666_v54 = vmul.f32 0.6931472, %v4955_v60  ;;  %v3684_v62 = vmul.f32 0.01, %v3564_v31  ;;  %v3704_v40 = vsel %vm3496_vm11, %v7605_v28, %v3688_v17  ;;  %vm3493_vm2 = vcmp.gt.f32.partialorder %v7657_v36, 20.0 }
 0x58c   : > { %v3567_v47 = vmul.f32 0.6931472, %v4957_v56  ;;  %v3709_v53 = vsel %vm3501_vm12, %v7677_v45, %v3693_v37 }
 0x58d   : > { %v4959_v3 = vpop.eup %4958  ;;  %v3672_v24 = vsel %vm3671_vm7, %v3669_v0, %v3666_v54  ;;  %v3700_v33 = vsel %vm3492_vm14, %v7593_v41, %v3684_v62  ;;  %v7841_v41 = vpop.permute.xlu1 %3739 }
 0x58e   : > { %v3696_v10 = vmul.f32 0.01, %v3672_v24  ;;  %v3675_v59 = vmul.f32 0.6931472, %v4959_v3  ;;  %v3573_v35 = vsel %vm3572_vm10, %v3570_v26, %v3567_v47 }
 0x58f   : > { %v3685_v43 = vmul.f32 0.01, %v3573_v35 }
 0x590   : > { %4450 = vmatmul.msk.f32.gmra.mxu1 %vm1092_vm6, %v7763_v18  ;;  %v3712_v16 = vsel %vm3504_vm3, %v7700_v15, %v3696_v10  ;;  %v3681_v19 = vsel %vm3680_vm13, %v3678_v23, %v3675_v59 }
 0x591   : > { %3824 = vmatpush.msra.mxu2 %v3712_v16  ;;  %v3697_v39 = vmul.f32 0.01, %v3681_v19  ;;  %v3701_v28 = vsel %vm3493_vm2, %v7627_v34, %v3685_v43 }
 0x593   : > { %v3713_v15 = vsel %vm3505_vm0, %v7716_v13, %v3697_v39  ;;  %3825 = vmatpush.msra.mxu2 %v3708_v22  ;;  %v3705_v13 = vsel %vm3497_vm15, %v7620_v46, %v3689_v49 }
 0x594   : > { %3853 = vmatpush.msra.mxu3 %v3713_v15 }
 0x595   : > { %3826 = vmatpush.msra.mxu2 %v3704_v40  ;;  %v7848_v36 = vpop.permute.xlu1 %3724 }
 0x596   : > { %3854 = vmatpush.msra.mxu3 %v3709_v53 }
 0x597   : > { %3827 = vmatpush.msra.mxu2 %v3700_v33 }
 0x598   : > { %3855 = vmatpush.msra.mxu3 %v3705_v13  ;;  %4451 = vmatmul.msk.f32.vlgmr.msra.gmra.mxu2 %vm1092_vm6, %v7674_v30 }
 0x59a   : > { %3856 = vmatpush.msra.mxu3 %v3701_v28 }
 0x59b   : > { %4455 = vmatmul.msk.f32.vlgmr.msra.gmra.mxu3 %vm1092_vm6, %v7674_v30 }
 0x5a0   : > { %4452 = vmatmul.msk.f32.gmra.mxu2 %vm1092_vm6, %v7712_v2 }
 0x5a3   : > { %4456 = vmatmul.msk.f32.gmra.mxu3 %vm1092_vm6, %v7712_v2 }
 0x5a8   : > { %4453 = vmatmul.msk.f32.gmra.mxu2 %vm1092_vm6, %v7738_v63 }
 0x5ab   : > { %4457 = vmatmul.msk.f32.gmra.mxu3 %vm1092_vm6, %v7738_v63 }
 0x5b0   : > { %4454 = vmatmul.msk.f32.gmra.mxu2 %vm1092_vm6, %v7763_v18 }
 0x5b3   : > { %4458 = vmatmul.msk.f32.gmra.mxu3 %vm1092_vm6, %v7763_v18 }
 0x5ee   : > { %v3771_v4 = vpop.f32.mrf.mxu0 }
 0x5ef   : > { %v7851_v30 = vadd.f32 %v3771_v4, %v7848_v36 }
 0x5f1   : > { %v7859_v2 = vmul.f32 100.0, %v7851_v30 }
 0x5f3   : > { %v3886_v32 = vmin.f32 %v7859_v2, 20.0  ;;  %vm3902_vm9 = vcmp.gt.f32.partialorder %v7859_v2, 20.0 }
 0x5f5   : > { %v3800_v46 = vpop.f32.mrf.mxu1  ;;  %v3918_v25 = vmul.f32 1.442695, %v3886_v32 }
 0x5f6   : > { %v3774_v34 = vpop.f32.mrf.mxu0  ;;  %v7862_v1 = vadd.f32 %v3800_v46, %v7848_v36 }
 0x5f7   : > { %v7846_v57 = vadd.f32 %v3774_v34, %v7843_v5 }
 0x5f8   : > { %v7873_v8 = vmul.f32 100.0, %v7862_v1 }
 0x5f9   : > { %v7854_v45 = vmul.f32 100.0, %v7846_v57 }
 0x5fa   : > { %v3887_v42 = vmin.f32 %v7873_v8, 20.0 }
 0x5fb   : > { %v3890_v52 = vmin.f32 %v7854_v45, 20.0  ;;  %vm3906_vm7 = vcmp.gt.f32.partialorder %v7854_v45, 20.0 }
 0x5fc   : > { %v3920_v20 = vmul.f32 1.442695, %v3887_v42 }
 0x5fd   : > { %v3803_v63 = vpop.f32.mrf.mxu1  ;;  %v3926_v38 = vmul.f32 1.442695, %v3890_v52 }
 0x5fe   : > { %v3777_v18 = vpop.f32.mrf.mxu0  ;;  %v7866_v6 = vadd.f32 %v3803_v63, %v7843_v5 }
 0x5ff   : > { %v7869_v51 = vadd.f32 %v3777_v18, %v7856_v50  ;;  %4960 = vpow2.f32 %v3926_v38 }
 0x600   : > { %v7879_v9 = vmul.f32 100.0, %v7866_v6 }
 0x601   : > { %v7876_v55 = vmul.f32 100.0, %v7869_v51 }
 0x602   : > { %v3891_v48 = vmin.f32 %v7879_v9, 20.0  ;;  %vm3907_vm2 = vcmp.gt.f32.partialorder %v7879_v9, 20.0 }
 0x603   : > { %v3894_v60 = vmin.f32 %v7876_v55, 20.0  ;;  %vm3910_vm1 = vcmp.gt.f32.partialorder %v7876_v55, 20.0 }
 0x604   : > { %v3928_v44 = vmul.f32 1.442695, %v3891_v48 }
 0x605   : > { %v3934_v11 = vmul.f32 1.442695, %v3894_v60  ;;  %v3806_v56 = vpop.f32.mrf.mxu1  ;;  %v7898_v21 = vpop.eup %4960 }
 0x606   : > { %v3780_v54 = vpop.f32.mrf.mxu0  ;;  %v7885_v0 = vadd.f32 %v3806_v56, %v7856_v50  ;;  %v3986_v31 = vadd.f32 1.0, %v7898_v21  ;;  %v3989_v43 = vmul.f32 -0.5, %v7898_v21 }
 0x607   : > { %v7888_v7 = vadd.f32 %v3780_v54, %v7841_v41  ;;  %4962 = vpow2.f32 %v3934_v11 }
 0x608   : > { %4964 = vpow2.f32 %v3918_v25  ;;  %v7891_v58 = vmul.f32 100.0, %v7885_v0  ;;  %v3990_v25 = vadd.f32 1.0, %v3989_v43 }
 0x609   : > { %v7894_v12 = vmul.f32 100.0, %v7888_v7  ;;  %4966 = vpow2.f32 %v3920_v20 }
 0x60a   : > { %v3895_v3 = vmin.f32 %v7891_v58, 20.0  ;;  %4968 = vpow2.f32 %v3928_v44  ;;  %vm3911_vm15 = vcmp.gt.f32.partialorder %v7891_v58, 20.0 }
 0x60b   : > { %v3898_v24 = vmin.f32 %v7894_v12, 20.0  ;;  %vm3914_vm4 = vcmp.gt.f32.partialorder %v7894_v12, 20.0 }
 0x60c   : > { %v3936_v27 = vmul.f32 1.442695, %v3895_v3 }
 0x60d   : > { %v3942_v61 = vmul.f32 1.442695, %v3898_v24  ;;  %v4963_v10 = vpop.eup %4962  ;;  %v3809_v59 = vpop.f32.mrf.mxu1  ;;  %v3992_v24 = vand.u32 2147483647, %v7898_v21 }
 0x60e   : > { %v7900_v23 = vpop.eup %4964  ;;  %4970 = vpow2.f32 %v3936_v27  ;;  %v7903_v47 = vadd.f32 %v3809_v59, %v7841_v41  ;;  %v4022_v17 = vadd.f32 1.0, %v4963_v10  ;;  %v4025_v22 = vmul.f32 -0.5, %v4963_v10 }
 0x60f   : > { %4972 = vpow2.f32 %v3942_v61  ;;  %v3950_v16 = vadd.f32 1.0, %v7900_v23  ;;  %v7910_v19 = vpop.eup %4966  ;;  %v3953_v62 = vmul.f32 -0.5, %v7900_v23  ;;  %v3956_v49 = vand.u32 2147483647, %v7900_v23 }
 0x610   : > { %v7906_v29 = vmul.f32 100.0, %v7903_v47  ;;  %4974 = vlog2.f32 %v4022_v17  ;;  %v7913_v26 = vpop.eup %4968  ;;  %v3959_v40 = vadd.f32 1.0, %v7910_v19  ;;  %v3962_v33 = vmul.f32 -0.5, %v7910_v19 }
 0x611   : > { %4976 = vlog2.f32 %v3986_v31  ;;  %v3995_v4 = vadd.f32 1.0, %v7913_v26  ;;  %v4026_v46 = vadd.f32 1.0, %v4025_v22  ;;  %v3954_v34 = vadd.f32 1.0, %v3953_v62 }
 0x612   : > { %v3899_v14 = vmin.f32 %v7906_v29, 20.0  ;;  %4978 = vlog2.f32 %v3950_v16  ;;  %v4028_v63 = vand.u32 2147483647, %v4963_v10  ;;  %v3998_v18 = vmul.f32 -0.5, %v7913_v26 }
 0x613   : > { %vm7925_vm3 = vcmp.lt.f32.partialorder %v3956_v49, 0.0004427343  ;;  %v3965_v32 = vand.u32 2147483647, %v7910_v19  ;;  %v7930_v42 = vadd.f32 1.0, %v3962_v33  ;;  %v4027_v3 = vmul.f32 %v4963_v10, %v4026_v46 }
 0x614   : > { %v7915_v39 = vpop.eup %4970  ;;  %v3944_v37 = vmul.f32 1.442695, %v3899_v14  ;;  %vm7936_vm5 = vcmp.lt.f32.partialorder %v4028_v63, 0.0004427343  ;;  %v3999_v17 = vadd.f32 1.0, %v3998_v18  ;;  %v3991_v22 = vmul.f32 %v7898_v21, %v3990_v25 }
 0x615   : > { %v4973_v35 = vpop.eup %4972  ;;  %v4031_v15 = vadd.f32 1.0, %v7915_v39  ;;  %v4034_v54 = vmul.f32 -0.5, %v7915_v39  ;;  %vm7944_vm13 = vcmp.lt.f32.partialorder %v3992_v24, 0.0004427343  ;;  %v4001_v33 = vand.u32 2147483647, %v7913_v26 }
 0x616   : > { %4980 = vpow2.f32 %v3944_v37  ;;  %v4058_v53 = vadd.f32 1.0, %v4973_v35  ;;  %v4975_v13 = vpop.eup %4974  ;;  %v4061_v28 = vmul.f32 -0.5, %v4973_v35  ;;  %v4064_v44 = vand.u32 2147483647, %v4973_v35 }
 0x617   : > { %v4977_v38 = vpop.eup %4976  ;;  %v4024_v60 = vmul.f32 0.6931472, %v4975_v13  ;;  %v3955_v13 = vmul.f32 %v7900_v23, %v3954_v34  ;;  %v4037_v46 = vand.u32 2147483647, %v7915_v39  ;;  %vm7954_vm10 = vcmp.lt.f32.partialorder %v3965_v32, 0.0004427343 }
 0x618   : > { %4982 = vlog2.f32 %v4058_v53  ;;  %v4979_v11 = vpop.eup %4978  ;;  %v4062_v56 = vadd.f32 1.0, %v4061_v28  ;;  %v3988_v59 = vmul.f32 0.6931472, %v4977_v38  ;;  %vm4065_vm8 = vcmp.lt.f32.partialorder %v4064_v44, 0.0004427343 }
 0x619   : > { %4984 = vlog2.f32 %v4031_v15  ;;  %v4030_v37 = vsel %vm7936_vm5, %v4027_v3, %v4024_v60  ;;  %v3952_v62 = vmul.f32 0.6931472, %v4979_v11  ;;  %vm7974_vm0 = vcmp.lt.f32.partialorder %v4037_v46, 0.0004427343 }
 0x61a   : > { %4986 = vlog2.f32 %v3959_v40  ;;  %v4063_v49 = vmul.f32 %v4973_v35, %v4062_v56  ;;  %v4035_v40 = vadd.f32 1.0, %v4034_v54  ;;  %v3994_v35 = vsel %vm7944_vm13, %v3991_v22, %v3988_v59 }
 0x61b   : > { %v3829_v48 = vpop.f32.mrf.mxu2  ;;  %4988 = vlog2.f32 %v3995_v4  ;;  %v4102_v4 = vmul.f32 0.01, %v4030_v37  ;;  %v3958_v23 = vsel %vm7925_vm3, %v3955_v13, %v3952_v62  ;;  %v4000_v56 = vmul.f32 %v7913_v26, %v3999_v17 }
 0x61c   : > { %v4981_v20 = vpop.eup %4980  ;;  %v4036_v11 = vmul.f32 %v7915_v39, %v4035_v40  ;;  %v4098_v3 = vmul.f32 0.01, %v3994_v35  ;;  %v7969_v52 = vadd.f32 %v3829_v48, %v7848_v36  ;;  %v4094_v12 = vmul.f32 0.01, %v3958_v23 }
 0x61d   : > { %v4067_v27 = vadd.f32 1.0, %v4981_v20  ;;  %v4070_v14 = vmul.f32 -0.5, %v4981_v20  ;;  %v4073_v34 = vand.u32 2147483647, %v4981_v20  ;;  %v4118_v39 = vsel %vm3910_vm1, %v7869_v51, %v4102_v4 }
 0x61e   : > { %v4983_v31 = vpop.eup %4982  ;;  %v3858_v16 = vpop.f32.mrf.mxu3  ;;  %vm7986_vm12 = vcmp.lt.f32.partialorder %v4001_v33, 0.0004427343  ;;  %v3964_v55 = vmul.f32 %v7910_v19, %v7930_v42  ;;  %v4114_v37 = vsel %vm3906_vm7, %v7846_v57, %v4098_v3  ;;  %vm3915_vm14 = vcmp.gt.f32.partialorder %v7906_v29, 20.0 }
 0x61f   : > { %v4985_v15 = vpop.eup %4984  ;;  %v4060_v10 = vmul.f32 0.6931472, %v4983_v31  ;;  %4990 = vlog2.f32 %v4067_v27  ;;  %v4071_v38 = vadd.f32 1.0, %v4070_v14  ;;  %vm4074_vm11 = vcmp.lt.f32.partialorder %v4073_v34, 0.0004427343 }
 0x620   : > { %v4987_v53 = vpop.eup %4986  ;;  %v4033_v60 = vmul.f32 0.6931472, %v4985_v15  ;;  %v8004_v62 = vadd.f32 %v3858_v16, %v7848_v36  ;;  %v8011_v57 = vmul.f32 100.0, %v7969_v52  ;;  %v4110_v45 = vsel %vm3902_vm9, %v7851_v30, %v4094_v12 }
 0x621   : > { %v4989_v28 = vpop.eup %4988  ;;  %v4066_v21 = vsel %vm4065_vm8, %v4063_v49, %v4060_v10  ;;  %v3961_v54 = vmul.f32 0.6931472, %v4987_v53  ;;  %v4072_v61 = vmul.f32 %v4981_v20, %v4071_v38  ;;  %vm3903_vm3 = vcmp.gt.f32.partialorder %v7873_v8, 20.0 }
 0x622   : > { %v4106_v18 = vmul.f32 0.01, %v4066_v21  ;;  %v3997_v24 = vmul.f32 0.6931472, %v4989_v28  ;;  %v4039_v48 = vsel %vm7974_vm0, %v4036_v11, %v4033_v60  ;;  %v8027_v30 = vmul.f32 100.0, %v8004_v62 }
 0x623   : > { %v3832_v25 = vpop.f32.mrf.mxu2  ;;  %v4103_v42 = vmul.f32 0.01, %v4039_v48  ;;  %v3967_v10 = vsel %vm7954_vm10, %v3964_v55, %v3961_v54  ;;  %v3888_v43 = vmin.f32 %v8011_v57, 20.0 }
 0x624   : > { %v4122_v32 = vsel %vm3914_vm4, %v7888_v7, %v4106_v18  ;;  %v7966_v44 = vadd.f32 %v3832_v25, %v7843_v5  ;;  %v4003_v22 = vsel %vm7986_vm12, %v4000_v56, %v3997_v24  ;;  %v4095_v29 = vmul.f32 0.01, %v3967_v10 }
 0x625   : > { %v4991_v27 = vpop.eup %4990  ;;  %4148 = vmatpush.msrb.mxu0 %v4122_v32  ;;  %v4099_v49 = vmul.f32 0.01, %v4003_v22  ;;  %v3889_v4 = vmin.f32 %v8027_v30, 20.0  ;;  %v3922_v35 = vmul.f32 1.442695, %v3888_v43 }
 0x626   : > { %v4069_v7 = vmul.f32 0.6931472, %v4991_v27  ;;  %v7979_v59 = vmul.f32 100.0, %v7966_v44  ;;  %v3861_v17 = vpop.f32.mrf.mxu3  ;;  %v4111_v9 = vsel %vm3903_vm3, %v7862_v1, %v4095_v29 }
 0x627   : > { %v7984_v31 = vadd.f32 %v3861_v17, %v7843_v5  ;;  %4149 = vmatpush.msrb.mxu0 %v4118_v39  ;;  %v8001_v5 = vld [vmem:[%s8191_s18] sm:$0x1f]  ;;  %v4115_v28 = vsel %vm3907_vm2, %v7866_v6, %v4099_v49  ;;  %v3924_v18 = vmul.f32 1.442695, %v3889_v4  ;;  %vm3904_vm2 = vcmp.gt.f32.partialorder %v8011_v57, 20.0 }
 0x628   : > { %v4075_v20 = vsel %vm4074_vm11, %v4072_v61, %v4069_v7  ;;  %v3892_v14 = vmin.f32 %v7979_v59, 20.0 }
 0x629   : > { %v4107_v15 = vmul.f32 0.01, %v4075_v20  ;;  %v8007_v19 = vmul.f32 100.0, %v7984_v31  ;;  %4150 = vmatpush.msrb.mxu0 %v4114_v37 }
 0x62a   : > { %v3930_v53 = vmul.f32 1.442695, %v3892_v14 }
 0x62b   : > { %v4123_v36 = vsel %vm3915_vm14, %v7903_v47, %v4107_v15  ;;  %v3893_v16 = vmin.f32 %v8007_v19, 20.0  ;;  %4151 = vmatpush.msrb.mxu0 %v4110_v45  ;;  %v3835_v40 = vpop.f32.mrf.mxu2  ;;  %v4119_v47 = vsel %vm3911_vm15, %v7885_v0, %v4103_v42  ;;  %vm3908_vm14 = vcmp.gt.f32.partialorder %v7979_v59, 20.0 }
 0x62c   : > { %4168 = vmatpush.msrb.mxu1 %v4123_v36  ;;  %4459 = vmatmul.msk.f32.vlgmr.msrb.gmra.mxu0 %vm1092_vm6, %v8001_v5  ;;  %v8024_v2 = vadd.f32 %v3835_v40, %v7856_v50  ;;  %4992 = vpow2.f32 %v3930_v53  ;;  %vm3909_vm3 = vcmp.gt.f32.partialorder %v8007_v19, 20.0  ;;  %v4131_v19 = vpop.permute.xlu2 %4130 }
 0x62d   : > { %v3932_v13 = vmul.f32 1.442695, %v3893_v16 }
 0x62e   : > { %4169 = vmatpush.msrb.mxu1 %v4119_v47  ;;  %v8033_v33 = vmul.f32 100.0, %v8024_v2  ;;  %v3864_v58 = vpop.f32.mrf.mxu3 }
 0x62f   : > { %v8037_v21 = vadd.f32 %v3864_v58, %v7856_v50  ;;  %4994 = vpow2.f32 %v3932_v13 }
 0x630   : > { %4170 = vmatpush.msrb.mxu1 %v4115_v28  ;;  %v3896_v0 = vmin.f32 %v8033_v33, 20.0  ;;  %vm3912_vm7 = vcmp.gt.f32.partialorder %v8033_v33, 20.0 }
 0x631   : > { %v8044_v46 = vmul.f32 100.0, %v8037_v21 }
 0x632   : > { %4171 = vmatpush.msrb.mxu1 %v4111_v9  ;;  %v3938_v63 = vmul.f32 1.442695, %v3896_v0  ;;  %v8052_v1 = vpop.eup %4992 }
 0x633   : > { %4460 = vmatmul.msk.f32.vlgmr.msrb.gmra.mxu1 %vm1092_vm6, %v8001_v5  ;;  %v3897_v50 = vmin.f32 %v8044_v46, 20.0  ;;  %v3838_v6 = vpop.f32.mrf.mxu2  ;;  %v4004_v54 = vadd.f32 1.0, %v8052_v1  ;;  %v4007_v48 = vmul.f32 -0.5, %v8052_v1  ;;  %v4010_v55 = vand.u32 2147483647, %v8052_v1 }
 0x634   : > { %4996 = vpow2.f32 %v3938_v63  ;;  %v8050_v8 = vadd.f32 %v3838_v6, %v7841_v41  ;;  %vm3913_vm15 = vcmp.gt.f32.partialorder %v8044_v46, 20.0 }
 0x635   : > { %v3940_v38 = vmul.f32 1.442695, %v3897_v50  ;;  %4998 = vpow2.f32 %v3922_v35  ;;  %v8061_v11 = vpop.eup %4994  ;;  %v4008_v49 = vadd.f32 1.0, %v4007_v48  ;;  %vm8080_vm4 = vcmp.lt.f32.partialorder %v4010_v55, 0.0004427343 }
 0x636   : > { %v8055_v60 = vmul.f32 100.0, %v8050_v8  ;;  %v3867_v23 = vpop.f32.mrf.mxu3  ;;  %v4016_v14 = vmul.f32 -0.5, %v8061_v11  ;;  %v4019_v43 = vand.u32 2147483647, %v8061_v11 }
 0x637   : > { %5000 = vpow2.f32 %v3940_v38  ;;  %v8058_v34 = vadd.f32 %v3867_v23, %v7841_v41  ;;  %v4013_v41 = vadd.f32 1.0, %v8061_v11  ;;  %v4009_v38 = vmul.f32 %v8052_v1, %v4008_v49 }
 0x638   : > { %v3900_v25 = vmin.f32 %v8055_v60, 20.0  ;;  %5002 = vpow2.f32 %v3924_v18  ;;  %v4017_v0 = vadd.f32 1.0, %v4016_v14  ;;  %vm3916_vm1 = vcmp.gt.f32.partialorder %v8055_v60, 20.0 }
 0x639   : > { %v8064_v56 = vmul.f32 100.0, %v8058_v34  ;;  %vm8110_vm0 = vcmp.lt.f32.partialorder %v4019_v43, 0.0004427343 }
 0x63a   : > { %v4997_v32 = vpop.eup %4996  ;;  %v3946_v3 = vmul.f32 1.442695, %v3900_v25 }
 0x63b   : > { %v3901_v24 = vmin.f32 %v8064_v56, 20.0  ;;  %v4040_v27 = vadd.f32 1.0, %v4997_v32  ;;  %v8068_v39 = vpop.eup %4998  ;;  %v4043_v51 = vmul.f32 -0.5, %v4997_v32  ;;  %v4046_v16 = vand.u32 2147483647, %v4997_v32 }
 0x63c   : > { %5004 = vpow2.f32 %v3946_v3  ;;  %v3968_v17 = vadd.f32 1.0, %v8068_v39  ;;  %v3971_v45 = vmul.f32 -0.5, %v8068_v39  ;;  %v3974_v40 = vand.u32 2147483647, %v8068_v39 }
 0x63d   : > { %v5001_v26 = vpop.eup %5000  ;;  %v3948_v12 = vmul.f32 1.442695, %v3901_v24  ;;  %5006 = vlog2.f32 %v4004_v54  ;;  %v4044_v47 = vadd.f32 1.0, %v4043_v51  ;;  %vm8086_vm5 = vcmp.lt.f32.partialorder %v4046_v16, 0.0004427343 }
 0x63e   : > { %5008 = vlog2.f32 %v4040_v27  ;;  %v4049_v7 = vadd.f32 1.0, %v5001_v26  ;;  %v8071_v61 = vpop.eup %5002  ;;  %v4052_v42 = vmul.f32 -0.5, %v5001_v26  ;;  %v4055_v28 = vand.u32 2147483647, %v5001_v26 }
 0x63f   : > { %5010 = vpow2.f32 %v3948_v12  ;;  %v3977_v37 = vadd.f32 1.0, %v8071_v61  ;;  %v3972_v50 = vadd.f32 1.0, %v3971_v45  ;;  %v4045_v54 = vmul.f32 %v4997_v32, %v4044_v47 }
 0x640   : > { %5012 = vlog2.f32 %v4013_v41  ;;  %v4053_v63 = vadd.f32 1.0, %v4052_v42  ;;  %v3980_v24 = vmul.f32 -0.5, %v8071_v61  ;;  %vm8093_vm8 = vcmp.lt.f32.partialorder %v4055_v28, 0.0004427343 }
 0x641   : > { %5014 = vlog2.f32 %v4049_v7  ;;  %v4018_v7 = vmul.f32 %v8061_v11, %v4017_v0  ;;  %v3973_v32 = vmul.f32 %v8068_v39, %v3972_v50  ;;  %vm8103_vm9 = vcmp.lt.f32.partialorder %v3974_v40, 0.0004427343 }
 0x642   : > { %v5005_v20 = vpop.eup %5004  ;;  %5016 = vlog2.f32 %v3968_v17  ;;  %v4054_v51 = vmul.f32 %v5001_v26, %v4053_v63  ;;  %v3981_v11 = vadd.f32 1.0, %v3980_v24  ;;  %v3983_v26 = vand.u32 2147483647, %v8071_v61 }
 0x643   : > { %v5007_v22 = vpop.eup %5006  ;;  %v4076_v15 = vadd.f32 1.0, %v5005_v20  ;;  %v4079_v36 = vmul.f32 -0.5, %v5005_v20  ;;  %v4082_v25 = vand.u32 2147483647, %v5005_v20  ;;  %vm3917_vm12 = vcmp.gt.f32.partialorder %v8064_v56, 20.0 }
 0x644   : > { %v5009_v10 = vpop.eup %5008  ;;  %v4006_v3 = vmul.f32 0.6931472, %v5007_v22  ;;  %vm3984_vm11 = vcmp.lt.f32.partialorder %v3983_v26, 0.0004427343 }
 0x645   : > { %v5011_v53 = vpop.eup %5010  ;;  %5018 = vlog2.f32 %v4076_v15  ;;  %v4042_v35 = vmul.f32 0.6931472, %v5009_v10  ;;  %v4080_v6 = vadd.f32 1.0, %v4079_v36  ;;  %vm4083_vm13 = vcmp.lt.f32.partialorder %v4082_v25, 0.0004427343 }
 0x646   : > { %v5013_v58 = vpop.eup %5012  ;;  %v4085_v13 = vadd.f32 1.0, %v5011_v53  ;;  %5020 = vlog2.f32 %v3977_v37  ;;  %v4088_v9 = vmul.f32 -0.5, %v5011_v53  ;;  %v4091_v22 = vand.u32 2147483647, %v5011_v53 }
 0x647   : > { %v5015_v4 = vpop.eup %5014  ;;  %v4015_v12 = vmul.f32 0.6931472, %v5013_v58  ;;  %v4048_v1 = vsel %vm8086_vm5, %v4045_v54, %v4042_v35  ;;  %v4081_v37 = vmul.f32 %v5005_v20, %v4080_v6  ;;  %v4012_v42 = vsel %vm8080_vm4, %v4009_v38, %v4006_v3 }
 0x648   : > { %5022 = vlog2.f32 %v4085_v13  ;;  %v5017_v23 = vpop.eup %5016  ;;  %v4051_v27 = vmul.f32 0.6931472, %v5015_v4  ;;  %v4089_v48 = vadd.f32 1.0, %v4088_v9  ;;  %v4104_v16 = vmul.f32 0.01, %v4048_v1 }
 0x649   : > { %v3970_v15 = vmul.f32 0.6931472, %v5017_v23  ;;  %vm4092_vm10 = vcmp.lt.f32.partialorder %v4091_v22, 0.0004427343  ;;  %v4100_v29 = vmul.f32 0.01, %v4012_v42  ;;  %v4021_v4 = vsel %vm8110_vm0, %v4018_v7, %v4015_v12 }
 0x64a   : > { %v4057_v39 = vsel %vm8093_vm8, %v4054_v51, %v4051_v27  ;;  %v4090_v47 = vmul.f32 %v5011_v53, %v4089_v48  ;;  %v3982_v53 = vmul.f32 %v8071_v61, %v3981_v11  ;;  %v4120_v43 = vsel %vm3912_vm7, %v8024_v2, %v4104_v16 }
 0x64b   : > { %v5019_v17 = vpop.eup %5018  ;;  %v3976_v13 = vsel %vm8103_vm9, %v3973_v32, %v3970_v15  ;;  %v4105_v35 = vmul.f32 0.01, %v4057_v39  ;;  %v4101_v60 = vmul.f32 0.01, %v4021_v4  ;;  %v4116_v61 = vsel %vm3908_vm14, %v7966_v44, %v4100_v29 }
 0x64c   : > { %v5021_v55 = vpop.eup %5020  ;;  %v4078_v14 = vmul.f32 0.6931472, %v5019_v17  ;;  %v4096_v63 = vmul.f32 0.01, %v3976_v13  ;;  %vm3905_vm4 = vcmp.gt.f32.partialorder %v8027_v30, 20.0 }
 0x64d   : > { %v3979_v58 = vmul.f32 0.6931472, %v5021_v55  ;;  %v4121_v56 = vsel %vm3913_vm15, %v8037_v21, %v4105_v35  ;;  %v4117_v59 = vsel %vm3909_vm3, %v7984_v31, %v4101_v60 }
 0x64e   : > { %v5023_v10 = vpop.eup %5022  ;;  %v4084_v36 = vsel %vm4083_vm13, %v4081_v37, %v4078_v14  ;;  %v4112_v33 = vsel %vm3904_vm2, %v7969_v52, %v4096_v63 }
 0x64f   : > { %v4108_v20 = vmul.f32 0.01, %v4084_v36  ;;  %v4087_v49 = vmul.f32 0.6931472, %v5023_v10  ;;  %v3985_v50 = vsel %vm3984_vm11, %v3982_v53, %v3979_v58 }
 0x650   : > { %v4097_v2 = vmul.f32 0.01, %v3985_v50 }
 0x651   : > { %v4124_v28 = vsel %vm3916_vm1, %v8050_v8, %v4108_v20  ;;  %v4093_v0 = vsel %vm4092_vm10, %v4090_v47, %v4087_v49 }
 0x652   : > { %4188 = vmatpush.msrb.mxu2 %v4124_v28  ;;  %v4109_v9 = vmul.f32 0.01, %v4093_v0  ;;  %v4113_v44 = vsel %vm3905_vm4, %v8004_v62, %v4097_v2 }
 0x654   : > { %v4125_v8 = vsel %vm3917_vm12, %v8058_v34, %v4109_v9  ;;  %4189 = vmatpush.msrb.mxu2 %v4120_v43 }
 0x655   : > { %4208 = vmatpush.msrb.mxu3 %v4125_v8 }
 0x656   : > { %4190 = vmatpush.msrb.mxu2 %v4116_v61 }
 0x657   : > { %4209 = vmatpush.msrb.mxu3 %v4121_v56 }
 0x658   : > { %4191 = vmatpush.msrb.mxu2 %v4112_v33 }
 0x659   : > { %4210 = vmatpush.msrb.mxu3 %v4117_v59  ;;  %4461 = vmatmul.msk.f32.vlgmr.msrb.gmra.mxu2 %vm1092_vm6, %v8001_v5 }
 0x65b   : > { %4211 = vmatpush.msrb.mxu3 %v4113_v44 }
 0x65c   : > { %4462 = vmatmul.msk.f32.vlgmr.msrb.gmra.mxu3 %vm1092_vm6, %v8001_v5 }
 0x6a9   : > { %v4153_v52 = vpop.f32.mrf.mxu0 }
 0x6aa   : > { %v4154_v57 = vadd.f32 %v4153_v52, %v4131_v19 }
 0x6ac   : > { %4216 = vst [vmem:[%s623_s24] sm:$0x1f] %v4154_v57 }
 0x6b0   : > { %v4173_v31 = vpop.f32.mrf.mxu1 }
 0x6b1   : > { %v4174_v21 = vadd.f32 %v4173_v31, %v4131_v19 }
 0x6b3   : > { %4217 = vst [vmem:[%s623_s24 + $0x8] sm:$0x1f] %v4174_v21 }
 0x6dc   : > { %v4193_v62 = vpop.f32.mrf.mxu2 }
 0x6dd   : > { %v4194_v30 = vadd.f32 %v4193_v62, %v4131_v19 }
 0x6df   : > { %4218 = vst [vmem:[%s623_s24 + $0x10] sm:$0x1f] %v4194_v30  ;;  %v4213_v5 = vpop.f32.mrf.mxu3 }
 0x6e0   : > { %v4214_v46 = vadd.f32 %v4213_v5, %v4131_v19 }
 0x6e2   : > { %4219 = vst [vmem:[%s623_s24 + $0x18] sm:$0x1f] %v4214_v46 }
 0x6e3   : > { %5051 = shalt.err (!%p5048_p3)
}
 0x6e4   : > { %4469 = dma.vmem_to_hbm [thread:$0]  (%p5232_p5), %s4235_s27, 512, %s4237_s3, %s4221_s23  }
 0x6e5 PF: > { %s8427_s1 = sld [smem:[#allocation7_spill]] }
 0x6e6   : > { %s8428_s24 = sld [smem:[#allocation5_spill]] }
 0x6eb   : > { %p4475_p4 = scmp.ge.s32.totalorder %s8427_s1, 2 }
 0x6ec   : > { %s4248_s7 = sand.u32 1, %s8428_s24  }
 0x6ed   : > { %p4472_p7 = pnand %p4475_p4, %p5236_p6  ;;  %s4249_s2 = scalar_lea.sflag [#allocation3], %s4248_s7 }
 0x6ef   : > { %p4473_p8 = pneg %p4472_p7 }
 0x6f1   : > { %5069 = dma.done.wait (%p4473_p8), %s4249_s2, 512  }
 0x6f2   : > { %5071 = vsyncadd (%p4473_p8), %s4249_s2, 4294966784  ;;  %s8430_s24 = sld [smem:[#allocation8_spill]]  ;;  %s8433_s1 = smov %s5078_s22 }
 0x6f3   : > { %s8431_s5 = sld [smem:[#allocation6_spill]] }
 0x6f4   : > { %s8432_s23 = sld [smem:[#allocation9_spill]] }
 0x6f8   : > { %p30_p9 = scmp.ge.s32.totalorder %s8430_s24, 4  }
 0x6f9   : > { %s8434_s22 = smov %s8431_s5 }
 0x6fa   :  { %32 = sbr.rel (!%p30_p9) target bundleno = 12 (0xc), region = 137 }
 0x6ff   :  { %4255 = vsyncpa [#allocation3], 1 }
 0x700   :  { %4257 = vsyncpa [#allocation3 + $0x1], 1 }

</bundles_post_ra>
